<compile_context>
chip_gen: v7x
topology: tpu7x:2x2x1
jax: 0.10.0
libtpu: 0.0.40
codegen_flags: <defaults>
</compile_context>

<pallas_src>
import functools
import math

import jax
import jax.numpy as jnp
from jax.experimental import pallas as pl
from jax.experimental.pallas import tpu as pltpu


_LAYER_KEYS = ("wqkv", "bqkv", "wo", "bo", "g1", "be1",
               "w1", "bf1", "w2", "bf2", "g2", "be2")


# ----------------------------- Pallas kernel -------------------------------


def _layernorm(x, gamma, beta, eps=1e-5):
    mean = jnp.mean(x, axis=-1, keepdims=True)
    var = jnp.mean((x - mean) ** 2, axis=-1, keepdims=True)
    return (x - mean) * jax.lax.rsqrt(var + eps) * gamma + beta


def fused_encoder_kernel(
    x_ref,                      # (N, E)  f32, N = B*S (embedding + pos. enc.)
    wqkv_ref, bqkv_ref,         # (1, E, 3E) bf16 / (1, 1, 3E) f32
    wo_ref, bo_ref,             # (1, E, E)  bf16 / (1, 1, E)  f32
    g1_ref, be1_ref,            # (1, 1, E) f32  LayerNorm1
    w1_ref, bf1_ref,            # (1, E, F) bf16 / (1, 1, F) f32
    w2_ref, bf2_ref,            # (1, F, E) bf16 / (1, 1, E) f32
    g2_ref, be2_ref,            # (1, 1, E) f32  LayerNorm2
    wout_ref, bout_ref,         # (E, Vp) bf16 / (1, Vp) f32  vocab projection
    o_ref,                      # (N, Vp) f32  logits (written on last layer)
    h_ref,                      # VMEM scratch (N, E) f32: running activation
    *, nhead, batch, seq,
):
    layer = pl.program_id(0)
    N, E = x_ref.shape
    H, S, B = nhead, seq, batch
    dh = E // H
    scale = 1.0 / math.sqrt(dh)

    @pl.when(layer == 0)
    def _():
        h_ref[...] = x_ref[...]

    x = h_ref[...]                                   # (N, E) f32
    x_bf = x.astype(jnp.bfloat16)

    # --- QKV projection on the full (B*S, E) slab: one MXU matmul -----------
    qkv = jnp.dot(x_bf, wqkv_ref[0],
                  preferred_element_type=jnp.float32) + bqkv_ref[0]   # (N, 3E)

    # --- multi-head self-attention: batch and heads merged into one batch ---
    # (N, E) -> (B*H, S, dh) using only reshapes + minor-dim swaps (the
    # transpose class Mosaic lowers cleanly); no per-batch/per-head loops.
    def to_heads(slab):                              # slab: (N, E) f32
        t = slab.reshape(B, S, E)                    # split rows
        t = jnp.swapaxes(t, 1, 2)                    # (B, E, S)   minor swap
        t = t.reshape(B * H, dh, S)                  # split E -> (H, dh)
        return jnp.swapaxes(t, 1, 2)                 # (B*H, S, dh) minor swap

    q = to_heads(qkv[:, :E] * scale).astype(jnp.bfloat16)       # scale q, not scores
    k = to_heads(qkv[:, E:2 * E]).astype(jnp.bfloat16)
    v = to_heads(qkv[:, 2 * E:]).astype(jnp.bfloat16)

    s = jnp.einsum("zqd,zkd->zqk", q, k,
                   preferred_element_type=jnp.float32)           # (B*H, S, S)
    s = s - jnp.max(s, axis=-1, keepdims=True)
    p = jnp.exp(s)
    p = p * pl.reciprocal(jnp.sum(p, axis=-1, keepdims=True), approx=True)
    ctx = jnp.einsum("zqk,zkd->zqd", p.astype(jnp.bfloat16), v,
                     preferred_element_type=jnp.float32)         # (B*H, S, dh)

    # (B*H, S, dh) -> (N, E): inverse of to_heads
    u = jnp.swapaxes(ctx, 1, 2).reshape(B, E, S)                 # (B, E, S)
    ctx_all = jnp.swapaxes(u, 1, 2).reshape(N, E)                # (N, E)

    # single full-width output projection over all rows
    attn = jnp.dot(ctx_all.astype(jnp.bfloat16), wo_ref[0],
                   preferred_element_type=jnp.float32) + bo_ref[0]

    # residual + LayerNorm1 (post-norm, eps=1e-5 like PyTorch)
    y = _layernorm(x + attn, g1_ref[0], be1_ref[0])

    # --- feed-forward on the full (B*S, .) slab -----------------------------
    hidden = jnp.maximum(
        jnp.dot(y.astype(jnp.bfloat16), w1_ref[0],
                preferred_element_type=jnp.float32) + bf1_ref[0], 0.0)
    ff = jnp.dot(hidden.astype(jnp.bfloat16), w2_ref[0],
                 preferred_element_type=jnp.float32) + bf2_ref[0]

    # residual + LayerNorm2
    z = _layernorm(y + ff, g2_ref[0], be2_ref[0])
    h_ref[...] = z

    # --- fused vocab projection on the last layer (lane-dense Vp) -----------
    @pl.when(layer == pl.num_programs(0) - 1)
    def _():
        o_ref[...] = (jnp.dot(z.astype(jnp.bfloat16), wout_ref[...],
                              preferred_element_type=jnp.float32)
                      + bout_ref[...]).astype(o_ref.dtype)


def fused_encoder_and_logits(x2d, lp, w_out, b_out, nhead, batch, seq):
    """x2d: (B*S, E) f32 -> padded logits (B*S, Vp) f32.

    All encoder layers + the vocab projection in ONE pallas_call.
    """
    N, E = x2d.shape
    L, _, F = lp["w1"].shape
    Vp = w_out.shape[1]
    dh = E // nhead

    def per_layer(arr):
        shape = arr.shape
        return pl.BlockSpec((1,) + shape[1:],
                            lambda l, _nd=len(shape): (l,) + (0,) * (_nd - 1))

    in_specs = ([pl.BlockSpec((N, E), lambda l: (0, 0))]
                + [per_layer(lp[k]) for k in _LAYER_KEYS]
                + [pl.BlockSpec((E, Vp), lambda l: (0, 0)),
                   pl.BlockSpec((1, Vp), lambda l: (0, 0))])

    flops = int(L * (2 * N * E * 3 * E                      # qkv proj
                     + 4 * batch * nhead * seq * seq * dh   # scores + ctx
                     + 2 * N * E * E                        # out proj
                     + 4 * N * E * F)                       # ffn
                + 2 * N * E * Vp)                           # fused vocab proj
    bytes_accessed = int(
        N * E * 4 + N * Vp * 4 + E * Vp * 2 + Vp * 4
        + sum(int(lp[k].size) * int(lp[k].dtype.itemsize) for k in _LAYER_KEYS))
    cost = pl.CostEstimate(flops=flops,
                           transcendentals=int(L * batch * nhead * seq * seq),
                           bytes_accessed=bytes_accessed)

    return pl.pallas_call(
        functools.partial(fused_encoder_kernel, nhead=nhead, batch=batch, seq=seq),
        out_shape=jax.ShapeDtypeStruct((N, Vp), jnp.float32),
        grid=(L,),
        in_specs=in_specs,
        out_specs=pl.BlockSpec((N, Vp), lambda l: (0, 0)),
        scratch_shapes=[pltpu.VMEM((N, E), jnp.float32)],
        compiler_params=pltpu.CompilerParams(
            dimension_semantics=("arbitrary",),
            vmem_limit_bytes=16 * 1024 * 1024),
        cost_estimate=cost,
    )(x2d, *[lp[k] for k in _LAYER_KEYS], w_out, b_out)


# ------------------------------ model wrapper ------------------------------


def positional_encoding_table(max_len, d_model):
    position = jnp.arange(max_len, dtype=jnp.float32)[:, None]
    div_term = jnp.exp(jnp.arange(0, d_model, 2, dtype=jnp.float32)
                       * (-math.log(10000.0) / d_model))
    pe = jnp.zeros((max_len, d_model), jnp.float32)
    pe = pe.at[:, 0::2].set(jnp.sin(position * div_term))
    pe = pe.at[:, 1::2].set(jnp.cos(position * div_term))
    return pe


def init_params(key, vocab, emb, ffn, num_layers, max_len=512, pad_id=0):
    ks = jax.random.split(key, 7)
    std = 0.02
    L = num_layers

    emb_w = jax.random.normal(ks[0], (vocab, emb), jnp.float32) * std
    emb_w = emb_w.at[pad_id].set(0.0)                 # padding_idx row is zero

    def w(k, shape):                                  # bf16 weights (halved DMA bytes)
        return (jax.random.normal(k, shape, jnp.float32) * std).astype(jnp.bfloat16)

    layers = dict(
        wqkv=w(ks[1], (L, emb, 3 * emb)),
        bqkv=jnp.zeros((L, 1, 3 * emb), jnp.float32),
        wo=w(ks[2], (L, emb, emb)),
        bo=jnp.zeros((L, 1, emb), jnp.float32),
        g1=jnp.ones((L, 1, emb), jnp.float32),
        be1=jnp.zeros((L, 1, emb), jnp.float32),
        w1=w(ks[3], (L, emb, ffn)),
        bf1=jnp.zeros((L, 1, ffn), jnp.float32),
        w2=w(ks[4], (L, ffn, emb)),
        bf2=jnp.zeros((L, 1, emb), jnp.float32),
        g2=jnp.ones((L, 1, emb), jnp.float32),
        be2=jnp.zeros((L, 1, emb), jnp.float32),
    )

    # Output projection: built once, already padded to a lane-dense 128-multiple.
    Vp = ((vocab + 127) // 128) * 128
    w_out = jnp.zeros((emb, Vp), jnp.bfloat16).at[:, :vocab].set(w(ks[5], (emb, vocab)))
    b_out = jnp.zeros((1, Vp), jnp.float32).at[0, :vocab].set(
        jax.random.normal(ks[6], (vocab,), jnp.float32) * std)

    return dict(emb=emb_w, pe=positional_encoding_table(max_len, emb),
                layers=layers, w_out=w_out, b_out=b_out, vocab=vocab)


def transformer_generator_forward(src, params, nhead):
    """src: int32 (B, S) -> logits (B, S, vocab)."""
    B, S = src.shape
    x = jnp.take(params["emb"], src, axis=0) + params["pe"][:S][None]   # (B, S, E)
    E = x.shape[-1]
    # PyTorch transposes to (S, B, E) before the encoder; attention mixes only
    # over S, so the (B*S, E) row layout with per-sequence attention blocks is
    # mathematically identical.
    logits_p = fused_encoder_and_logits(
        x.reshape(B * S, E).astype(jnp.float32),
        params["layers"], params["w_out"], params["b_out"], nhead, B, S)
    V = params["vocab"]
    return logits_p[:, :V].reshape(B, S, V)


# --------------------------- pure-JAX reference -----------------------------


def reference_forward(src, params, nhead):
    B, S = src.shape
    x = jnp.take(params["emb"], src, axis=0) + params["pe"][:S][None]
    E = x.shape[-1]
    dh = E // nhead
    lp = params["layers"]
    L = lp["wqkv"].shape[0]
    V = params["vocab"]
    f32 = lambda a: a.astype(jnp.float32)

    def ln(u, g, b):
        m = u.mean(-1, keepdims=True)
        var = ((u - m) ** 2).mean(-1, keepdims=True)
        return (u - m) * jax.lax.rsqrt(var + 1e-5) * g + b

    for l in range(L):
        qkv = x @ f32(lp["wqkv"][l]) + lp["bqkv"][l]
        q, k, v = jnp.split(qkv, 3, axis=-1)
        q = q.reshape(B, S, nhead, dh).transpose(0, 2, 1, 3)
        k = k.reshape(B, S, nhead, dh).transpose(0, 2, 1, 3)
        v = v.reshape(B, S, nhead, dh).transpose(0, 2, 1, 3)
        s = jnp.einsum("bhsd,bhtd->bhst", q, k) / math.sqrt(dh)
        a = jax.nn.softmax(s, axis=-1)
        ctx = jnp.einsum("bhst,bhtd->bhsd", a, v).transpose(0, 2, 1, 3).reshape(B, S, E)
        attn = ctx @ f32(lp["wo"][l]) + lp["bo"][l]
        y = ln(x + attn, lp["g1"][l], lp["be1"][l])
        ff = jnp.maximum(y @ f32(lp["w1"][l]) + lp["bf1"][l], 0.0) @ f32(lp["w2"][l]) + lp["bf2"][l]
        x = ln(y + ff, lp["g2"][l], lp["be2"][l])
    return x @ f32(params["w_out"][:, :V]) + params["b_out"][0, :V]


# ---------------------------------- main ------------------------------------

if __name__ == "__main__":
    # Small, forward-consistent shapes.
    VOCAB = 32          # tokenizer.vocab_size()
    PAD_ID = 0          # tokenizer.PAD_TOKEN
    EMB = 128           # emb_size (d_model)
    NHEAD = 8           # -> head_dim 16
    FFN = 2048          # nn.TransformerEncoderLayer default dim_feedforward
    NUM_LAYERS = 2
    BATCH, SEQ = 2, 8

    key = jax.random.PRNGKey(0)
    pkey, skey = jax.random.split(key)
    params = init_params(pkey, VOCAB, EMB, FFN, NUM_LAYERS, pad_id=PAD_ID)
    src = jax.random.randint(skey, (BATCH, SEQ), 0, VOCAB, dtype=jnp.int32)

    logits = jax.block_until_ready(transformer_generator_forward(src, params, NHEAD))
    ref = jax.block_until_ready(reference_forward(src, params, NHEAD))

    assert logits.shape == (BATCH, SEQ, VOCAB)
    max_err = float(jnp.max(jnp.abs(logits - ref)))
    assert jnp.allclose(logits, ref, atol=2e-2, rtol=2e-2), (
        f"mismatch vs JAX reference (max abs err {max_err})")

    # TODO(synk): dropout (training mode) and optional src_mask are not modeled
    # (forward here matches eval mode with src_mask=None).
    print("KERNEL_OK")
</pallas_src>

<mosaic_0001>
module attributes {stable_mosaic.version = 11 : i64} {
  func.func @fused_encoder_kernel(%arg0: i32, %arg1: memref<16x128xf32, #tpu.memory_space<vmem>>, %arg2: memref<1x128x384xbf16, #tpu.memory_space<vmem>>, %arg3: memref<1x1x384xf32, #tpu.memory_space<vmem>>, %arg4: memref<1x128x128xbf16, #tpu.memory_space<vmem>>, %arg5: memref<1x1x128xf32, #tpu.memory_space<vmem>>, %arg6: memref<1x1x128xf32, #tpu.memory_space<vmem>>, %arg7: memref<1x1x128xf32, #tpu.memory_space<vmem>>, %arg8: memref<1x128x2048xbf16, #tpu.memory_space<vmem>>, %arg9: memref<1x1x2048xf32, #tpu.memory_space<vmem>>, %arg10: memref<1x2048x128xbf16, #tpu.memory_space<vmem>>, %arg11: memref<1x1x128xf32, #tpu.memory_space<vmem>>, %arg12: memref<1x1x128xf32, #tpu.memory_space<vmem>>, %arg13: memref<1x1x128xf32, #tpu.memory_space<vmem>>, %arg14: memref<128x128xbf16, #tpu.memory_space<vmem>>, %arg15: memref<1x128xf32, #tpu.memory_space<vmem>>, %arg16: memref<16x128xf32, #tpu.memory_space<vmem>>, %arg17: memref<16x128xf32, #tpu.memory_space<vmem>>) attributes {dimension_semantics = [#tpu.dimension_semantics<arbitrary>], iteration_bounds = array<i64: 2>, scalar_prefetch = 0 : i64, scratch_operands = 1 : i64, tpu.core_type = #tpu.core_type<tc>, window_params = [{pipeline_mode = #tpu.pipeline_mode<synchronous>, transform_indices = @transform_0, window_bounds = array<i64: 16, 128>}, {transform_indices = @transform_1, window_bounds = array<i64: 1, 128, 384>}, {transform_indices = @transform_2, window_bounds = array<i64: 1, 1, 384>}, {transform_indices = @transform_3, window_bounds = array<i64: 1, 128, 128>}, {transform_indices = @transform_4, window_bounds = array<i64: 1, 1, 128>}, {transform_indices = @transform_5, window_bounds = array<i64: 1, 1, 128>}, {transform_indices = @transform_6, window_bounds = array<i64: 1, 1, 128>}, {transform_indices = @transform_7, window_bounds = array<i64: 1, 128, 2048>}, {transform_indices = @transform_8, window_bounds = array<i64: 1, 1, 2048>}, {transform_indices = @transform_9, window_bounds = array<i64: 1, 2048, 128>}, {transform_indices = @transform_10, window_bounds = array<i64: 1, 1, 128>}, {transform_indices = @transform_11, window_bounds = array<i64: 1, 1, 128>}, {transform_indices = @transform_12, window_bounds = array<i64: 1, 1, 128>}, {pipeline_mode = #tpu.pipeline_mode<synchronous>, transform_indices = @transform_13, window_bounds = array<i64: 128, 128>}, {pipeline_mode = #tpu.pipeline_mode<synchronous>, transform_indices = @transform_14, window_bounds = array<i64: 1, 128>}, {pipeline_mode = #tpu.pipeline_mode<synchronous>, transform_indices = @transform_15, window_bounds = array<i64: 16, 128>}]} {
    %c0_i32 = arith.constant 0 : i32
    %0 = arith.cmpi eq, %arg0, %c0_i32 : i32
    %1 = arith.extui %0 : i1 to i32
    %c0_i32_0 = arith.constant 0 : i32
    %2 = arith.cmpi ne, %1, %c0_i32_0 : i32
    scf.if %2 {
      %c0_60 = arith.constant 0 : index
      %c0_61 = arith.constant 0 : index
      %133 = vector.load %arg1[%c0_60, %c0_61] : memref<16x128xf32, #tpu.memory_space<vmem>>, vector<16x128xf32>
      %c0_62 = arith.constant 0 : index
      %c0_63 = arith.constant 0 : index
      %134 = vector.load %arg17[%c0_62, %c0_63] : memref<16x128xf32, #tpu.memory_space<vmem>>, vector<16x128xf32>
      tpu.vector_store %arg17[%c0_62, %c0_63], %133 {strides = array<i32>} : memref<16x128xf32, #tpu.memory_space<vmem>>, vector<16x128xf32>,
    } else {
    }
    %c0 = arith.constant 0 : index
    %c0_1 = arith.constant 0 : index
    %3 = vector.load %arg17[%c0, %c0_1] : memref<16x128xf32, #tpu.memory_space<vmem>>, vector<16x128xf32>
    %4 = arith.truncf %3 : vector<16x128xf32> to vector<16x128xbf16>
    %c0_2 = arith.constant 0 : index
    %c0_3 = arith.constant 0 : index
    %c0_4 = arith.constant 0 : index
    %5 = vector.load %arg2[%c0_2, %c0_3, %c0_4] : memref<1x128x384xbf16, #tpu.memory_space<vmem>>, vector<1x128x384xbf16>
    %6 = vector.shape_cast %5 : vector<1x128x384xbf16> to vector<128x384xbf16>
    %cst = arith.constant dense<0.000000e+00> : vector<16x384xf32>
    %7 = tpu.matmul %4, %6, %cst {dimension_numbers = #tpu.dot_dimension_numbers<[1], [0], [0], [1], [0, 0, 1, 1], [], []>} : vector<16x128xbf16>, vector<128x384xbf16>, vector<16x384xf32> -> vector<16x384xf32>
    %c0_5 = arith.constant 0 : index
    %c0_6 = arith.constant 0 : index
    %c0_7 = arith.constant 0 : index
    %8 = vector.load %arg3[%c0_5, %c0_6, %c0_7] : memref<1x1x384xf32, #tpu.memory_space<vmem>>, vector<1x1x384xf32>
    %9 = vector.shape_cast %8 : vector<1x1x384xf32> to vector<1x384xf32>
    %10 = vector.broadcast %9 : vector<1x384xf32> to vector<16x384xf32>
    %11 = arith.addf %7, %10 : vector<16x384xf32>
    %12 = vector.extract_strided_slice %11 {offsets = [0, 0], sizes = [16, 128], strides = [1, 1]} : vector<16x384xf32> to vector<16x128xf32>
    %cst_8 = arith.constant 2.500000e-01 : f32
    %13 = vector.broadcast %cst_8 : f32 to vector<16x128xf32>
    %14 = arith.mulf %12, %13 : vector<16x128xf32>
    %15 = vector.shape_cast %14 : vector<16x128xf32> to vector<2x8x128xf32>
    %16 = tpu.transpose %15, [0, 2, 1] : vector<2x8x128xf32> -> vector<2x128x8xf32>
    %17 = vector.shape_cast %16 : vector<2x128x8xf32> to vector<16x16x8xf32>
    %18 = tpu.transpose %17, [0, 2, 1] : vector<16x16x8xf32> -> vector<16x8x16xf32>
    %19 = arith.truncf %18 : vector<16x8x16xf32> to vector<16x8x16xbf16>
    %20 = vector.extract_strided_slice %11 {offsets = [0, 128], sizes = [16, 128], strides = [1, 1]} : vector<16x384xf32> to vector<16x128xf32>
    %21 = vector.shape_cast %20 : vector<16x128xf32> to vector<2x8x128xf32>
    %22 = tpu.transpose %21, [0, 2, 1] : vector<2x8x128xf32> -> vector<2x128x8xf32>
    %23 = vector.shape_cast %22 : vector<2x128x8xf32> to vector<16x16x8xf32>
    %24 = tpu.transpose %23, [0, 2, 1] : vector<16x16x8xf32> -> vector<16x8x16xf32>
    %25 = arith.truncf %24 : vector<16x8x16xf32> to vector<16x8x16xbf16>
    %26 = vector.extract_strided_slice %11 {offsets = [0, 256], sizes = [16, 128], strides = [1, 1]} : vector<16x384xf32> to vector<16x128xf32>
    %27 = vector.shape_cast %26 : vector<16x128xf32> to vector<2x8x128xf32>
    %28 = tpu.transpose %27, [0, 2, 1] : vector<2x8x128xf32> -> vector<2x128x8xf32>
    %29 = vector.shape_cast %28 : vector<2x128x8xf32> to vector<16x16x8xf32>
    %30 = tpu.transpose %29, [0, 2, 1] : vector<16x16x8xf32> -> vector<16x8x16xf32>
    %31 = arith.truncf %30 : vector<16x8x16xf32> to vector<16x8x16xbf16>
    "tpu.trace_start"() <{level = 10 : i32, message = "zqd,zkd->zqk"}> : () -> ()
    %cst_9 = arith.constant dense<0.000000e+00> : vector<16x8x8xf32>
    %32 = tpu.matmul %19, %25, %cst_9 {dimension_numbers = #tpu.dot_dimension_numbers<[2], [2], [1], [1], [0, 0, 0, 1, 1, 1], [0], [0]>} : vector<16x8x16xbf16>, vector<16x8x16xbf16>, vector<16x8x8xf32> -> vector<16x8x8xf32>
    "tpu.trace_stop"() : () -> ()
    %cst_10 = arith.constant dense<0xFF800000> : vector<16x8xf32>
    %33 = vector.multi_reduction <maximumf>, %32, %cst_10 [2] : vector<16x8x8xf32> to vector<16x8xf32>
    %34 = vector.shape_cast %33 : vector<16x8xf32> to vector<16x8x1xf32>
    %35 = vector.broadcast %34 : vector<16x8x1xf32> to vector<16x8x8xf32>
    %36 = arith.subf %32, %35 : vector<16x8x8xf32>
    %37 = math.exp %36 : vector<16x8x8xf32>
    %cst_11 = arith.constant dense<0.000000e+00> : vector<16x8xf32>
    %38 = vector.multi_reduction <add>, %37, %cst_11 [2] : vector<16x8x8xf32> to vector<16x8xf32>
    %39 = vector.shape_cast %38 : vector<16x8xf32> to vector<16x8x1xf32>
    %40 = tpu.reciprocal %39 {approx = true} : vector<16x8x1xf32> -> vector<16x8x1xf32>
    %41 = vector.broadcast %40 : vector<16x8x1xf32> to vector<16x8x8xf32>
    %42 = arith.mulf %37, %41 : vector<16x8x8xf32>
    %43 = arith.truncf %42 : vector<16x8x8xf32> to vector<16x8x8xbf16>
    "tpu.trace_start"() <{level = 10 : i32, message = "zqk,zkd->zqd"}> : () -> ()
    %cst_12 = arith.constant dense<0.000000e+00> : vector<16x8x16xf32>
    %44 = tpu.matmul %43, %31, %cst_12 {dimension_numbers = #tpu.dot_dimension_numbers<[2], [1], [1], [2], [0, 0, 0, 1, 1, 2], [0], [0]>} : vector<16x8x8xbf16>, vector<16x8x16xbf16>, vector<16x8x16xf32> -> vector<16x8x16xf32>
    "tpu.trace_stop"() : () -> ()
    %45 = tpu.transpose %44, [0, 2, 1] : vector<16x8x16xf32> -> vector<16x16x8xf32>
    %46 = vector.shape_cast %45 : vector<16x16x8xf32> to vector<2x128x8xf32>
    %47 = tpu.transpose %46, [0, 2, 1] : vector<2x128x8xf32> -> vector<2x8x128xf32>
    %48 = vector.shape_cast %47 : vector<2x8x128xf32> to vector<16x128xf32>
    %49 = arith.truncf %48 : vector<16x128xf32> to vector<16x128xbf16>
    %c0_13 = arith.constant 0 : index
    %c0_14 = arith.constant 0 : index
    %c0_15 = arith.constant 0 : index
    %50 = vector.load %arg4[%c0_13, %c0_14, %c0_15] : memref<1x128x128xbf16, #tpu.memory_space<vmem>>, vector<1x128x128xbf16>
    %51 = vector.shape_cast %50 : vector<1x128x128xbf16> to vector<128x128xbf16>
    %cst_16 = arith.constant dense<0.000000e+00> : vector<16x128xf32>
    %52 = tpu.matmul %49, %51, %cst_16 {dimension_numbers = #tpu.dot_dimension_numbers<[1], [0], [0], [1], [0, 0, 1, 1], [], []>} : vector<16x128xbf16>, vector<128x128xbf16>, vector<16x128xf32> -> vector<16x128xf32>
    %c0_17 = arith.constant 0 : index
    %c0_18 = arith.constant 0 : index
    %c0_19 = arith.constant 0 : index
    %53 = vector.load %arg5[%c0_17, %c0_18, %c0_19] : memref<1x1x128xf32, #tpu.memory_space<vmem>>, vector<1x1x128xf32>
    %54 = vector.shape_cast %53 : vector<1x1x128xf32> to vector<1x128xf32>
    %55 = vector.broadcast %54 : vector<1x128xf32> to vector<16x128xf32>
    %56 = arith.addf %52, %55 : vector<16x128xf32>
    %57 = arith.addf %3, %56 : vector<16x128xf32>
    %c0_20 = arith.constant 0 : index
    %c0_21 = arith.constant 0 : index
    %c0_22 = arith.constant 0 : index
    %58 = vector.load %arg6[%c0_20, %c0_21, %c0_22] : memref<1x1x128xf32, #tpu.memory_space<vmem>>, vector<1x1x128xf32>
    %59 = vector.shape_cast %58 : vector<1x1x128xf32> to vector<1x128xf32>
    %c0_23 = arith.constant 0 : index
    %c0_24 = arith.constant 0 : index
    %c0_25 = arith.constant 0 : index
    %60 = vector.load %arg7[%c0_23, %c0_24, %c0_25] : memref<1x1x128xf32, #tpu.memory_space<vmem>>, vector<1x1x128xf32>
    %61 = vector.shape_cast %60 : vector<1x1x128xf32> to vector<1x128xf32>
    %cst_26 = arith.constant dense<0.000000e+00> : vector<16xf32>
    %62 = vector.multi_reduction <add>, %57, %cst_26 [1] : vector<16x128xf32> to vector<16xf32>
    %63 = vector.shape_cast %62 : vector<16xf32> to vector<16x1xf32>
    %cst_27 = arith.constant 1.280000e+02 : f32
    %64 = vector.broadcast %cst_27 : f32 to vector<16x1xf32>
    %65 = arith.divf %63, %64 : vector<16x1xf32>
    %66 = vector.broadcast %65 : vector<16x1xf32> to vector<16x128xf32>
    %67 = arith.subf %57, %66 : vector<16x128xf32>
    %68 = arith.mulf %67, %67 : vector<16x128xf32>
    %cst_28 = arith.constant dense<0.000000e+00> : vector<16xf32>
    %69 = vector.multi_reduction <add>, %68, %cst_28 [1] : vector<16x128xf32> to vector<16xf32>
    %70 = vector.shape_cast %69 : vector<16xf32> to vector<16x1xf32>
    %cst_29 = arith.constant 1.280000e+02 : f32
    %71 = vector.broadcast %cst_29 : f32 to vector<16x1xf32>
    %72 = arith.divf %70, %71 : vector<16x1xf32>
    %73 = vector.broadcast %65 : vector<16x1xf32> to vector<16x128xf32>
    %74 = arith.subf %57, %73 : vector<16x128xf32>
    %cst_30 = arith.constant 9.99999974E-6 : f32
    %75 = vector.broadcast %cst_30 : f32 to vector<16x1xf32>
    %76 = arith.addf %72, %75 : vector<16x1xf32>
    %77 = math.rsqrt %76 : vector<16x1xf32>
    %78 = vector.broadcast %77 : vector<16x1xf32> to vector<16x128xf32>
    %79 = arith.mulf %74, %78 : vector<16x128xf32>
    %80 = vector.broadcast %59 : vector<1x128xf32> to vector<16x128xf32>
    %81 = arith.mulf %79, %80 : vector<16x128xf32>
    %82 = vector.broadcast %61 : vector<1x128xf32> to vector<16x128xf32>
    %83 = arith.addf %81, %82 : vector<16x128xf32>
    %84 = arith.truncf %83 : vector<16x128xf32> to vector<16x128xbf16>
    %c0_31 = arith.constant 0 : index
    %c0_32 = arith.constant 0 : index
    %c0_33 = arith.constant 0 : index
    %85 = vector.load %arg8[%c0_31, %c0_32, %c0_33] : memref<1x128x2048xbf16, #tpu.memory_space<vmem>>, vector<1x128x2048xbf16>
    %86 = vector.shape_cast %85 : vector<1x128x2048xbf16> to vector<128x2048xbf16>
    %cst_34 = arith.constant dense<0.000000e+00> : vector<16x2048xf32>
    %87 = tpu.matmul %84, %86, %cst_34 {dimension_numbers = #tpu.dot_dimension_numbers<[1], [0], [0], [1], [0, 0, 1, 1], [], []>} : vector<16x128xbf16>, vector<128x2048xbf16>, vector<16x2048xf32> -> vector<16x2048xf32>
    %c0_35 = arith.constant 0 : index
    %c0_36 = arith.constant 0 : index
    %c0_37 = arith.constant 0 : index
    %88 = vector.load %arg9[%c0_35, %c0_36, %c0_37] : memref<1x1x2048xf32, #tpu.memory_space<vmem>>, vector<1x1x2048xf32>
    %89 = vector.shape_cast %88 : vector<1x1x2048xf32> to vector<1x2048xf32>
    %90 = vector.broadcast %89 : vector<1x2048xf32> to vector<16x2048xf32>
    %91 = arith.addf %87, %90 : vector<16x2048xf32>
    %cst_38 = arith.constant 0.000000e+00 : f32
    %92 = vector.broadcast %cst_38 : f32 to vector<16x2048xf32>
    %93 = arith.maximumf %91, %92 : vector<16x2048xf32>
    %94 = arith.truncf %93 : vector<16x2048xf32> to vector<16x2048xbf16>
    %c0_39 = arith.constant 0 : index
    %c0_40 = arith.constant 0 : index
    %c0_41 = arith.constant 0 : index
    %95 = vector.load %arg10[%c0_39, %c0_40, %c0_41] : memref<1x2048x128xbf16, #tpu.memory_space<vmem>>, vector<1x2048x128xbf16>
    %96 = vector.shape_cast %95 : vector<1x2048x128xbf16> to vector<2048x128xbf16>
    %cst_42 = arith.constant dense<0.000000e+00> : vector<16x128xf32>
    %97 = tpu.matmul %94, %96, %cst_42 {dimension_numbers = #tpu.dot_dimension_numbers<[1], [0], [0], [1], [0, 0, 1, 1], [], []>} : vector<16x2048xbf16>, vector<2048x128xbf16>, vector<16x128xf32> -> vector<16x128xf32>
    %c0_43 = arith.constant 0 : index
    %c0_44 = arith.constant 0 : index
    %c0_45 = arith.constant 0 : index
    %98 = vector.load %arg11[%c0_43, %c0_44, %c0_45] : memref<1x1x128xf32, #tpu.memory_space<vmem>>, vector<1x1x128xf32>
    %99 = vector.shape_cast %98 : vector<1x1x128xf32> to vector<1x128xf32>
    %100 = vector.broadcast %99 : vector<1x128xf32> to vector<16x128xf32>
    %101 = arith.addf %97, %100 : vector<16x128xf32>
    %102 = arith.addf %83, %101 : vector<16x128xf32>
    %c0_46 = arith.constant 0 : index
    %c0_47 = arith.constant 0 : index
    %c0_48 = arith.constant 0 : index
    %103 = vector.load %arg12[%c0_46, %c0_47, %c0_48] : memref<1x1x128xf32, #tpu.memory_space<vmem>>, vector<1x1x128xf32>
    %104 = vector.shape_cast %103 : vector<1x1x128xf32> to vector<1x128xf32>
    %c0_49 = arith.constant 0 : index
    %c0_50 = arith.constant 0 : index
    %c0_51 = arith.constant 0 : index
    %105 = vector.load %arg13[%c0_49, %c0_50, %c0_51] : memref<1x1x128xf32, #tpu.memory_space<vmem>>, vector<1x1x128xf32>
    %106 = vector.shape_cast %105 : vector<1x1x128xf32> to vector<1x128xf32>
    %cst_52 = arith.constant dense<0.000000e+00> : vector<16xf32>
    %107 = vector.multi_reduction <add>, %102, %cst_52 [1] : vector<16x128xf32> to vector<16xf32>
    %108 = vector.shape_cast %107 : vector<16xf32> to vector<16x1xf32>
    %cst_53 = arith.constant 1.280000e+02 : f32
    %109 = vector.broadcast %cst_53 : f32 to vector<16x1xf32>
    %110 = arith.divf %108, %109 : vector<16x1xf32>
    %111 = vector.broadcast %110 : vector<16x1xf32> to vector<16x128xf32>
    %112 = arith.subf %102, %111 : vector<16x128xf32>
    %113 = arith.mulf %112, %112 : vector<16x128xf32>
    %cst_54 = arith.constant dense<0.000000e+00> : vector<16xf32>
    %114 = vector.multi_reduction <add>, %113, %cst_54 [1] : vector<16x128xf32> to vector<16xf32>
    %115 = vector.shape_cast %114 : vector<16xf32> to vector<16x1xf32>
    %cst_55 = arith.constant 1.280000e+02 : f32
    %116 = vector.broadcast %cst_55 : f32 to vector<16x1xf32>
    %117 = arith.divf %115, %116 : vector<16x1xf32>
    %118 = vector.broadcast %110 : vector<16x1xf32> to vector<16x128xf32>
    %119 = arith.subf %102, %118 : vector<16x128xf32>
    %cst_56 = arith.constant 9.99999974E-6 : f32
    %120 = vector.broadcast %cst_56 : f32 to vector<16x1xf32>
    %121 = arith.addf %117, %120 : vector<16x1xf32>
    %122 = math.rsqrt %121 : vector<16x1xf32>
    %123 = vector.broadcast %122 : vector<16x1xf32> to vector<16x128xf32>
    %124 = arith.mulf %119, %123 : vector<16x128xf32>
    %125 = vector.broadcast %104 : vector<1x128xf32> to vector<16x128xf32>
    %126 = arith.mulf %124, %125 : vector<16x128xf32>
    %127 = vector.broadcast %106 : vector<1x128xf32> to vector<16x128xf32>
    %128 = arith.addf %126, %127 : vector<16x128xf32>
    %c0_57 = arith.constant 0 : index
    %c0_58 = arith.constant 0 : index
    %129 = vector.load %arg17[%c0_57, %c0_58] : memref<16x128xf32, #tpu.memory_space<vmem>>, vector<16x128xf32>
    tpu.vector_store %arg17[%c0_57, %c0_58], %128 {strides = array<i32>} : memref<16x128xf32, #tpu.memory_space<vmem>>, vector<16x128xf32>,
    %c1_i32 = arith.constant 1 : i32
    %130 = arith.cmpi eq, %arg0, %c1_i32 : i32
    %131 = arith.extui %130 : i1 to i32
    %c0_i32_59 = arith.constant 0 : i32
    %132 = arith.cmpi ne, %131, %c0_i32_59 : i32
    scf.if %132 {
      %133 = arith.truncf %128 : vector<16x128xf32> to vector<16x128xbf16>
      %c0_60 = arith.constant 0 : index
      %c0_61 = arith.constant 0 : index
      %134 = vector.load %arg14[%c0_60, %c0_61] : memref<128x128xbf16, #tpu.memory_space<vmem>>, vector<128x128xbf16>
      %cst_62 = arith.constant dense<0.000000e+00> : vector<16x128xf32>
      %135 = tpu.matmul %133, %134, %cst_62 {dimension_numbers = #tpu.dot_dimension_numbers<[1], [0], [0], [1], [0, 0, 1, 1], [], []>} : vector<16x128xbf16>, vector<128x128xbf16>, vector<16x128xf32> -> vector<16x128xf32>
      %c0_63 = arith.constant 0 : index
      %c0_64 = arith.constant 0 : index
      %136 = vector.load %arg15[%c0_63, %c0_64] : memref<1x128xf32, #tpu.memory_space<vmem>>, vector<1x128xf32>
      %137 = vector.broadcast %136 : vector<1x128xf32> to vector<16x128xf32>
      %138 = arith.addf %135, %137 : vector<16x128xf32>
      %c0_65 = arith.constant 0 : index
      %c0_66 = arith.constant 0 : index
      %139 = vector.load %arg16[%c0_65, %c0_66] : memref<16x128xf32, #tpu.memory_space<vmem>>, vector<16x128xf32>
      tpu.vector_store %arg16[%c0_65, %c0_66], %138 {strides = array<i32>} : memref<16x128xf32, #tpu.memory_space<vmem>>, vector<16x128xf32>,
    } else {
    }
    return
  }
  func.func @transform_0(%arg0: i32) -> (i32, i32) {
    %c0_i32 = arith.constant 0 : i32
    %c0_i32_0 = arith.constant 0 : i32
    %c0_i32_1 = arith.constant 0 : i32
    return %c0_i32, %c0_i32_0 : i32, i32
  }
  func.func @transform_1(%arg0: i32) -> (i32, i32, i32) {
    %c0_i32 = arith.constant 0 : i32
    %c0_i32_0 = arith.constant 0 : i32
    %c0_i32_1 = arith.constant 0 : i32
    return %arg0, %c0_i32, %c0_i32_0 : i32, i32, i32
  }
  func.func @transform_2(%arg0: i32) -> (i32, i32, i32) {
    %c0_i32 = arith.constant 0 : i32
    %c0_i32_0 = arith.constant 0 : i32
    %c0_i32_1 = arith.constant 0 : i32
    return %arg0, %c0_i32, %c0_i32_0 : i32, i32, i32
  }
  func.func @transform_3(%arg0: i32) -> (i32, i32, i32) {
    %c0_i32 = arith.constant 0 : i32
    %c0_i32_0 = arith.constant 0 : i32
    %c0_i32_1 = arith.constant 0 : i32
    return %arg0, %c0_i32, %c0_i32_0 : i32, i32, i32
  }
  func.func @transform_4(%arg0: i32) -> (i32, i32, i32) {
    %c0_i32 = arith.constant 0 : i32
    %c0_i32_0 = arith.constant 0 : i32
    %c0_i32_1 = arith.constant 0 : i32
    return %arg0, %c0_i32, %c0_i32_0 : i32, i32, i32
  }
  func.func @transform_5(%arg0: i32) -> (i32, i32, i32) {
    %c0_i32 = arith.constant 0 : i32
    %c0_i32_0 = arith.constant 0 : i32
    %c0_i32_1 = arith.constant 0 : i32
    return %arg0, %c0_i32, %c0_i32_0 : i32, i32, i32
  }
  func.func @transform_6(%arg0: i32) -> (i32, i32, i32) {
    %c0_i32 = arith.constant 0 : i32
    %c0_i32_0 = arith.constant 0 : i32
    %c0_i32_1 = arith.constant 0 : i32
    return %arg0, %c0_i32, %c0_i32_0 : i32, i32, i32
  }
  func.func @transform_7(%arg0: i32) -> (i32, i32, i32) {
    %c0_i32 = arith.constant 0 : i32
    %c0_i32_0 = arith.constant 0 : i32
    %c0_i32_1 = arith.constant 0 : i32
    return %arg0, %c0_i32, %c0_i32_0 : i32, i32, i32
  }
  func.func @transform_8(%arg0: i32) -> (i32, i32, i32) {
    %c0_i32 = arith.constant 0 : i32
    %c0_i32_0 = arith.constant 0 : i32
    %c0_i32_1 = arith.constant 0 : i32
    return %arg0, %c0_i32, %c0_i32_0 : i32, i32, i32
  }
  func.func @transform_9(%arg0: i32) -> (i32, i32, i32) {
    %c0_i32 = arith.constant 0 : i32
    %c0_i32_0 = arith.constant 0 : i32
    %c0_i32_1 = arith.constant 0 : i32
    return %arg0, %c0_i32, %c0_i32_0 : i32, i32, i32
  }
  func.func @transform_10(%arg0: i32) -> (i32, i32, i32) {
    %c0_i32 = arith.constant 0 : i32
    %c0_i32_0 = arith.constant 0 : i32
    %c0_i32_1 = arith.constant 0 : i32
    return %arg0, %c0_i32, %c0_i32_0 : i32, i32, i32
  }
  func.func @transform_11(%arg0: i32) -> (i32, i32, i32) {
    %c0_i32 = arith.constant 0 : i32
    %c0_i32_0 = arith.constant 0 : i32
    %c0_i32_1 = arith.constant 0 : i32
    return %arg0, %c0_i32, %c0_i32_0 : i32, i32, i32
  }
  func.func @transform_12(%arg0: i32) -> (i32, i32, i32) {
    %c0_i32 = arith.constant 0 : i32
    %c0_i32_0 = arith.constant 0 : i32
    %c0_i32_1 = arith.constant 0 : i32
    return %arg0, %c0_i32, %c0_i32_0 : i32, i32, i32
  }
  func.func @transform_13(%arg0: i32) -> (i32, i32) {
    %c0_i32 = arith.constant 0 : i32
    %c0_i32_0 = arith.constant 0 : i32
    %c0_i32_1 = arith.constant 0 : i32
    return %c0_i32, %c0_i32_0 : i32, i32
  }
  func.func @transform_14(%arg0: i32) -> (i32, i32) {
    %c0_i32 = arith.constant 0 : i32
    %c0_i32_0 = arith.constant 0 : i32
    %c0_i32_1 = arith.constant 0 : i32
    return %c0_i32, %c0_i32_0 : i32, i32
  }
  func.func @transform_15(%arg0: i32) -> (i32, i32) {
    %c0_i32 = arith.constant 0 : i32
    %c0_i32_0 = arith.constant 0 : i32
    %c0_i32_1 = arith.constant 0 : i32
    return %c0_i32, %c0_i32_0 : i32, i32
  }
}

</mosaic_0001>

<bundles_post_ra>
// kernel: tpu_custom_call.1
= control target key start
LH: loop header
LB: loop body
LE: loop exit
PB: predicated region body
PF: predicated region fallthrough
CT: control target
= control target key end

     0   :  { %s11723_s0 = inlined_call_operand.hbm [shape: f32[16,128], index: 0, kind: input, shape index: {}]   ;;  %s11724_s1 = inlined_call_operand.hbm [shape: bf16[2,128,384], index: 1, kind: input, shape index: {}]   ;;  %s11725_s2 = inlined_call_operand.vmem [shape: f32[2,1,384], index: 2, kind: input, shape index: {}]   ;;  %s11726_s3 = inlined_call_operand.hbm [shape: bf16[2,128,128], index: 3, kind: input, shape index: {}]   ;;  %s11727_s4 = inlined_call_operand.vmem [shape: f32[2,1,128], index: 4, kind: input, shape index: {}]   ;;  %s11728_s5 = inlined_call_operand.vmem [shape: f32[2,1,128], index: 5, kind: input, shape index: {}]   ;;  %s11729_s6 = inlined_call_operand.vmem [shape: f32[2,1,128], index: 6, kind: input, shape index: {}]   ;;  %s11730_s7 = inlined_call_operand.hbm [shape: bf16[2,128,2048], index: 7, kind: input, shape index: {}]   ;;  %s11731_s8 = inlined_call_operand.hbm [shape: f32[2,1,2048], index: 8, kind: input, shape index: {}]   ;;  %s11732_s9 = inlined_call_operand.hbm [shape: bf16[2,2048,128], index: 9, kind: input, shape index: {}]   ;;  %s11733_s10 = inlined_call_operand.vmem [shape: f32[2,1,128], index: 10, kind: input, shape index: {}]   ;;  %s11734_s11 = inlined_call_operand.vmem [shape: f32[2,1,128], index: 11, kind: input, shape index: {}]   ;;  %s11735_s12 = inlined_call_operand.vmem [shape: f32[2,1,128], index: 12, kind: input, shape index: {}]   ;;  %s11736_s13 = inlined_call_operand.hbm [shape: bf16[128,128], index: 13, kind: input, shape index: {}]   ;;  %s11737_s14 = inlined_call_operand.vmem [shape: f32[1,128], index: 14, kind: input, shape index: {}]   ;;  %s11738_s15 = inlined_call_operand.hbm [shape: f32[16,128], index: 15, kind: output, shape index: {}]  }
   0x1   :  { %11760 = sst [smem:[#allocation26_spill]] %s11723_s0 }
   0x2   :  { %11761 = sst [smem:[#allocation27_spill]] %s11724_s1 }
   0x3   :  { %11762 = sst [smem:[#allocation28_spill]] %s11725_s2 }
   0x4   :  { %11763 = sst [smem:[#allocation29_spill]] %s11726_s3 }
   0x5   :  { %11764 = sst [smem:[#allocation30_spill]] %s11727_s4 }
   0x6   :  { %11765 = sst [smem:[#allocation31_spill]] %s11728_s5 }
   0x7   :  { %11766 = sst [smem:[#allocation32_spill]] %s11729_s6 }
   0x8   :  { %11767 = sst [smem:[#allocation33_spill]] %s11730_s7 }
   0x9   :  { %11768 = sst [smem:[#allocation34_spill]] %s11731_s8 }
   0xa   :  { %11769 = sst [smem:[#allocation35_spill]] %s11733_s10 }
   0xb   :  { %11770 = sst [smem:[#allocation36_spill]] %s11734_s11 }
   0xc   :  { %11771 = sst [smem:[#allocation37_spill]] %s11735_s12 }
   0xd   :  { %11772 = sst [smem:[#allocation38_spill]] %s11736_s13 }
   0xe   :  { %11773 = sst [smem:[#allocation39_spill]] %s11737_s14 }
   0xf   :  { %11774 = sst [smem:[#allocation40_spill]] %s11738_s15 }
  0x10   :  { %20 = vsyncpa [#allocation4], 0 }
  0x11   :  { %21 = vsyncpa [#allocation7], 0 }
  0x12   :  { %23 = vsyncpa [#allocation7 + $0x1], 0 }
  0x13   :  { %24 = vsyncpa [#allocation10], 0 }
  0x14   :  { %26 = vsyncpa [#allocation10 + $0x1], 0 }
  0x15   :  { %27 = vsyncpa [#allocation13], 0 }
  0x16   :  { %29 = vsyncpa [#allocation13 + $0x1], 0 }
  0x17   :  { %30 = vsyncpa [#allocation5], 0  ;;  %s10407_s18 = smov 0   ;;  %s10409_s19 = smov 0  }
  0x18   :  { %s10411_s20 = smov 0   ;;  %s10413_s21 = smov 0  }
  0x19 LB: > { %11775 = sst [smem:[#allocation22_spill]] %s10299_s20  ;;  %s10426_s22 = sadd.s32 4294967295, %s10303_s21   ;;  %s10303_s21 = sphi %s10413_s21, %s11826_s21   ;;  %s10299_s20 = sphi %s10411_s20, %s11828_s20   ;;  %s10295_s19 = sphi %s10409_s19, %s11830_s19   ;;  %s10291_s18 = sphi %s10407_s18, %s11829_s18  }
  0x1a   : > { %s10429_s23 = sadd.s32 1, %s10303_s21   ;;  %s64_s25 = sadd.s32 1, %s10299_s20 }
  0x1b   : > { %11776 = sst [smem:[#allocation23_spill]] %s10429_s23  ;;  %s61_s24 = ssub.s32 %s10303_s21, %s10429_s23 }
  0x1c   : > { %p62_p0 = scmp.eq.s32.totalorder %s61_s24, 0  ;;  %p71_p1 = scmp.ne.s32.totalorder %s10299_s20, %s10295_s19 }
  0x1d   : > { %p72_p2 = scmp.eq.s32.totalorder %s10303_s21, 0  ;;  %p77_p3 = scmp.ne.s32.totalorder %s10295_s19, %s10291_s18 }
  0x1e   : > { %s10439_s26 = scalar_select %p62_p0, %s10299_s20, %s64_s25  }
  0x1f   : > { %p10441_p4 = por %p72_p2, %p71_p1  ;;  %p11743_p5 = scmp.eq.s32.totalorder %s10426_s22, 0 }
  0x20   : > { %11777 = sst [smem:[#allocation24_spill]] %s10439_s26  ;;  %p8233_p6 = scmp.ge.s32.totalorder %s10303_s21, 1 }
  0x21   : > { %s11778_s27 = scalar_select %p10441_p4, 1, 0 }
  0x22   : > { %p437_p7 = scmp.lt.s32.totalorder %s10303_s21, 3  ;;  %p10450_p8 = por %p11743_p5, %p77_p3 }
  0x23   : > { %s10305_s30 = smov [#allocation14]   ;;  %s10469_s18 = sand.u32 1, %s10303_s21  }
  0x24   : > { %s11779_s28 = scalar_select %p10450_p8, 1, 0 }
  0x25   : > { %p10455_p10 = pnand %p8233_p6, %p437_p7  ;;  %s462_s16 = sshll.u32 %s10305_s30, 4  ;;  %s463_s16 = int_to_ptr.vmem [resolvable:$true] %s462_s16 }
  0x26   : > { %11780 = sst [smem:[#allocation25_spill]] %s11779_s28  ;;  %s10472_s24 = sand.u32 1, %s10299_s20  }
  0x27   : > { %s11781_s29 = scalar_select %p10455_p10, 1, 0 }
  0x28   : > { %p9147_p11 = pneg %p10455_p10  ;;  %s11783_s13 = sld [smem:[#allocation38_spill]] }
  0x2a   : > { %p10463_p12 = pnand %p9147_p11, %p11743_p5 }
  0x2c   : > { %s11782_s17 = scalar_select %p10463_p12, 1, 0 }
  0x2d   : > { %p11750_p1 = pneg %p10463_p12 }
  0x2e   : > { %s10017_s23 = scalar_lea.hbm %s11783_s13, 1024 }
  0x2f   : > { %p10018_p0 = scmp.ne.s32.totalorder %s11783_s13, %s10017_s23  ;;  %p10024_p6 = scmp.lt.u32.totalorder %s10017_s23, %s11783_s13 }
  0x31   : > { %p10020_p2 = pnand %p11750_p1, %p10018_p0 }
  0x33   : > { %p10021_p3 = pneg %p10020_p2 }
  0x35   : > { %p10026_p7 = pnand %p10024_p6, %p10021_p3 }
  0x37   : > { %10029 = shalt.err (!%p10026_p7)
}
  0x38   : > { %s10030_s20 = scalar_lea.vmem %s463_s16, 1024  ;;  %p10038_p13 = scmp.lt.s32.totalorder %s463_s16, %s463_s16 }
  0x39   : > { %p10031_p11 = scmp.ne.s32.totalorder %s463_s16, %s10030_s20  ;;  %p10039_p8 = scmp.lt.s32.totalorder %s10030_s20, %s10030_s20 }
  0x3b   : > { %p10033_p9 = pnand %p10031_p11, %p11750_p1  ;;  %p10040_p10 = por %p10039_p8, %p10038_p13 }
  0x3d   : > { %p10034_p5 = pneg %p10033_p9 }
  0x3f   : > { %p10041_p4 = pnand %p10040_p10, %p10034_p5 }
  0x41   : > { %10044 = shalt.err (!%p10041_p4)
}
  0x42   : > { %s11748_s15 = smov 64   ;;  %s11746_s12 = smov 4  }
  0x43   : > { %9153 = dma.hbm_to_vmem [thread:$0]  (!%p10463_p12), %s11783_s13, 1024, %s463_s16, [#allocation13], %s11748_s15, %s11748_s15, %s11746_s12  }
  0x44   : > { %s9121_s20 = smul.u32 192, %s10472_s24  ;;  %p11784_p8 = scmp.ne.s32.totalorder %s11778_s27, 0 }
  0x45   : > { %p11785_p5 = scmp.lt.s32.totalorder %s10303_s21, 2  ;;  %s9122_s25 = smul.u32 3072, %s10303_s21 }
  0x46   : > { %s11787_s1 = sld [smem:[#allocation27_spill]]  ;;  %s483_s14 = scalar_lea.vmem [#allocation6], %s9121_s20 }
  0x47   : > { %p10504_p4 = pnand %p11785_p5, %p11784_p8  ;;  %s490_s16 = sshll.u32 %s483_s14, 4  ;;  %s10514_s16 = int_to_ptr.vmem [resolvable:$true] %s490_s16 }
  0x48   : > { %s11753_s27 = scalar_lea.sflag [#allocation7], %s10469_s18 }
  0x49   : > { %s11786_s26 = scalar_select %p10504_p4, 1, 0 }
  0x4a   : > { %p10521_p10 = pneg %p10504_p4 }
  0x4c   : > { %s10512_s10 = scalar_lea.hbm %s11787_s1, %s9122_s25  ;;  %s10050_s30 = scalar_lea.hbm %s11787_s1, 6144 }
  0x4d   : > { %s10045_s23 = scalar_lea.hbm %s10512_s10, 3072  ;;  %p10051_p2 = scmp.lt.u32.totalorder %s10512_s10, %s11787_s1 }
  0x4e   : > { %p10046_p9 = scmp.ne.s32.totalorder %s10512_s10, %s10045_s23  ;;  %p10052_p3 = scmp.lt.u32.totalorder %s10050_s30, %s10045_s23 }
  0x4f   : > { %s11788_s12 = scalar_select %p10521_p10, 1, 0 }
  0x50   : > { %p10048_p13 = pnand %p10521_p10, %p10046_p9  ;;  %p10053_p6 = por %p10052_p3, %p10051_p2 }
  0x51   : > { %p10054_p7 = scmp.lt.u32.totalorder %s10045_s23, %s10512_s10 }
  0x52   : > { %p10049_p0 = pneg %p10048_p13 }
  0x53   : > { %p10055_p11 = por %p10054_p7, %p10053_p6 }
  0x55   : > { %p10056_p8 = pnand %p10055_p11, %p10049_p0 }
  0x57   : > { %10059 = shalt.err (!%p10056_p8)
}
  0x58   : > { %s10060_s15 = scalar_lea.vmem %s10514_s16, 3072  ;;  %s10308_s11 = smov [#allocation6]  }
  0x59   : > { %p10061_p5 = scmp.ne.s32.totalorder %s10514_s16, %s10060_s15  ;;  %s10065_s25 = sshll.u32 %s10308_s11, 4  ;;  %s10066_s25 = int_to_ptr.vmem [resolvable:$false] %s10065_s25 }
  0x5a   : > { %s10067_s20 = scalar_lea.vmem %s10066_s25, 6144  ;;  %p10068_p1 = scmp.lt.s32.totalorder %s10514_s16, %s10066_s25 }
  0x5b   : > { %p10063_p9 = pnand %p10061_p5, %p10521_p10  ;;  %p10069_p12 = scmp.lt.s32.totalorder %s10067_s20, %s10060_s15 }
  0x5d   : > { %p10064_p13 = pneg %p10063_p9  ;;  %p10070_p2 = por %p10069_p12, %p10068_p1 }
  0x5f   : > { %p10071_p3 = pnand %p10070_p2, %p10064_p13 }
  0x61   : > { %10074 = shalt.err (!%p10071_p3)
}
  0x62   : > { %s10309_s23 = smov 192   ;;  %s10310_s30 = smov 12  }
  0x63   : > { %9157 = dma.hbm_to_vmem [thread:$0]  (!%p10504_p4), %s10512_s10, 3072, %s10514_s16, %s11753_s27, %s10309_s23, %s10309_s23, %s10310_s30  }
  0x64   : > { %s8241_s14 = sshll.u32 %s10472_s24, 10  ;;  %s8599_s15 = sshll.u32 %s10303_s21, 14 }
  0x65   : > { %s11789_s7 = sld [smem:[#allocation33_spill]]  ;;  %s550_s1 = scalar_lea.vmem [#allocation9], %s8241_s14 }
  0x66   : > { %s557_s13 = sshll.u32 %s550_s1, 4  ;;  %s547_s2 = scalar_lea.sflag [#allocation10], %s10469_s18  ;;  %s10557_s13 = int_to_ptr.vmem [resolvable:$true] %s557_s13 }
  0x6b   : > { %s10553_s20 = scalar_lea.hbm %s11789_s7, %s8599_s15  ;;  %s10080_s23 = scalar_lea.hbm %s11789_s7, 32768 }
  0x6c   : > { %s10075_s6 = scalar_lea.hbm %s10553_s20, 16384  ;;  %p10081_p6 = scmp.lt.u32.totalorder %s10553_s20, %s11789_s7 }
  0x6d   : > { %p10076_p12 = scmp.ne.s32.totalorder %s10553_s20, %s10075_s6  ;;  %p10082_p7 = scmp.lt.u32.totalorder %s10080_s23, %s10075_s6 }
  0x6e   : > { %p10084_p8 = scmp.lt.u32.totalorder %s10075_s6, %s10553_s20 }
  0x6f   : > { %p10078_p1 = pnand %p10076_p12, %p10521_p10  ;;  %p10083_p11 = por %p10082_p7, %p10081_p6 }
  0x71   : > { %p10079_p0 = pneg %p10078_p1  ;;  %p10085_p5 = por %p10084_p8, %p10083_p11 }
  0x73   : > { %p10086_p9 = pnand %p10085_p5, %p10079_p0 }
  0x75   : > { %10089 = shalt.err (!%p10086_p9)
}
  0x76   : > { %s10090_s1 = scalar_lea.vmem %s10557_s13, 16384  ;;  %s10311_s25 = smov [#allocation9]  }
  0x77   : > { %p10091_p13 = scmp.ne.s32.totalorder %s10557_s13, %s10090_s1  ;;  %s10095_s10 = sshll.u32 %s10311_s25, 4  ;;  %s10096_s10 = int_to_ptr.vmem [resolvable:$false] %s10095_s10 }
  0x78   : > { %s10097_s16 = scalar_lea.vmem %s10096_s10, 32768  ;;  %p10098_p12 = scmp.lt.s32.totalorder %s10557_s13, %s10096_s10 }
  0x79   : > { %p10093_p2 = pnand %p10091_p13, %p10521_p10  ;;  %p10099_p1 = scmp.lt.s32.totalorder %s10097_s16, %s10090_s1 }
  0x7b   : > { %p10094_p3 = pneg %p10093_p2  ;;  %p10100_p6 = por %p10099_p1, %p10098_p12 }
  0x7d   : > { %p10101_p7 = pnand %p10100_p6, %p10094_p3 }
  0x7f   : > { %10104 = shalt.err (!%p10101_p7)
}
  0x80   : > { %s10312_s6 = smov 1024   ;;  %s11790_s23 = smov 64  }
  0x81   : > { %9163 = dma.hbm_to_vmem [thread:$0]  (!%p10504_p4), %s10553_s20, 16384, %s10557_s13, %s547_s2, %s10312_s6, %s10312_s6, %s11790_s23  }
  0x82   : > { %s10589_s1 = scalar_lea.hbm %s11732_s9, %s8599_s15  ;;  %s590_s25 = scalar_lea.vmem [#allocation12], %s8241_s14 }
  0x83   : > { %s597_s10 = sshll.u32 %s590_s25, 4  ;;  %s10313_s16 = smov [#allocation3]   ;;  %s10593_s10 = int_to_ptr.vmem [resolvable:$true] %s597_s10 }
  0x84   : > { %s449_s27 = sshll.u32 %s10313_s16, 4  ;;  %s8238_s7 = sshll.u32 %s10472_s24, 6  ;;  %s450_s27 = int_to_ptr.vmem [resolvable:$true] %s449_s27 }
  0x85   : > { %s11791_s0 = sld [smem:[#allocation26_spill]]  ;;  %p11792_p11 = scmp.ne.s32.totalorder %s11782_s17, 0 }
  0x87   : > { %p11793_p8 = pneg %p11792_p11 }
  0x8b   : > { %s10105_s28 = scalar_lea.hbm %s11791_s0, 256 }
  0x8c   : > { %p10106_p0 = scmp.ne.s32.totalorder %s11791_s0, %s10105_s28  ;;  %p10112_p13 = scmp.lt.u32.totalorder %s10105_s28, %s11791_s0 }
  0x8e   : > { %p10108_p5 = pnand %p10106_p0, %p11793_p8 }
  0x90   : > { %p10109_p9 = pneg %p10108_p5 }
  0x92   : > { %p10114_p2 = pnand %p10112_p13, %p10109_p9 }
  0x94   : > { %10117 = shalt.err (!%p10114_p2)
}
  0x95   : > { %s10118_s6 = scalar_lea.vmem %s450_s27, 256  ;;  %p11794_p12 = pmov %p11793_p8 }
  0x96   : > { %p10119_p3 = scmp.ne.s32.totalorder %s450_s27, %s10118_s6  ;;  %p10126_p7 = scmp.lt.s32.totalorder %s450_s27, %s450_s27 }
  0x97   : > { %p10127_p4 = scmp.lt.s32.totalorder %s10118_s6, %s10118_s6 }
  0x98   : > { %p10121_p1 = pnand %p10119_p3, %p11794_p12 }
  0x99   : > { %p10128_p10 = por %p10127_p4, %p10126_p7 }
  0x9a   : > { %p10122_p6 = pneg %p10121_p1 }
  0x9c   : > { %p10129_p0 = pnand %p10128_p10, %p10122_p6 }
  0x9e   : > { %10132 = shalt.err (!%p10129_p0)
}
  0x9f   : > { %s10314_s4 = smov 128   ;;  %s10315_s5 = smov 8  }
  0xa0   : > { %9150 = dma.hbm_to_vmem [thread:$0]  (!%p11792_p11), %s11791_s0, 256, %s450_s27, [#allocation4], %s10314_s4, %s10314_s4, %s10315_s5  }
  0xa1   : > { %s8598_s11 = sshll.u32 %s10303_s21, 10  ;;  %s11795_s3 = sld [smem:[#allocation29_spill]] }
  0xa2   : > { %s511_s20 = scalar_lea.vmem [#allocation8], %s8238_s7  ;;  %s8244_s15 = sshll.u32 %s10472_s24, 4 }
  0xa3   : > { %s518_s14 = sshll.u32 %s511_s20, 4  ;;  %p11796_p10 = scmp.ne.s32.totalorder %s11788_s12, 0  ;;  %s10622_s14 = int_to_ptr.vmem [resolvable:$true] %s518_s14 }
  0xa7   : > { %s10620_s13 = scalar_lea.hbm %s11795_s3, %s8598_s11  ;;  %s10138_s4 = scalar_lea.hbm %s11795_s3, 2048 }
  0xa8   : > { %s10133_s17 = scalar_lea.hbm %s10620_s13, 1024  ;;  %p10139_p5 = scmp.lt.u32.totalorder %s10620_s13, %s11795_s3 }
  0xa9   : > { %p10134_p4 = scmp.ne.s32.totalorder %s10620_s13, %s10133_s17  ;;  %p10140_p9 = scmp.lt.u32.totalorder %s10138_s4, %s10133_s17 }
  0xaa   : > { %p10142_p2 = scmp.lt.u32.totalorder %s10133_s17, %s10620_s13 }
  0xab   : > { %p10136_p8 = pnand %p10134_p4, %p11796_p10  ;;  %p10141_p13 = por %p10140_p9, %p10139_p5 }
  0xad   : > { %p10137_p11 = pneg %p10136_p8  ;;  %p10143_p3 = por %p10142_p2, %p10141_p13 }
  0xaf   : > { %p10144_p12 = pnand %p10143_p3, %p10137_p11 }
  0xb1   : > { %10147 = shalt.err (!%p10144_p12)
}
  0xb2   : > { %s10148_s7 = scalar_lea.vmem %s10622_s14, 1024  ;;  %s10316_s30 = smov [#allocation8]  }
  0xb3   : > { %p10149_p1 = scmp.ne.s32.totalorder %s10622_s14, %s10148_s7  ;;  %s10153_s11 = sshll.u32 %s10316_s30, 4  ;;  %s10154_s11 = int_to_ptr.vmem [resolvable:$false] %s10153_s11 }
  0xb4   : > { %s10155_s25 = scalar_lea.vmem %s10154_s11, 2048  ;;  %p10156_p0 = scmp.lt.s32.totalorder %s10622_s14, %s10154_s11 }
  0xb5   : > { %p10151_p6 = pnand %p10149_p1, %p11796_p10  ;;  %p10157_p4 = scmp.lt.s32.totalorder %s10155_s25, %s10148_s7 }
  0xb7   : > { %p10152_p7 = pneg %p10151_p6  ;;  %p10158_p8 = por %p10157_p4, %p10156_p0 }
  0xb9   : > { %p10159_p5 = pnand %p10158_p8, %p10152_p7 }
  0xbb   : > { %10162 = shalt.err (!%p10159_p5)
}
  0xbc   : > { %p11797_p11 = scmp.ne.s32.totalorder %s11786_s26, 0  ;;  %s11798_s16 = smov 4  }
  0xbd   : > { %s11799_s20 = scalar_lea.sflag [#allocation7], %s10469_s18  ;;  %s8600_s17 = sshll.u32 %s10303_s21, 8 }
  0xbe   : > { %9160 = dma.hbm_to_vmem [thread:$0]  (!%p11797_p11), %s10620_s13, 1024, %s10622_s14, %s11799_s20, %s11790_s23, %s11790_s23, %s11798_s16  }
  0xbf   : > { %s11800_s8 = sld [smem:[#allocation34_spill]]  ;;  %s571_s5 = scalar_lea.vmem [#allocation11], %s8244_s15 }
  0xc0   : > { %s579_s28 = sshll.u32 %s571_s5, 4  ;;  %s580_s28 = int_to_ptr.vmem [resolvable:$true] %s579_s28 }
  0xc5   : > { %s10655_s4 = scalar_lea.hbm %s11800_s8, %s8600_s17  ;;  %s10168_s14 = scalar_lea.hbm %s11800_s8, 512 }
  0xc6   : > { %s10163_s7 = scalar_lea.hbm %s10655_s4, 256  ;;  %p10169_p3 = scmp.lt.u32.totalorder %s10655_s4, %s11800_s8 }
  0xc7   : > { %p10164_p9 = scmp.ne.s32.totalorder %s10655_s4, %s10163_s7  ;;  %p10170_p12 = scmp.lt.u32.totalorder %s10168_s14, %s10163_s7 }
  0xc8   : > { %p10172_p6 = scmp.lt.u32.totalorder %s10163_s7, %s10655_s4 }
  0xc9   : > { %p10166_p13 = pnand %p10164_p9, %p11796_p10  ;;  %p10171_p1 = por %p10170_p12, %p10169_p3 }
  0xcb   : > { %p10167_p2 = pneg %p10166_p13  ;;  %p10173_p7 = por %p10172_p6, %p10171_p1 }
  0xcd   : > { %p10174_p0 = pnand %p10173_p7, %p10167_p2 }
  0xcf   : > { %10177 = shalt.err (!%p10174_p0)
}
  0xd0   : > { %s10178_s24 = scalar_lea.vmem %s580_s28, 256  ;;  %s10317_s15 = smov [#allocation11]  }
  0xd1   : > { %p10179_p4 = scmp.ne.s32.totalorder %s580_s28, %s10178_s24  ;;  %s10183_s25 = sshll.u32 %s10317_s15, 4  ;;  %s10184_s25 = int_to_ptr.vmem [resolvable:$false] %s10183_s25 }
  0xd2   : > { %s10185_s20 = scalar_lea.vmem %s10184_s25, 512  ;;  %p10186_p9 = scmp.lt.s32.totalorder %s580_s28, %s10184_s25 }
  0xd3   : > { %p10181_p8 = pnand %p10179_p4, %p11796_p10  ;;  %p10187_p13 = scmp.lt.s32.totalorder %s10185_s20, %s10178_s24 }
  0xd5   : > { %p10182_p5 = pneg %p10181_p8  ;;  %p10188_p11 = por %p10187_p13, %p10186_p9 }
  0xd7   : > { %p10189_p3 = pnand %p10188_p11, %p10182_p5 }
  0xd9   : > { %10192 = shalt.err (!%p10189_p3)
}
  0xda   : > { %p11801_p12 = scmp.ne.s32.totalorder %s11786_s26, 0  ;;  %s587_s17 = scalar_lea.sflag [#allocation13], %s10469_s18 }
  0xdb   : > { %s10193_s27 = scalar_lea.hbm %s10589_s1, 16384  ;;  %s10198_s7 = scalar_lea.hbm %s11732_s9, 32768 }
  0xdc   : > { %9166 = dma.hbm_to_vmem [thread:$0]  (!%p11801_p12), %s10655_s4, 256, %s580_s28, %s547_s2  }
  0xdd   : > { %p10194_p2 = scmp.ne.s32.totalorder %s10589_s1, %s10193_s27  ;;  %p10199_p11 = scmp.lt.u32.totalorder %s10589_s1, %s11732_s9 }
  0xde   : > { %p10200_p7 = scmp.lt.u32.totalorder %s10198_s7, %s10193_s27  ;;  %p10202_p4 = scmp.lt.u32.totalorder %s10193_s27, %s10589_s1 }
  0xdf   : > { %p10196_p1 = pnand %p10194_p2, %p11796_p10 }
  0xe0   : > { %p10201_p0 = por %p10200_p7, %p10199_p11 }
  0xe1   : > { %p10197_p6 = pneg %p10196_p1 }
  0xe2   : > { %p10203_p8 = por %p10202_p4, %p10201_p0 }
  0xe4   : > { %p10204_p5 = pnand %p10203_p8, %p10197_p6 }
  0xe6   : > { %10207 = shalt.err (!%p10204_p5)
}
  0xe7   : > { %s10208_s2 = scalar_lea.vmem %s10593_s10, 16384  ;;  %s10318_s4 = smov [#allocation12]  }
  0xe8   : > { %p10209_p9 = scmp.ne.s32.totalorder %s10593_s10, %s10208_s2  ;;  %s10213_s28 = sshll.u32 %s10318_s4, 4  ;;  %s10214_s28 = int_to_ptr.vmem [resolvable:$false] %s10213_s28 }
  0xe9   : > { %s10215_s14 = scalar_lea.vmem %s10214_s28, 32768  ;;  %p10216_p2 = scmp.lt.s32.totalorder %s10593_s10, %s10214_s28 }
  0xea   : > { %p10211_p13 = pnand %p10209_p9, %p11796_p10  ;;  %p10217_p1 = scmp.lt.s32.totalorder %s10215_s14, %s10208_s2 }
  0xec   : > { %p10212_p3 = pneg %p10211_p13  ;;  %p10218_p11 = por %p10217_p1, %p10216_p2 }
  0xee   : > { %p10219_p7 = pnand %p10218_p11, %p10212_p3 }
  0xf0   : > { %10222 = shalt.err (!%p10219_p7)
}
  0xf1   : > { %9169 = dma.hbm_to_vmem [thread:$0]  (!%p11801_p12), %s10589_s1, 16384, %s10593_s10, %s587_s17, %s11790_s23, %s11790_s23, %s11798_s16  }
  0xf2   : > { %p11802_p10 = scmp.ne.s32.totalorder %s11781_s29, 0 }
  0xf3   : > { %p11803_p6 = scmp.eq.s32.totalorder (!%p11802_p10), %s10426_s22, 0 }
  0xf4   : > { %627 = sbr.rel (%p11802_p10) target bundleno = 3603 (0xe13), region = 80 }
  0xfb   : > { %10266 = dma.done.wait (%p11803_p6), [#allocation4], 256   ;;  %p11804_p0 = pmov %p11803_p6 }
  0xfc   : > { %s11805_s12 = sld [smem:[#allocation25_spill]]  ;;  %s633_s26 = sand.u32 1, %s10426_s22  }
  0xfd   : > { %10268 = vsyncadd (%p11804_p0), [#allocation4], 4294967040  ;;  %s635_s30 = sand.u32 1, %s10295_s19   ;;  %s634_s24 = scalar_lea.sflag [#allocation7], %s633_s26 }
  0xfe   : > { %s9123_s11 = smul.u32 192, %s635_s30 }
 0x100   : > { %s10713_s18 = scalar_lea.vmem [#allocation6], %s9123_s11 }
 0x102   : > { %p11806_p4 = scmp.ne.s32.totalorder %s11805_s12, 0 }
 0x104   : > { %10270 = dma.done.wait (%p11806_p4), %s634_s24, 4096  }
 0x105   : > { %10272 = vsyncadd (%p11806_p4), %s634_s24, 4294963200  ;;  %s8252_s29 = sshll.u32 %s635_s30, 6  ;;  %s8253_s23 = sshll.u32 %s635_s30, 10 }
 0x106   : > { %s10719_s1 = scalar_lea.vmem [#allocation8], %s8252_s29  ;;  %s652_s10 = scalar_lea.sflag [#allocation10], %s633_s26 }
 0x107   : > { %s10721_s16 = scalar_lea.vmem [#allocation9], %s8253_s23 }
 0x108   : > { %10274 = dma.done.wait (%p11806_p4), %s652_s10, 16640  }
 0x109   : > { %10276 = vsyncadd (%p11806_p4), %s652_s10, 4294950656  ;;  %s8254_s15 = sshll.u32 %s635_s30, 4  ;;  %s670_s20 = scalar_lea.sflag [#allocation13], %s633_s26 }
 0x10a   : > { %s10727_s25 = scalar_lea.vmem [#allocation11], %s8254_s15  ;;  %s10729_s17 = scalar_lea.vmem [#allocation12], %s8253_s23 }
 0x10b   : > { %10278 = dma.done.wait (%p11806_p4), %s670_s20, 16384  }
 0x10c   : > { %10280 = vsyncadd (%p11806_p4), %s670_s20, 4294950912  ;;  %p11807_p12 = pmov %p11804_p0 }
 0x10d   : > { %p11808_p8 = pmov %p11804_p0 }
 0x10e   : > { %10282 = dma.done.wait (%p11807_p12), [#allocation13], 1024  }
 0x10f   : > { %10284 = vsyncadd (%p11808_p8), [#allocation13], 4294966272  ;;  %p761_p5 = scmp.lt.s32.totalorder %s10426_s22, 1  ;;  %s11810_s28 = sld [smem:[#allocation31_spill]] }
 0x110   : > { %s11811_s30 = sld [smem:[#allocation32_spill]]  ;;  %s11812_s23 = sld [smem:[#allocation28_spill]] }
 0x111   : > { %s10741_s27 = scalar_select %p761_p5, %s10426_s22, 1 }
 0x112   : > { %s11813_s0 = sld [smem:[#allocation35_spill]]  ;;  %s11814_s7 = sld [smem:[#allocation36_spill]] }
 0x113   : > { %s9124_s6 = smul.u32 3, %s10741_s27  ;;  %s11815_s4 = sld [smem:[#allocation37_spill]] }
 0x114   : > { %p11816_p9 = scmp.ne.s32.totalorder %s10426_s22, 0 }
 0x115   : > { %s770_s14 = scalar_lea.vmem %s11810_s28, %s10741_s27  ;;  %v788_v0 = vld [vmem:[#allocation3] sm:$0xff] (!%p11816_p9)  ;;  %v789_v1 = vld [vmem:[#allocation3 + $0x8] sm:$0xff] (!%p11816_p9) }
 0x116   : > { %s773_s11 = scalar_lea.vmem %s11811_s30, %s10741_s27  ;;  %s10759_s10 = scalar_lea.vmem %s11812_s23, %s9124_s6  ;;  %790 = vst [vmem:[#allocation2] sm:$0xff] (!%p11816_p9), %v788_v0  ;;  %791 = vst [vmem:[#allocation2 + $0x8] sm:$0xff] (!%p11816_p9), %v789_v1 }
 0x117   : > { %787 = sbr.rel (%p11816_p9) target bundleno = 286 (0x11e), region = 112 }
 0x118   : > { %s776_s3 = scalar_lea.vmem %s11813_s0, %s10741_s27  ;;  %s779_s13 = scalar_lea.vmem %s11814_s7, %s10741_s27 }
 0x119   : > { %s782_s28 = scalar_lea.vmem %s11815_s4, %s10741_s27 }
 0x11e PF: > { %v9767_v2 = vld [vmem:[%s10713_s18 + $0x4] ss:$12 sps:$4 sm:$0xff]   ;;  %v9769_v3 = vld [vmem:[%s10713_s18] ss:$12 sps:$4 sm:$0xff]   ;;  %v10319_v4 = vmov 0   ;;  %v10320_v5 = vmov 0.0   ;;  %v829_v31 = vlaneseq }
 0x11f   : > { %1004 = vmatprep.mubr.bf16.mxu0 %v10319_v4  ;;  %8869 = vmatprep.subr.bf16.mxu1 %v10320_v5  ;;  %v9770_v6 = vld [vmem:[%s10713_s18 + $0x1c] ss:$12 sps:$4 sm:$0xff]   ;;  %v9772_v7 = vld [vmem:[%s10713_s18 + $0x18] ss:$12 sps:$4 sm:$0xff]   ;;  %v9773_v8 = vld [vmem:[%s10713_s18 + $0x34] ss:$12 sps:$4 sm:$0xff]  }
 0x120   : > { %972 = vmatprep.subr.bf16.mxu0 %v9767_v2  ;;  %v9775_v9 = vld [vmem:[%s10713_s18 + $0x30] ss:$12 sps:$4 sm:$0xff]   ;;  %v9776_v10 = vld [vmem:[%s10713_s18 + $0x4c] ss:$12 sps:$4 sm:$0xff]   ;;  %v9778_v11 = vld [vmem:[%s10713_s18 + $0x48] ss:$12 sps:$4 sm:$0xff]  }
 0x121   : > { %973 = vmatpush1.bf16.msra.mxu0 %v9769_v3  ;;  %v9779_v12 = vld [vmem:[%s10713_s18 + $0x64] ss:$12 sps:$4 sm:$0xff]   ;;  %v9791_v13 = vld [vmem:[%s10713_s18 + $0x8] ss:$12 sps:$4 sm:$0xff]   ;;  %v9792_v14 = vld [vmem:[%s10713_s18 + $0x20] ss:$12 sps:$4 sm:$0xff]  }
 0x122   : > { %974 = vmatprep.subr.bf16.mxu0 %v9770_v6  ;;  %8870 = vmatpush3.bf16.msra.mxu1 %v9791_v13  ;;  %v9781_v15 = vld [vmem:[%s10713_s18 + $0x60] ss:$12 sps:$4 sm:$0xff]   ;;  %v9782_v16 = vld [vmem:[%s10713_s18 + $0x7c] ss:$12 sps:$4 sm:$0xff]   ;;  %v9793_v17 = vld [vmem:[%s10713_s18 + $0x38] ss:$12 sps:$4 sm:$0xff]  }
 0x123   : > { %8871 = vmatprep.subr.bf16.mxu1 %v10320_v5  ;;  %v9784_v18 = vld [vmem:[%s10713_s18 + $0x78] ss:$12 sps:$4 sm:$0xff]   ;;  %v9785_v19 = vld [vmem:[%s10713_s18 + $0x94] ss:$12 sps:$4 sm:$0xff]   ;;  %v9794_v20 = vld [vmem:[%s10713_s18 + $0x50] ss:$12 sps:$4 sm:$0xff]  }
 0x124   : > { %v9787_v21 = vld [vmem:[%s10713_s18 + $0x90] ss:$12 sps:$4 sm:$0xff]   ;;  %v9788_v22 = vld [vmem:[%s10713_s18 + $0xac] ss:$12 sps:$4 sm:$0xff]   ;;  %v9790_v23 = vld [vmem:[%s10713_s18 + $0xa8] ss:$12 sps:$4 sm:$0xff]  }
 0x125   : > { %975 = vmatpush1.bf16.msra.mxu0 %v9772_v7  ;;  %v792_v24 = vld [vmem:[#allocation2] sm:$0xff]  ;;  %v793_v25 = vld [vmem:[#allocation2 + $0x8] sm:$0xff]  ;;  %vm10321_vm0 = vmmov 0   ;;  %v9798_v30 = vld [vmem:[%s10713_s18 + $0xb0] ss:$12 sps:$4 sm:$0xff]   ;;  %v10816_v32 = vshrl.u32 %v829_v31, 7 }
 0x126   : > { %976 = vmatprep.subr.bf16.mxu0 %v9773_v8  ;;  %8872 = vmatpush3.bf16.msra.mxu1 %v9792_v14  ;;  %v794_v26 = vpack.c.bf16 %v793_v25, %v792_v24  ;;  %v9795_v27 = vld [vmem:[%s10713_s18 + $0x68] ss:$12 sps:$4 sm:$0xff]   ;;  %v9796_v28 = vld [vmem:[%s10713_s18 + $0x80] ss:$12 sps:$4 sm:$0xff]   ;;  %v9797_v29 = vld [vmem:[%s10713_s18 + $0x98] ss:$12 sps:$4 sm:$0xff]  }
 0x127   : > { %8873 = vmatprep.subr.bf16.mxu1 %v10320_v5  ;;  %8885 = vmatprep.mubr.msk.bf16.mxu1 %vm10321_vm0, %v10320_v5  ;;  %v10819_v33 = vsub.s32 0, %v10816_v32  ;;  %v827_v34 = vld [vmem:[%s10759_s10] sm:$0x7]  ;;  %v10823_v35 = vsub.s32 1, %v10816_v32  ;;  %v10828_v50 = vsub.s32 2, %v10816_v32  ;;  %vm2834_vm1 = vcmask 130048  }
 0x128   : > { %vm3571_vm2 = vcmask 64512   ;;  %vm3767_vm3 = vcmask 1043456   ;;  %s11817_s18 = sld [smem:[#allocation30_spill]]  ;;  %p8584_p13 = scmp.ne.s32.totalorder %s10426_s22, 1 }
 0x129   : > { %977 = vmatpush1.bf16.msra.mxu0 %v9775_v9  ;;  %v832_v36 = vrot.slane %v827_v34, %v10819_v33  ;;  %v836_v37 = vrot.slane %v827_v34, %v10823_v35  ;;  %v840_v52 = vrot.slane %v827_v34, %v10828_v50  ;;  %vm10323_vm4 = vmmov (!%p8584_p13), 0   ;;  %s11824_s20 = sld [smem:[#allocation39_spill]] (!%p8584_p13) }
 0x12a   : > { %978 = vmatprep.subr.bf16.mxu0 %v9776_v10  ;;  %8874 = vmatpush3.bf16.msra.mxu1 %v9793_v17 }
 0x12b   : > { %8875 = vmatprep.subr.bf16.mxu1 %v10320_v5 }
 0x12d   : > { %979 = vmatpush1.bf16.msra.mxu0 %v9778_v11 }
 0x12e   : > { %980 = vmatprep.subr.bf16.mxu0 %v9779_v12  ;;  %8876 = vmatpush3.bf16.msra.mxu1 %v9794_v20 }
 0x12f   : > { %8877 = vmatprep.subr.bf16.mxu1 %v10320_v5 }
 0x131   : > { %981 = vmatpush1.bf16.msra.mxu0 %v9781_v15 }
 0x132   : > { %982 = vmatprep.subr.bf16.mxu0 %v9782_v16  ;;  %8878 = vmatpush3.bf16.msra.mxu1 %v9795_v27 }
 0x133   : > { %8879 = vmatprep.subr.bf16.mxu1 %v10320_v5 }
 0x135   : > { %983 = vmatpush1.bf16.msra.mxu0 %v9784_v18 }
 0x136   : > { %984 = vmatprep.subr.bf16.mxu0 %v9785_v19  ;;  %8880 = vmatpush3.bf16.msra.mxu1 %v9796_v28 }
 0x137   : > { %8881 = vmatprep.subr.bf16.mxu1 %v10320_v5 }
 0x139   : > { %985 = vmatpush1.bf16.msra.mxu0 %v9787_v21 }
 0x13a   : > { %986 = vmatprep.subr.bf16.mxu0 %v9788_v22  ;;  %8882 = vmatpush3.bf16.msra.mxu1 %v9797_v29 }
 0x13b   : > { %8883 = vmatprep.subr.bf16.mxu1 %v10320_v5 }
 0x13d   : > { %987 = vmatpush1.bf16.msra.mxu0 %v9790_v23 }
 0x13e   : > { %8913 = vmatprep.subr.bf16.mxu0 %v10320_v5  ;;  %8884 = vmatpush3.bf16.msra.mxu1 %v9798_v30 }
 0x13f   : > { %8889 = vmatprep.subr.bf16.mxu1 %v10320_v5 }
 0x140   : > { %1005 = vmatmul.mubr.bf16.vlgmr.msra.gmra.mrb[0].mxu0 %v794_v26 }
 0x141   : > { %8915 = vmatprep.mubr.msk.bf16.mxu0 %vm10321_vm0, %v10320_v5  ;;  %8886 = vmatmul.mubr.bf16.vlgmr.msra.gmra.mrb[0].mxu1 %v794_v26 }
 0x142   : > { %8891 = vmatprep.mubr.msk.bf16.mxu1 %vm10321_vm0, %v10320_v5 }
 0x213   : > { %v1006_v38 = vpop.f32.mrb[0].mxu0 }
 0x214   : > { %v1007_v39 = vadd.f32 %v1006_v38, %v832_v36  ;;  %v1008_v40 = vpop.f32.mrb[1].mxu0  ;;  %v1049_v51 = vpop.f32.mrb[0].mxu1 }
 0x215   : > { %v1009_v41 = vadd.f32 %v1008_v40, %v836_v37  ;;  %v1010_v42 = vpop.f32.mrb[2].mxu0  ;;  %v8887_v53 = vpop.f32.mrb[1].mxu1  ;;  %v10831_v55 = vadd.f32 %v1049_v51, %v840_v52 }
 0x216   : > { %v1056_v43 = vmul.f32 0.25, %v1007_v39  ;;  %v1011_v44 = vadd.f32 %v1010_v42, %v832_v36  ;;  %v1012_v45 = vpop.f32.mrb[3].mxu0  ;;  %v1052_v54 = vpop.f32.mrb[2].mxu1 }
 0x217   : > { %v1013_v46 = vadd.f32 %v1012_v45, %v836_v37  ;;  %v10833_v56 = vadd.f32 %v1052_v54, %v840_v52  ;;  %v8888_v57 = vpop.f32.mrb[3].mxu1 }
 0x218   : > { %v1057_v47 = vmul.f32 0.25, %v1011_v44  ;;  %v9226_v48 = vpack.i.bf16 %v1056_v43, %v1009_v41 }
 0x219   : > { %v9534_v58 = vpack.i.bf16 %v10833_v56, %v10831_v55 }
 0x21a   : > { %9227 = vxpose.xlu0.b32.start.end [1/1] (short) %v9226_v48, 128  ;;  %v9317_v49 = vpack.i.bf16 %v1057_v47, %v1013_v46 }
 0x21c   : > { %9318 = vxpose.xlu1.b32.start.end [1/1] (short) %v9317_v49, 128 }
 0x29a   : > { %v9228_v59 = vpop.trf.xlu0 }
 0x29b   : > { %9309 = vxpose.xlu0.b32.start [1/2] (short) (narrow) %v9228_v59, 8 }
 0x29c   : > { %v10837_v60 = vpop.trf.xlu1 }
 0x29d   : > { %v9320_v48 = vunpack.i.l.bf16 %v10837_v60 }
 0x29e   : > { %v9233_v61 = vpop.trf.xlu0 }
 0x29f   : > { %9311 = vxpose.xlu0.b32.end [2/2] (short) (narrow) %v9233_v61, 8 }
 0x2a0   : > { %v10839_v62 = vpop.trf.xlu1 }
 0x2a1   : > { %v9325_v61 = vunpack.i.l.bf16 %v10839_v62 }
 0x2a2   : > { %v9238_v63 = vpop.trf.xlu0 }
 0x2a3   : > { %9400 = vxpose.xlu1.b32.start [1/2] (short) (narrow) %v9238_v63, 8 }
 0x2a4   : > { %v10841_v0 = vpop.trf.xlu1 }
 0x2a6   : > { %v9243_v1 = vpop.trf.xlu0 }
 0x2a7   : > { %9402 = vxpose.xlu1.b32.end [2/2] (short) (narrow) %v9243_v1, 8 }
 0x2a8   : > { %v10843_v2 = vpop.trf.xlu1 }
 0x2aa   : > { %v9248_v3 = vpop.trf.xlu0 }
 0x2ab   : > { %9409 = vxpose.xlu0.b32.start [1/2] (short) (narrow) %v9248_v3, 8 }
 0x2ac   : > { %v10845_v6 = vpop.trf.xlu1 }
 0x2ae   : > { %v9253_v7 = vpop.trf.xlu0 }
 0x2af   : > { %9411 = vxpose.xlu0.b32.end [2/2] (short) (narrow) %v9253_v7, 8  ;;  %v9340_v7 = vunpack.i.l.bf16 %v10845_v6 }
 0x2b0   : > { %v10847_v8 = vpop.trf.xlu1 }
 0x2b2   : > { %v9258_v9 = vpop.trf.xlu0 }
 0x2b3   : > { %v9259_v15 = vunpack.i.l.bf16 %v9258_v9  ;;  %v9262_v25 = vunpack.i.h.bf16 %v9258_v9  ;;  %v9323_v9 = vunpack.i.h.bf16 %v10837_v60  ;;  %v9343_v60 = vunpack.i.h.bf16 %v10845_v6 }
 0x2b4   : > { %v10849_v10 = vpop.trf.xlu1  ;;  %v9348_v6 = vunpack.i.h.bf16 %v10847_v8 }
 0x2b6   : > { %v9263_v11 = vpop.trf.xlu0 }
 0x2b7   : > { %v9264_v20 = vunpack.i.l.bf16 %v9263_v11  ;;  %v9267_v30 = vunpack.i.h.bf16 %v9263_v11 }
 0x2b8   : > { %v10851_v12 = vpop.trf.xlu1 }
 0x2ba   : > { %v9268_v13 = vpop.trf.xlu0 }
 0x2bb   : > { %v9269_v14 = vunpack.i.l.bf16 %v9268_v13  ;;  %v9272_v38 = vunpack.i.h.bf16 %v9268_v13 }
 0x2bc   : > { %v10853_v16 = vpop.trf.xlu1 }
 0x2bd   : > { %v9417_v17 = vpack.i.bf16 %v9269_v14, %v9259_v15  ;;  %v9330_v15 = vunpack.i.l.bf16 %v10841_v0 }
 0x2be   : > { %v9273_v18 = vpop.trf.xlu0 }
 0x2bf   : > { %9418 = vxpose.xlu1.b32.start [1/2] (short) (narrow) %v9417_v17, 8  ;;  %v9274_v19 = vunpack.i.l.bf16 %v9273_v18  ;;  %v9277_v43 = vunpack.i.h.bf16 %v9273_v18  ;;  %v9328_v17 = vunpack.i.h.bf16 %v10839_v62  ;;  %v9355_v62 = vunpack.i.l.bf16 %v10851_v12 }
 0x2c0   : > { %v10855_v21 = vpop.trf.xlu1 }
 0x2c1   : > { %v9419_v22 = vpack.i.bf16 %v9274_v19, %v9264_v20  ;;  %v9453_v19 = vpack.i.bf16 %v9340_v7, %v9323_v9 }
 0x2c2   : > { %v9278_v23 = vpop.trf.xlu0 }
 0x2c3   : > { %9420 = vxpose.xlu1.b32.end [2/2] (short) (narrow) %v9419_v22, 8  ;;  %v9279_v24 = vunpack.i.l.bf16 %v9278_v23  ;;  %v9282_v51 = vunpack.i.h.bf16 %v9278_v23  ;;  %v9345_v22 = vunpack.i.l.bf16 %v10847_v8  ;;  %v9335_v23 = vunpack.i.l.bf16 %v10843_v2 }
 0x2c4   : > { %v10857_v26 = vpop.trf.xlu1 }
 0x2c5   : > { %v9426_v27 = vpack.i.bf16 %v9279_v24, %v9262_v25  ;;  %v9333_v24 = vunpack.i.h.bf16 %v10841_v0  ;;  %v9455_v25 = vpack.i.bf16 %v9345_v22, %v9328_v17 }
 0x2c6   : > { %v9283_v28 = vpop.trf.xlu0 }
 0x2c7   : > { %9427 = vxpose.xlu0.b32.start [1/2] (short) (narrow) %v9426_v27, 8  ;;  %v9284_v29 = vunpack.i.l.bf16 %v9283_v28  ;;  %v9287_v1 = vunpack.i.h.bf16 %v9283_v28  ;;  %v9360_v28 = vunpack.i.l.bf16 %v10853_v16 }
 0x2c8   : > { %v10859_v31 = vpop.trf.xlu1 }
 0x2c9   : > { %v9428_v34 = vpack.i.bf16 %v9284_v29, %v9267_v30  ;;  %v9350_v29 = vunpack.i.l.bf16 %v10849_v10  ;;  %v9338_v30 = vunpack.i.h.bf16 %v10843_v2  ;;  %v9368_v2 = vunpack.i.h.bf16 %v10855_v21 }
 0x2ca   : > { %v9288_v36 = vpop.trf.xlu0 }
 0x2cb   : > { %9429 = vxpose.xlu0.b32.end [2/2] (short) (narrow) %v9428_v34, 8  ;;  %v9289_v37 = vunpack.i.l.bf16 %v9288_v36  ;;  %v9292_v46 = vunpack.i.h.bf16 %v9288_v36  ;;  %v9489_v34 = vpack.i.bf16 %v9360_v28, %v9343_v60  ;;  %v9480_v36 = vpack.i.bf16 %v9350_v29, %v9333_v24 }
 0x2cc   : > { %v10861_v39 = vpop.trf.xlu1  ;;  %v9482_v0 = vpack.i.bf16 %v9355_v62, %v9338_v30 }
 0x2cd   : > { %v9435_v40 = vpack.i.bf16 %v9289_v37, %v9272_v38  ;;  %v9444_v54 = vpack.i.bf16 %v9320_v48, %v9292_v46  ;;  %v9365_v37 = vunpack.i.l.bf16 %v10855_v21  ;;  %v9353_v38 = vunpack.i.h.bf16 %v10849_v10 }
 0x2ce   : > { %v9293_v41 = vpop.trf.xlu0  ;;  %v9375_v48 = vunpack.i.l.bf16 %v10859_v31  ;;  %v9373_v21 = vunpack.i.h.bf16 %v10857_v26 }
 0x2cf   : > { %v9294_v42 = vunpack.i.l.bf16 %v9293_v41  ;;  %9436 = vxpose.xlu1.b32.start [1/2] (short) (narrow) %v9435_v40, 8  ;;  %v9297_v52 = vunpack.i.h.bf16 %v9293_v41  ;;  %v9491_v40 = vpack.i.bf16 %v9365_v37, %v9348_v6  ;;  %v9380_v41 = vunpack.i.l.bf16 %v10861_v39 }
 0x2d0   : > { %v10863_v44 = vpop.trf.xlu1 }
 0x2d1   : > { %v9437_v45 = vpack.i.bf16 %v9294_v42, %v9277_v43  ;;  %v9446_v3 = vpack.i.bf16 %v9325_v61, %v9297_v52  ;;  %v9363_v42 = vunpack.i.h.bf16 %v10853_v16  ;;  %v9370_v43 = vunpack.i.l.bf16 %v10857_v26 }
 0x2d2   : > { %v9298_v47 = vpop.trf.xlu0  ;;  %v9383_v16 = vunpack.i.h.bf16 %v10861_v39 }
 0x2d3   : > { %9438 = vxpose.xlu1.b32.end [2/2] (short) (narrow) %v9437_v45, 8  ;;  %v9299_v49 = vunpack.i.l.bf16 %v9298_v47  ;;  %v9302_v14 = vunpack.i.h.bf16 %v9298_v47  ;;  %v9358_v45 = vunpack.i.h.bf16 %v10851_v12  ;;  %v9507_v46 = vpack.i.bf16 %v9380_v41, %v9363_v42 }
 0x2d4   : > { %v10866_v53 = vpop.trf.xlu1  ;;  %v9498_v8 = vpack.i.bf16 %v9370_v43, %v9353_v38  ;;  %v9385_v47 = vunpack.i.l.bf16 %v10863_v44 }
 0x2d5   : > { %v9462_v57 = vpack.i.bf16 %v9299_v49, %v9282_v51  ;;  %v9471_v20 = vpack.i.bf16 %v9330_v15, %v9302_v14  ;;  %v9393_v10 = vunpack.i.h.bf16 %v10866_v53  ;;  %v9500_v51 = vpack.i.bf16 %v9375_v48, %v9358_v45 }
 0x2d6   : > { %v9303_v59 = vpop.trf.xlu0  ;;  %v9509_v49 = vpack.i.bf16 %v9385_v47, %v9368_v2  ;;  %v9390_v52 = vunpack.i.l.bf16 %v10866_v53 }
 0x2d7   : > { %v9304_v63 = vunpack.i.l.bf16 %v9303_v59  ;;  %9445 = vxpose.xlu1.b32.start [1/2] (short) (narrow) %v9444_v54, 8  ;;  %9463 = vxpose.xlu0.b32.start [1/2] (short) (narrow) %v9462_v57, 8  ;;  %v9307_v18 = vunpack.i.h.bf16 %v9303_v59  ;;  %v9525_v12 = vpack.i.bf16 %v9393_v10, %v9383_v16  ;;  %v9388_v57 = vunpack.i.h.bf16 %v10863_v44 }
 0x2d8   : > { %v10871_v11 = vpop.trf.xlu1  ;;  %v9516_v59 = vpack.i.bf16 %v9390_v52, %v9373_v21 }
 0x2d9   : > { %v9464_v13 = vpack.i.bf16 %v9304_v63, %v9287_v1  ;;  %v9473_v27 = vpack.i.bf16 %v9335_v23, %v9307_v18  ;;  %v9398_v54 = vunpack.i.h.bf16 %v10871_v11  ;;  %v9395_v61 = vunpack.i.l.bf16 %v10871_v11 }
 0x2da   : > { %v9378_v63 = vunpack.i.h.bf16 %v10859_v31 }
 0x2db   : > { %9447 = vxpose.xlu1.b32.end [2/2] (short) (narrow) %v9446_v3, 8  ;;  %9465 = vxpose.xlu0.b32.end [2/2] (short) (narrow) %v9464_v13, 8  ;;  %v9527_v39 = vpack.i.bf16 %v9398_v54, %v9388_v57 }
 0x2dc   : > { %v9518_v1 = vpack.i.bf16 %v9395_v61, %v9378_v63 }
 0x2df   : > { %9454 = vxpose.xlu1.b32.start [1/2] (short) (narrow) %v9453_v19, 8  ;;  %9472 = vxpose.xlu0.b32.start [1/2] (short) (narrow) %v9471_v20, 8 }
 0x2e3   : > { %9456 = vxpose.xlu1.b32.end [2/2] (short) (narrow) %v9455_v25, 8  ;;  %9474 = vxpose.xlu0.b32.end [2/2] (short) (narrow) %v9473_v27, 8 }
 0x2e7   : > { %9490 = vxpose.xlu1.b32.start [1/2] (short) (narrow) %v9489_v34, 8  ;;  %9481 = vxpose.xlu0.b32.start [1/2] (short) (narrow) %v9480_v36, 8 }
 0x2eb   : > { %9492 = vxpose.xlu1.b32.end [2/2] (short) (narrow) %v9491_v40, 8  ;;  %9483 = vxpose.xlu0.b32.end [2/2] (short) (narrow) %v9482_v0, 8 }
 0x2ef   : > { %9508 = vxpose.xlu1.b32.start [1/2] (short) (narrow) %v9507_v46, 8  ;;  %9499 = vxpose.xlu0.b32.start [1/2] (short) (narrow) %v9498_v8, 8 }
 0x2f3   : > { %9510 = vxpose.xlu1.b32.end [2/2] (short) (narrow) %v9509_v49, 8  ;;  %9501 = vxpose.xlu0.b32.end [2/2] (short) (narrow) %v9500_v51, 8 }
 0x2f7   : > { %9526 = vxpose.xlu1.b32.start [1/2] (short) (narrow) %v9525_v12, 8  ;;  %9517 = vxpose.xlu0.b32.start [1/2] (short) (narrow) %v9516_v59, 8 }
 0x2fb   : > { %9528 = vxpose.xlu1.b32.end [2/2] (short) (narrow) %v9527_v39, 8  ;;  %9519 = vxpose.xlu0.b32.end [2/2] (short) (narrow) %v9518_v1, 8 }
 0x2ff   : > { %9535 = vxpose.xlu1.b32.start.end [1/1] (short) %v9534_v58, 128 }
 0x31b   : > { %v9312_v26 = vpop.trf.xlu0 }
 0x31c   : > { %v9313_v53 = vunpack.i.l.bf16 %v9312_v26  ;;  %v9316_v44 = vunpack.i.h.bf16 %v9312_v26 }
 0x31e   : > { %v2226_v3 = vpack.c.bf16 %v9313_v53, %v9313_v53  ;;  %v1634_v9 = vpack.c.bf16 %v9316_v44, %v9316_v44 }
 0x320   : > { %v2839_v7 = vsel %vm2834_vm1, %v2226_v3, 0 }
 0x321   : > { %8890 = vmatpush3.bf16.xpose.msra.mxu1 %v2839_v7 }
 0x322   : > { %8895 = vmatprep.subr.bf16.mxu1 %v10320_v5 }
 0x323   : > { %v9403_v31 = vpop.trf.xlu1 }
 0x324   : > { %v9404_v11 = vunpack.i.l.bf16 %v9403_v31  ;;  %v9407_v14 = vunpack.i.h.bf16 %v9403_v31 }
 0x326   : > { %v2227_v13 = vpack.c.bf16 %v9404_v11, %v9404_v11  ;;  %v1635_v58 = vpack.c.bf16 %v9407_v14, %v9407_v14 }
 0x328   : > { %8892 = vmatmul.mubr.msk.bf16.vlgmr.msra.gmra.mrb[4].mxu1 %vm2834_vm1, %v1634_v9  ;;  %v2885_v55 = vsel %vm2834_vm1, %v2227_v13, 0 }
 0x329   : > { %8896 = vmatpush3.bf16.xpose.msra.mxu1 %v2885_v55  ;;  %8897 = vmatprep.mubr.msk.bf16.mxu1 %vm10321_vm0, %v10320_v5 }
 0x32a   : > { %8901 = vmatprep.subr.bf16.mxu1 %v10320_v5 }
 0x32b   : > { %v9412_v56 = vpop.trf.xlu0 }
 0x32c   : > { %v9413_v15 = vunpack.i.l.bf16 %v9412_v56  ;;  %v9416_v18 = vunpack.i.h.bf16 %v9412_v56 }
 0x32e   : > { %v2228_v17 = vpack.c.bf16 %v9413_v15, %v9413_v15  ;;  %v1636_v20 = vpack.c.bf16 %v9416_v18, %v9416_v18 }
 0x330   : > { %8898 = vmatmul.mubr.msk.bf16.vlgmr.msra.gmra.mrb[8].mxu1 %vm2834_vm1, %v1635_v58  ;;  %v2931_v19 = vsel %vm2834_vm1, %v2228_v17, 0 }
 0x331   : > { %8902 = vmatpush3.bf16.xpose.msra.mxu1 %v2931_v19  ;;  %8903 = vmatprep.mubr.msk.bf16.mxu1 %vm10321_vm0, %v10320_v5 }
 0x332   : > { %8907 = vmatprep.subr.bf16.mxu1 %v10320_v5 }
 0x338   : > { %8904 = vmatmul.mubr.msk.bf16.vlgmr.msra.gmra.mrb[12].mxu1 %vm2834_vm1, %v1636_v20 }
 0x339   : > { %8909 = vmatprep.mubr.msk.bf16.mxu1 %vm10321_vm0, %v10320_v5 }
 0x33f   : > { %v9421_v22 = vpop.trf.xlu1 }
 0x340   : > { %v9422_v23 = vunpack.i.l.bf16 %v9421_v22  ;;  %v9425_v60 = vunpack.i.h.bf16 %v9421_v22 }
 0x342   : > { %v2229_v24 = vpack.c.bf16 %v9422_v23, %v9422_v23  ;;  %v2230_v25 = vpack.c.bf16 %v9425_v60, %v9425_v60 }
 0x344   : > { %v2977_v27 = vsel %vm2834_vm1, %v2229_v24, 0  ;;  %v3023_v28 = vsel %vm2834_vm1, %v2230_v25, 0 }
 0x345   : > { %8908 = vmatpush3.bf16.xpose.msra.mxu1 %v2977_v27  ;;  %8914 = vmatpush3.bf16.xpose.msra.mxu0 %v3023_v28 }
 0x346   : > { %8919 = vmatprep.subr.bf16.mxu1 %v10320_v5  ;;  %8925 = vmatprep.subr.bf16.mxu0 %v10320_v5 }
 0x347   : > { %v9430_v29 = vpop.trf.xlu0 }
 0x348   : > { %v9434_v62 = vunpack.i.h.bf16 %v9430_v29  ;;  %v9431_v30 = vunpack.i.l.bf16 %v9430_v29 }
 0x34a   : > { %v1637_v34 = vpack.c.bf16 %v9431_v30, %v9431_v30  ;;  %v2231_v36 = vpack.c.bf16 %v9434_v62, %v9434_v62 }
 0x34c   : > { %8910 = vmatmul.mubr.msk.bf16.vlgmr.msra.gmra.mrb[16].mxu1 %vm2834_vm1, %v1637_v34  ;;  %v3069_v37 = vsel %vm2834_vm1, %v2231_v36, 0 }
 0x34d   : > { %8920 = vmatpush3.bf16.xpose.msra.mxu1 %v3069_v37  ;;  %8921 = vmatprep.mubr.msk.bf16.mxu1 %vm10321_vm0, %v10320_v5 }
 0x34e   : > { %8931 = vmatprep.subr.bf16.mxu1 %v10320_v5 }
 0x34f   : > { %v9439_v6 = vpop.trf.xlu1 }
 0x350   : > { %v9440_v0 = vunpack.i.l.bf16 %v9439_v6  ;;  %v9443_v38 = vunpack.i.h.bf16 %v9439_v6 }
 0x352   : > { %v1638_v40 = vpack.c.bf16 %v9440_v0, %v9440_v0  ;;  %v2232_v41 = vpack.c.bf16 %v9443_v38, %v9443_v38 }
 0x354   : > { %8916 = vmatmul.mubr.msk.bf16.vlgmr.msra.gmra.mrb[4].mxu0 %vm2834_vm1, %v1638_v40  ;;  %v3115_v42 = vsel %vm2834_vm1, %v2232_v41, 0 }
 0x355   : > { %8926 = vmatpush3.bf16.xpose.msra.mxu0 %v3115_v42  ;;  %8927 = vmatprep.mubr.msk.bf16.mxu0 %vm10321_vm0, %v10320_v5 }
 0x356   : > { %8937 = vmatprep.subr.bf16.mxu0 %v10320_v5 }
 0x357   : > { %v9448_v43 = vpop.trf.xlu1  ;;  %v9466_v2 = vpop.trf.xlu0 }
 0x358   : > { %v9449_v45 = vunpack.i.l.bf16 %v9448_v43  ;;  %v9470_v46 = vunpack.i.h.bf16 %v9466_v2  ;;  %v9467_v8 = vunpack.i.l.bf16 %v9466_v2  ;;  %v9452_v47 = vunpack.i.h.bf16 %v9448_v43 }
 0x35a   : > { %v1640_v48 = vpack.c.bf16 %v9449_v45, %v9449_v45  ;;  %v2233_v10 = vpack.c.bf16 %v9470_v46, %v9470_v46  ;;  %v1639_v16 = vpack.c.bf16 %v9467_v8, %v9467_v8  ;;  %v2234_v49 = vpack.c.bf16 %v9452_v47, %v9452_v47 }
 0x35c   : > { %8928 = vmatmul.mubr.msk.bf16.vlgmr.msra.gmra.mrb[8].mxu0 %vm2834_vm1, %v1640_v48  ;;  %v3161_v51 = vsel %vm2834_vm1, %v2233_v10, 0  ;;  %8922 = vmatmul.mubr.msk.bf16.vlgmr.msra.gmra.mrb[20].mxu1 %vm2834_vm1, %v1639_v16  ;;  %v3207_v52 = vsel %vm2834_vm1, %v2234_v49, 0 }
 0x35d   : > { %8939 = vmatprep.mubr.msk.bf16.mxu0 %vm10321_vm0, %v10320_v5  ;;  %8932 = vmatpush3.bf16.xpose.msra.mxu1 %v3161_v51 }
 0x35e   : > { %8938 = vmatpush3.bf16.xpose.msra.mxu0 %v3207_v52  ;;  %8933 = vmatprep.mubr.msk.bf16.mxu1 %vm10321_vm0, %v10320_v5 }
 0x35f   : > { %v9457_v21 = vpop.trf.xlu1  ;;  %v9475_v12 = vpop.trf.xlu0  ;;  %8943 = vmatprep.subr.bf16.mxu1 %v10320_v5  ;;  %8949 = vmatprep.subr.bf16.mxu0 %v10320_v5 }
 0x360   : > { %v9458_v54 = vunpack.i.l.bf16 %v9457_v21  ;;  %v9479_v57 = vunpack.i.h.bf16 %v9475_v12  ;;  %v9476_v59 = vunpack.i.l.bf16 %v9475_v12  ;;  %v9461_v61 = vunpack.i.h.bf16 %v9457_v21 }
 0x362   : > { %v1642_v63 = vpack.c.bf16 %v9458_v54, %v9458_v54  ;;  %v2235_v39 = vpack.c.bf16 %v9479_v57, %v9479_v57  ;;  %v1641_v1 = vpack.c.bf16 %v9476_v59, %v9476_v59  ;;  %v2236_v26 = vpack.c.bf16 %v9461_v61, %v9461_v61 }
 0x364   : > { %v3253_v53 = vsel %vm2834_vm1, %v2235_v39, 0  ;;  %8934 = vmatmul.mubr.msk.bf16.vlgmr.msra.gmra.mrb[24].mxu1 %vm2834_vm1, %v1641_v1  ;;  %v3299_v3 = vsel %vm2834_vm1, %v2236_v26, 0 }
 0x365   : > { %8940 = vmatmul.mubr.msk.bf16.vlgmr.msra.gmra.mrb[12].mxu0 %vm2834_vm1, %v1642_v63  ;;  %8944 = vmatpush3.bf16.xpose.msra.mxu1 %v3253_v53 }
 0x366   : > { %8950 = vmatpush3.bf16.xpose.msra.mxu0 %v3299_v3  ;;  %8945 = vmatprep.mubr.msk.bf16.mxu1 %vm10321_vm0, %v10320_v5 }
 0x367   : > { %v9493_v44 = vpop.trf.xlu1  ;;  %v9484_v7 = vpop.trf.xlu0  ;;  %8951 = vmatprep.mubr.msk.bf16.mxu0 %vm10321_vm0, %v10320_v5  ;;  %8955 = vmatprep.subr.bf16.mxu1 %v10320_v5 }
 0x368   : > { %v9494_v31 = vunpack.i.l.bf16 %v9493_v44  ;;  %v9488_v9 = vunpack.i.h.bf16 %v9484_v7  ;;  %8961 = vmatprep.subr.bf16.mxu0 %v10320_v5  ;;  %v9485_v11 = vunpack.i.l.bf16 %v9484_v7  ;;  %v9497_v13 = vunpack.i.h.bf16 %v9493_v44 }
 0x36a   : > { %v1644_v14 = vpack.c.bf16 %v9494_v31, %v9494_v31  ;;  %v2237_v55 = vpack.c.bf16 %v9488_v9, %v9488_v9  ;;  %v1643_v56 = vpack.c.bf16 %v9485_v11, %v9485_v11  ;;  %v2238_v58 = vpack.c.bf16 %v9497_v13, %v9497_v13 }
 0x36c   : > { %v3345_v15 = vsel %vm2834_vm1, %v2237_v55, 0  ;;  %8946 = vmatmul.mubr.msk.bf16.vlgmr.msra.gmra.mrb[28].mxu1 %vm2834_vm1, %v1643_v56  ;;  %v3391_v17 = vsel %vm2834_vm1, %v2238_v58, 0 }
 0x36d   : > { %8952 = vmatmul.mubr.msk.bf16.vlgmr.msra.gmra.mrb[16].mxu0 %vm2834_vm1, %v1644_v14  ;;  %8956 = vmatpush3.bf16.xpose.msra.mxu1 %v3345_v15 }
 0x36e   : > { %8962 = vmatpush3.bf16.xpose.msra.mxu0 %v3391_v17  ;;  %8957 = vmatprep.mubr.msk.bf16.mxu1 %vm10321_vm0, %v10320_v5 }
 0x36f   : > { %v9511_v18 = vpop.trf.xlu1  ;;  %v9502_v19 = vpop.trf.xlu0  ;;  %8963 = vmatprep.mubr.msk.bf16.mxu0 %vm10321_vm0, %v10320_v5  ;;  %8967 = vmatprep.subr.bf16.mxu1 %v10320_v5 }
 0x370   : > { %v9512_v20 = vunpack.i.l.bf16 %v9511_v18  ;;  %v9506_v22 = vunpack.i.h.bf16 %v9502_v19  ;;  %8973 = vmatprep.subr.bf16.mxu0 %v10320_v5  ;;  %v9503_v23 = vunpack.i.l.bf16 %v9502_v19  ;;  %v9515_v60 = vunpack.i.h.bf16 %v9511_v18 }
 0x372   : > { %v1646_v24 = vpack.c.bf16 %v9512_v20, %v9512_v20  ;;  %v2239_v25 = vpack.c.bf16 %v9506_v22, %v9506_v22  ;;  %v1645_v27 = vpack.c.bf16 %v9503_v23, %v9503_v23  ;;  %v2240_v28 = vpack.c.bf16 %v9515_v60, %v9515_v60 }
 0x374   : > { %v3437_v29 = vsel %vm2834_vm1, %v2239_v25, 0  ;;  %8958 = vmatmul.mubr.msk.bf16.vlgmr.msra.gmra.mrb[32].mxu1 %vm2834_vm1, %v1645_v27  ;;  %v3483_v62 = vsel %vm2834_vm1, %v2240_v28, 0 }
 0x375   : > { %8964 = vmatmul.mubr.msk.bf16.vlgmr.msra.gmra.mrb[20].mxu0 %vm2834_vm1, %v1646_v24  ;;  %8968 = vmatpush3.bf16.xpose.msra.mxu1 %v3437_v29 }
 0x376   : > { %8974 = vmatpush3.bf16.xpose.msra.mxu0 %v3483_v62  ;;  %8969 = vmatprep.mubr.msk.bf16.mxu1 %vm10321_vm0, %v10320_v5 }
 0x377   : > { %v9529_v30 = vpop.trf.xlu1  ;;  %v9520_v34 = vpop.trf.xlu0  ;;  %8975 = vmatprep.mubr.msk.bf16.mxu0 %vm10321_vm0, %v10320_v5  ;;  %8979 = vmatprep.subr.bf16.mxu1 %v10320_v5 }
 0x378   : > { %v9530_v36 = vunpack.i.l.bf16 %v9529_v30  ;;  %8985 = vmatprep.subr.bf16.mxu0 %v10320_v5  ;;  %v9524_v37 = vunpack.i.h.bf16 %v9520_v34  ;;  %v9521_v6 = vunpack.i.l.bf16 %v9520_v34  ;;  %v9533_v41 = vunpack.i.h.bf16 %v9529_v30 }
 0x37a   : > { %v1648_v0 = vpack.c.bf16 %v9530_v36, %v9530_v36  ;;  %v1647_v38 = vpack.c.bf16 %v9521_v6, %v9521_v6  ;;  %v2241_v40 = vpack.c.bf16 %v9524_v37, %v9524_v37  ;;  %v1649_v2 = vpack.c.bf16 %v9533_v41, %v9533_v41 }
 0x37c   : > { %8970 = vmatmul.mubr.msk.bf16.vlgmr.msra.gmra.mrb[36].mxu1 %vm2834_vm1, %v1647_v38  ;;  %v3529_v42 = vsel %vm2834_vm1, %v2241_v40, 0 }
 0x37d   : > { %8976 = vmatmul.mubr.msk.bf16.vlgmr.msra.gmra.mrb[24].mxu0 %vm2834_vm1, %v1648_v0  ;;  %8980 = vmatpush3.bf16.xpose.msra.mxu1 %v3529_v42 }
 0x37e   : > { %8981 = vmatprep.mubr.msk.bf16.mxu1 %vm10321_vm0, %v10320_v5  ;;  %8991 = vmatprep.subr.bf16.mxu1 %v10320_v5 }
 0x37f   : > { %v9536_v43 = vpop.trf.xlu1  ;;  %8987 = vmatprep.mubr.msk.bf16.mxu0 %vm10321_vm0, %v10320_v5 }
 0x380   : > { %v9537_v46 = vunpack.i.l.bf16 %v9536_v43  ;;  %v9540_v22 = vunpack.i.h.bf16 %v9536_v43 }
 0x383   : > { %v9541_v45 = vpop.trf.xlu1 }
 0x384   : > { %8982 = vmatmul.mubr.msk.bf16.vlgmr.msra.gmra.mrb[40].mxu1 %vm2834_vm1, %v1649_v2  ;;  %v9542_v48 = vunpack.i.l.bf16 %v9541_v45  ;;  %v9545_v23 = vunpack.i.h.bf16 %v9541_v45 }
 0x385   : > { %8993 = vmatprep.mubr.msk.bf16.mxu1 %vm10321_vm0, %v10320_v5 }
 0x387   : > { %v9546_v8 = vpop.trf.xlu1 }
 0x388   : > { %v9547_v47 = vunpack.i.l.bf16 %v9546_v8  ;;  %v9550_v60 = vunpack.i.h.bf16 %v9546_v8 }
 0x38a   : > { %v9616_v10 = vpack.i.bf16 %v9547_v47, %v9537_v46 }
 0x38b   : > { %v9551_v16 = vpop.trf.xlu1 }
 0x38c   : > { %v9552_v49 = vunpack.i.l.bf16 %v9551_v16  ;;  %9617 = vxpose.xlu0.b32.start [1/2] (short) (narrow) %v9616_v10, 8  ;;  %v9555_v24 = vunpack.i.h.bf16 %v9551_v16 }
 0x38e   : > { %v9618_v51 = vpack.i.bf16 %v9552_v49, %v9542_v48 }
 0x38f   : > { %v9556_v52 = vpop.trf.xlu1 }
 0x390   : > { %9619 = vxpose.xlu0.b32.end [2/2] (short) (narrow) %v9618_v51, 8  ;;  %v9557_v12 = vunpack.i.l.bf16 %v9556_v52  ;;  %v9560_v7 = vunpack.i.h.bf16 %v9556_v52 }
 0x393   : > { %v9561_v21 = vpop.trf.xlu1 }
 0x394   : > { %v9562_v59 = vunpack.i.l.bf16 %v9561_v21  ;;  %v9565_v11 = vunpack.i.h.bf16 %v9561_v21 }
 0x397   : > { %v10984_v54 = vpop.trf.xlu1 }
 0x398   : > { %v9567_v57 = vunpack.i.l.bf16 %v10984_v54 }
 0x39a   : > { %v9625_v61 = vpack.i.bf16 %v9567_v57, %v9557_v12 }
 0x39b   : > { %v10987_v63 = vpop.trf.xlu1 }
 0x39c   : > { %v9572_v39 = vunpack.i.l.bf16 %v10987_v63  ;;  %9626 = vxpose.xlu0.b32.start [1/2] (short) (narrow) %v9625_v61, 8 }
 0x39e   : > { %v9627_v1 = vpack.i.bf16 %v9572_v39, %v9562_v59 }
 0x39f   : > { %v10990_v26 = vpop.trf.xlu1 }
 0x3a0   : > { %9628 = vxpose.xlu0.b32.end [2/2] (short) (narrow) %v9627_v1, 8  ;;  %v9577_v53 = vunpack.i.l.bf16 %v10990_v26 }
 0x3a2   : > { %2434 = vxpose.xlu1.b32.start [1/2] (short) (narrow) %v9577_v53, 8 }
 0x3a3   : > { %v10993_v3 = vpop.trf.xlu1 }
 0x3a4   : > { %v9582_v44 = vunpack.i.l.bf16 %v10993_v3 }
 0x3a6   : > { %2435 = vxpose.xlu1.b32.end [2/2] (short) (narrow) %v9582_v44, 8 }
 0x3a7   : > { %v10996_v31 = vpop.trf.xlu1 }
 0x3a8   : > { %v9587_v9 = vunpack.i.l.bf16 %v10996_v31 }
 0x3aa   : > { %2466 = vxpose.xlu0.b32.start [1/2] (short) (narrow) %v9587_v9, 8  ;;  %2626 = vxpose.xlu1.b32.start [1/2] (short) (narrow) %v9560_v7, 8 }
 0x3ab   : > { %v10999_v13 = vpop.trf.xlu1 }
 0x3ac   : > { %v9592_v14 = vunpack.i.l.bf16 %v10999_v13 }
 0x3ae   : > { %2467 = vxpose.xlu0.b32.end [2/2] (short) (narrow) %v9592_v14, 8  ;;  %2627 = vxpose.xlu1.b32.end [2/2] (short) (narrow) %v9565_v11, 8 }
 0x3af   : > { %v11002_v55 = vpop.trf.xlu1 }
 0x3b0   : > { %v9597_v56 = vunpack.i.l.bf16 %v11002_v55 }
 0x3b2   : > { %2498 = vxpose.xlu0.b32.start [1/2] (short) (narrow) %v9597_v56, 8 }
 0x3b3   : > { %v11005_v58 = vpop.trf.xlu1 }
 0x3b4   : > { %v9602_v15 = vunpack.i.l.bf16 %v11005_v58 }
 0x3b6   : > { %2499 = vxpose.xlu0.b32.end [2/2] (short) (narrow) %v9602_v15, 8 }
 0x3b7   : > { %v11008_v17 = vpop.trf.xlu1 }
 0x3b8   : > { %v9607_v18 = vunpack.i.l.bf16 %v11008_v17 }
 0x3ba   : > { %2530 = vxpose.xlu0.b32.start [1/2] (short) (narrow) %v9607_v18, 8 }
 0x3bb   : > { %v11011_v19 = vpop.trf.xlu1 }
 0x3bc   : > { %v9612_v20 = vunpack.i.l.bf16 %v11011_v19 }
 0x3be   : > { %2531 = vxpose.xlu0.b32.end [2/2] (short) (narrow) %v9612_v20, 8 }
 0x3c2   : > { %2562 = vxpose.xlu0.b32.start [1/2] (short) (narrow) %v9540_v22, 8 }
 0x3c6   : > { %2563 = vxpose.xlu0.b32.end [2/2] (short) (narrow) %v9545_v23, 8 }
 0x3ca   : > { %2594 = vxpose.xlu0.b32.start [1/2] (short) (narrow) %v9550_v60, 8 }
 0x3ce   : > { %2595 = vxpose.xlu0.b32.end [2/2] (short) (narrow) %v9555_v24, 8 }
 0x3fb   : > { %v11014_v25 = vpop.f32.mrb[4].mxu1 }
 0x3fc   : > { %v3572_v27 = vsel %vm3571_vm2, %v11014_v25, -inf  ;;  %v8893_v28 = vpop.f32.mrb[5].mxu1 }
 0x3fd   : > { %3573 = vmax.xlane.f32.xlu0 %v3572_v27  ;;  %v2878_v29 = vpop.f32.mrb[6].mxu1 }
 0x3fe   : > { %v8894_v62 = vpop.f32.mrb[7].mxu1 }
 0x403   : > { %v11018_v30 = vpop.f32.mrb[8].mxu1 }
 0x404   : > { %v3575_v34 = vsel %vm3571_vm2, %v11018_v30, -inf  ;;  %v8899_v36 = vpop.f32.mrb[9].mxu1 }
 0x405   : > { %3576 = vmax.xlane.f32.xlu1 %v3575_v34  ;;  %v2924_v37 = vpop.f32.mrb[10].mxu1 }
 0x406   : > { %v8900_v6 = vpop.f32.mrb[11].mxu1 }
 0x40b   : > { %v11022_v38 = vpop.f32.mrb[12].mxu1 }
 0x40c   : > { %v9620_v0 = vpop.trf.xlu0  ;;  %v3578_v40 = vsel %vm3571_vm2, %v11022_v38, -inf  ;;  %v8905_v41 = vpop.f32.mrb[13].mxu1 }
 0x40d   : > { %3579 = vmax.xlane.f32.xlu1 %v3578_v40  ;;  %v2970_v42 = vpop.f32.mrb[14].mxu1  ;;  %v9624_v2 = vunpack.i.h.bf16 %v9620_v0  ;;  %v9621_v45 = vunpack.i.l.bf16 %v9620_v0 }
 0x40e   : > { %v8906_v43 = vpop.f32.mrb[15].mxu1 }
 0x40f   : > { %v2818_v46 = vpack.c.bf16 %v9621_v45, %v9621_v45  ;;  %v2819_v8 = vpack.c.bf16 %v9624_v2, %v9624_v2 }
 0x411   : > { %v3769_v47 = vsel %vm3767_vm3, %v2818_v46, 0  ;;  %v3815_v48 = vsel %vm3767_vm3, %v2819_v8, 0 }
 0x412   : > { %8986 = vmatpush3.bf16.msra.mxu0 %v3769_v47  ;;  %8992 = vmatpush3.bf16.msra.mxu1 %v3815_v48 }
 0x413   : > { %8997 = vmatprep.subr.bf16.mxu0 %v10320_v5  ;;  %9003 = vmatprep.subr.bf16.mxu1 %v10320_v5 }
 0x41c   : > { %v11030_v10 = vpop.trf.xlu0 }
 0x41f   : > { %v11032_v16 = vpop.f32.mrb[16].mxu1 }
 0x420   : > { %v3581_v49 = vsel %vm3571_vm2, %v11032_v16, -inf  ;;  %v8911_v51 = vpop.f32.mrb[17].mxu1 }
 0x421   : > { %3582 = vmax.xlane.f32.xlu1 %v3581_v49  ;;  %v3016_v52 = vpop.f32.mrb[18].mxu1 }
 0x422   : > { %v8912_v21 = vpop.f32.mrb[19].mxu1 }
 0x427   : > { %v11036_v12 = vpop.f32.mrb[4].mxu0 }
 0x428   : > { %v8917_v57 = vpop.f32.mrb[5].mxu0  ;;  %v3584_v59 = vsel %vm3571_vm2, %v11036_v12, -inf }
 0x429   : > { %3585 = vmax.xlane.f32.xlu0 %v3584_v59  ;;  %v3062_v61 = vpop.f32.mrb[6].mxu0 }
 0x42a   : > { %v8918_v39 = vpop.f32.mrb[7].mxu0 }
 0x42f   : > { %v11040_v1 = vpop.f32.mrb[8].mxu0  ;;  %v11042_v53 = vpop.f32.mrb[20].mxu1 }
 0x430   : > { %v8929_v44 = vpop.f32.mrb[9].mxu0  ;;  %v3590_v7 = vsel %vm3571_vm2, %v11040_v1, -inf  ;;  %v8923_v9 = vpop.f32.mrb[21].mxu1  ;;  %v3587_v11 = vsel %vm3571_vm2, %v11042_v53, -inf }
 0x431   : > { %3591 = vmax.xlane.f32.xlu0 %v3590_v7  ;;  %v3154_v14 = vpop.f32.mrb[10].mxu0  ;;  %3588 = vmax.xlane.f32.xlu1 %v3587_v11  ;;  %v3108_v56 = vpop.f32.mrb[22].mxu1 }
 0x432   : > { %v8930_v15 = vpop.f32.mrb[11].mxu0  ;;  %v8924_v18 = vpop.f32.mrb[23].mxu1 }
 0x437   : > { %v11048_v20 = vpop.f32.mrb[24].mxu1 }
 0x438   : > { %v11050_v22 = vpop.f32.mrb[12].mxu0  ;;  %v8935_v23 = vpop.f32.mrb[25].mxu1  ;;  %v3593_v27 = vsel %vm3571_vm2, %v11048_v20, -inf }
 0x439   : > { %v8941_v60 = vpop.f32.mrb[13].mxu0  ;;  %v3596_v24 = vsel %vm3571_vm2, %v11050_v22, -inf  ;;  %3594 = vmax.xlane.f32.xlu1 %v3593_v27  ;;  %v3200_v28 = vpop.f32.mrb[26].mxu1 }
 0x43a   : > { %3597 = vmax.xlane.f32.xlu0 %v3596_v24  ;;  %v3246_v29 = vpop.f32.mrb[14].mxu0  ;;  %v8936_v62 = vpop.f32.mrb[27].mxu1 }
 0x43b   : > { %v8942_v34 = vpop.f32.mrb[15].mxu0  ;;  %v11084_v29 = vpop.trf.xlu0 }
 0x43f   : > { %v11056_v36 = vpop.f32.mrb[28].mxu1  ;;  %v11086_v62 = vpop.trf.xlu0 }
 0x440   : > { %v11058_v37 = vpop.f32.mrb[16].mxu0  ;;  %v8947_v6 = vpop.f32.mrb[29].mxu1  ;;  %v3599_v41 = vsel %vm3571_vm2, %v11056_v36, -inf }
 0x441   : > { %v8953_v0 = vpop.f32.mrb[17].mxu0  ;;  %v3602_v40 = vsel %vm3571_vm2, %v11058_v37, -inf  ;;  %3600 = vmax.xlane.f32.xlu1 %v3599_v41  ;;  %v3292_v42 = vpop.f32.mrb[30].mxu1 }
 0x442   : > { %3603 = vmax.xlane.f32.xlu0 %v3602_v40  ;;  %v3338_v43 = vpop.f32.mrb[18].mxu0  ;;  %v8948_v2 = vpop.f32.mrb[31].mxu1 }
 0x443   : > { %v8954_v45 = vpop.f32.mrb[19].mxu0  ;;  %v11088_v34 = vpop.trf.xlu0 }
 0x444   : > { %v11094_v40 = vpop.trf.xlu1 }
 0x447   : > { %v11064_v46 = vpop.f32.mrb[32].mxu1  ;;  %v11090_v6 = vpop.trf.xlu0 }
 0x448   : > { %v11066_v8 = vpop.f32.mrb[20].mxu0  ;;  %v8959_v47 = vpop.f32.mrb[33].mxu1  ;;  %v3605_v49 = vsel %vm3571_vm2, %v11064_v46, -inf }
 0x449   : > { %v3608_v48 = vsel %vm3571_vm2, %v11066_v8, -inf  ;;  %v8965_v51 = vpop.f32.mrb[21].mxu0  ;;  %3606 = vmax.xlane.f32.xlu1 %v3605_v49  ;;  %v3384_v52 = vpop.f32.mrb[34].mxu1 }
 0x44a   : > { %3609 = vmax.xlane.f32.xlu0 %v3608_v48  ;;  %v3430_v21 = vpop.f32.mrb[22].mxu0  ;;  %v8960_v57 = vpop.f32.mrb[35].mxu1 }
 0x44b   : > { %v8966_v59 = vpop.f32.mrb[23].mxu0  ;;  %v11092_v0 = vpop.trf.xlu0 }
 0x44c   : > { %v11097_v43 = vpop.trf.xlu1 }
 0x44f   : > { %v11072_v61 = vpop.f32.mrb[36].mxu1 }
 0x450   : > { %v11074_v39 = vpop.f32.mrb[24].mxu0  ;;  %v3611_v7 = vsel %vm3571_vm2, %v11072_v61, -inf  ;;  %v8971_v9 = vpop.f32.mrb[37].mxu1 }
 0x451   : > { %v3614_v44 = vsel %vm3571_vm2, %v11074_v39, -inf  ;;  %v8977_v11 = vpop.f32.mrb[25].mxu0  ;;  %3612 = vmax.xlane.f32.xlu1 %v3611_v7  ;;  %v3476_v14 = vpop.f32.mrb[38].mxu1 }
 0x452   : > { %3615 = vmax.xlane.f32.xlu0 %v3614_v44  ;;  %v3522_v56 = vpop.f32.mrb[26].mxu0  ;;  %v8972_v15 = vpop.f32.mrb[39].mxu1 }
 0x453   : > { %v8978_v18 = vpop.f32.mrb[27].mxu0 }
 0x457   : > { %v11080_v23 = vpop.f32.mrb[40].mxu1 }
 0x458   : > { %v3617_v60 = vsel %vm3571_vm2, %v11080_v23, -inf  ;;  %v8983_v24 = vpop.f32.mrb[41].mxu1 }
 0x459   : > { %3618 = vmax.xlane.f32.xlu1 %v3617_v60  ;;  %v3568_v27 = vpop.f32.mrb[42].mxu1 }
 0x45a   : > { %v8984_v28 = vpop.f32.mrb[43].mxu1 }
 0x48a   : > { %v3574_v41 = vpop.xlane.xlu0 %3573 }
 0x48b   : > { %v3620_v42 = vsub.f32 %v11014_v25, %v3574_v41 }
 0x48d   : > { %v3636_v2 = vmul.f32 1.442695, %v3620_v42 }
 0x48f   : > { %9935 = vpow2.f32 %v3636_v2 }
 0x492   : > { %v3577_v45 = vpop.xlane.xlu1 %3576 }
 0x493   : > { %v3621_v47 = vsub.f32 %v11018_v30, %v3577_v45 }
 0x495   : > { %v3638_v48 = vmul.f32 1.442695, %v3621_v47 }
 0x497   : > { %9937 = vpow2.f32 %v3638_v48 }
 0x499   : > { %v11100_v49 = vpop.eup %9935 }
 0x49a   : > { %v3580_v51 = vpop.xlane.xlu1 %3579  ;;  %v3668_v52 = vsel %vm3571_vm2, %v11100_v49, 0.0 }
 0x49b   : > { %v3622_v21 = vsub.f32 %v11022_v38, %v3580_v51  ;;  %3669 = vadd.xlane.f32.xlu0 %v3668_v52 }
 0x49d   : > { %v3640_v57 = vmul.f32 1.442695, %v3622_v21 }
 0x49f   : > { %9939 = vpow2.f32 %v3640_v57 }
 0x4a1   : > { %v11105_v25 = vpop.eup %9937 }
 0x4a2   : > { %v3671_v59 = vsel %vm3571_vm2, %v11105_v25, 0.0 }
 0x4a3   : > { %3672 = vadd.xlane.f32.xlu1 %v3671_v59 }
 0x4a9   : > { %v11109_v30 = vpop.eup %9939 }
 0x4aa   : > { %v3674_v7 = vsel %vm3571_vm2, %v11109_v30, 0.0 }
 0x4ab   : > { %3675 = vadd.xlane.f32.xlu0 %v3674_v7 }
 0x4ae   : > { %v3583_v44 = vpop.xlane.xlu1 %3582 }
 0x4af   : > { %v3623_v9 = vsub.f32 %v11032_v16, %v3583_v44 }
 0x4b1   : > { %v3642_v11 = vmul.f32 1.442695, %v3623_v9 }
 0x4b3   : > { %9941 = vpow2.f32 %v3642_v11 }
 0x4b6   : > { %v3586_v38 = vpop.xlane.xlu0 %3585 }
 0x4b7   : > { %v3624_v14 = vsub.f32 %v11036_v12, %v3586_v38 }
 0x4b9   : > { %v3644_v56 = vmul.f32 1.442695, %v3624_v14  ;;  %v9580_v14 = vunpack.i.h.bf16 %v10990_v26 }
 0x4bb   : > { %9943 = vpow2.f32 %v3644_v56 }
 0x4bd   : > { %v11115_v15 = vpop.eup %9941 }
 0x4be   : > { %v3592_v18 = vpop.xlane.xlu0 %3591  ;;  %v3677_v60 = vsel %vm3571_vm2, %v11115_v15, 0.0  ;;  %v3589_v27 = vpop.xlane.xlu1 %3588 }
 0x4bf   : > { %v3626_v24 = vsub.f32 %v11040_v1, %v3592_v18  ;;  %3678 = vadd.xlane.f32.xlu0 %v3677_v60  ;;  %v3625_v16 = vsub.f32 %v11042_v53, %v3589_v27  ;;  %v9585_v60 = vunpack.i.h.bf16 %v10993_v3 }
 0x4c1   : > { %v3648_v28 = vmul.f32 1.442695, %v3626_v24  ;;  %v3646_v41 = vmul.f32 1.442695, %v3625_v16 }
 0x4c3   : > { %9945 = vpow2.f32 %v3646_v41 }
 0x4c4   : > { %9947 = vpow2.f32 %v3648_v28 }
 0x4c5   : > { %v11121_v42 = vpop.eup %9943 }
 0x4c6   : > { %v3680_v12 = vsel %vm3571_vm2, %v11121_v42, 0.0  ;;  %v3595_v45 = vpop.xlane.xlu1 %3594 }
 0x4c7   : > { %v3598_v2 = vpop.xlane.xlu0 %3597  ;;  %3681 = vadd.xlane.f32.xlu0 %v3680_v12  ;;  %v3627_v1 = vsub.f32 %v11048_v20, %v3595_v45 }
 0x4c8   : > { %v3628_v47 = vsub.f32 %v11050_v22, %v3598_v2 }
 0x4c9   : > { %v3650_v48 = vmul.f32 1.442695, %v3627_v1 }
 0x4ca   : > { %v3652_v51 = vmul.f32 1.442695, %v3628_v47 }
 0x4cb   : > { %9949 = vpow2.f32 %v3650_v48 }
 0x4cc   : > { %9951 = vpow2.f32 %v3652_v51 }
 0x4cd   : > { %v11127_v53 = vpop.eup %9945 }
 0x4ce   : > { %v3601_v21 = vpop.xlane.xlu1 %3600  ;;  %v3683_v57 = vsel %vm3571_vm2, %v11127_v53, 0.0  ;;  %v11131_v59 = vpop.eup %9947 }
 0x4cf   : > { %v3604_v52 = vpop.xlane.xlu0 %3603  ;;  %v3629_v7 = vsub.f32 %v11056_v36, %v3601_v21  ;;  %3684 = vadd.xlane.f32.xlu0 %v3683_v57  ;;  %v3686_v9 = vsel %vm3571_vm2, %v11131_v59, 0.0 }
 0x4d0   : > { %v3630_v44 = vsub.f32 %v11058_v37, %v3604_v52 }
 0x4d1   : > { %v3654_v22 = vmul.f32 1.442695, %v3629_v7 }
 0x4d2   : > { %v3656_v20 = vmul.f32 1.442695, %v3630_v44 }
 0x4d3   : > { %3687 = vadd.xlane.f32.xlu0 %v3686_v9  ;;  %9953 = vpow2.f32 %v3654_v22  ;;  %v9570_v22 = vunpack.i.h.bf16 %v10984_v54  ;;  %v9633_v54 = vunpack.i.h.bf16 %v11030_v10 }
 0x4d4   : > { %9955 = vpow2.f32 %v3656_v20  ;;  %v9575_v20 = vunpack.i.h.bf16 %v10987_v63 }
 0x4d5   : > { %v11137_v11 = vpop.eup %9949 }
 0x4d6   : > { %v3607_v38 = vpop.xlane.xlu1 %3606  ;;  %v3689_v37 = vsel %vm3571_vm2, %v11137_v11, 0.0  ;;  %v11143_v36 = vpop.eup %9951  ;;  %2690 = vxpose.xlu1.b32.start [1/2] (short) (narrow) %v9580_v14, 8  ;;  %v9630_v14 = vunpack.i.l.bf16 %v11030_v10  ;;  %v9605_v10 = vunpack.i.h.bf16 %v11005_v58  ;;  %v2822_v58 = vpack.c.bf16 %v11094_v40, %v11094_v40 }
 0x4d7   : > { %v3631_v56 = vsub.f32 %v11064_v46, %v3607_v38  ;;  %3690 = vadd.xlane.f32.xlu0 %v3689_v37  ;;  %v3692_v24 = vsel %vm3571_vm2, %v11143_v36, 0.0  ;;  %v3610_v41 = vpop.xlane.xlu0 %3609  ;;  %v2823_v40 = vpack.c.bf16 %v11084_v29, %v11084_v29 }
 0x4d8   : > { %v3632_v12 = vsub.f32 %v11066_v8, %v3610_v41  ;;  %v2821_v41 = vpack.c.bf16 %v9633_v54, %v9633_v54 }
 0x4d9   : > { %v3658_v18 = vmul.f32 1.442695, %v3631_v56 }
 0x4da   : > { %2691 = vxpose.xlu1.b32.end [2/2] (short) (narrow) %v9585_v60, 8  ;;  %v3660_v47 = vmul.f32 1.442695, %v3632_v12 }
 0x4db   : > { %9957 = vpow2.f32 %v3658_v18  ;;  %3693 = vadd.xlane.f32.xlu0 %v3692_v24  ;;  %v2820_v24 = vpack.c.bf16 %v9630_v14, %v9630_v14 }
 0x4dc   : > { %9959 = vpow2.f32 %v3660_v47 }
 0x4dd   : > { %v11148_v27 = vpop.eup %9953  ;;  %v3861_v63 = vsel %vm3767_vm3, %v2820_v24, 0 }
 0x4de   : > { %v3695_v26 = vsel %vm3571_vm2, %v11148_v27, 0.0  ;;  %v11152_v46 = vpop.eup %9955  ;;  %v3613_v45 = vpop.xlane.xlu1 %3612 }
 0x4df   : > { %3696 = vadd.xlane.f32.xlu0 %v3695_v26  ;;  %v3698_v16 = vsel %vm3571_vm2, %v11152_v46, 0.0  ;;  %v3616_v2 = vpop.xlane.xlu0 %3615  ;;  %v3633_v38 = vsub.f32 %v11072_v61, %v3613_v45  ;;  %v9600_v61 = vunpack.i.h.bf16 %v11002_v55  ;;  %v3907_v45 = vsel %vm3767_vm3, %v2821_v41, 0 }
 0x4e0   : > { %v3634_v1 = vsub.f32 %v11074_v39, %v3616_v2 }
 0x4e1   : > { %v3662_v37 = vmul.f32 1.442695, %v3633_v38 }
 0x4e2   : > { %v3664_v51 = vmul.f32 1.442695, %v3634_v1 }
 0x4e3   : > { %3699 = vadd.xlane.f32.xlu0 %v3698_v16 }
 0x4e4   : > { %9961 = vpow2.f32 %v3664_v51 }
 0x4e5   : > { %v11156_v28 = vpop.eup %9957 }
 0x4e6   : > { %v3701_v3 = vsel %vm3571_vm2, %v11156_v28, 0.0  ;;  %v3619_v48 = vpop.xlane.xlu1 %3618  ;;  %v11163_v57 = vpop.eup %9959 }
 0x4e7   : > { %3702 = vadd.xlane.f32.xlu0 %v3701_v3  ;;  %v3635_v52 = vsub.f32 %v11080_v23, %v3619_v48  ;;  %v3704_v44 = vsel %vm3571_vm2, %v11163_v57, 0.0  ;;  %v3953_v48 = vsel %vm3767_vm3, %v2822_v58, 0 }
 0x4e9   : > { %v3666_v21 = vmul.f32 1.442695, %v3635_v52 }
 0x4eb   : > { %9963 = vpow2.f32 %v3666_v21 }
 0x4ee   : > { %v11167_v7 = vpop.eup %9961 }
 0x4ef   : > { %v3710_v8 = vsel %vm3571_vm2, %v11167_v7, 0.0 }
 0x4f5   : > { %v11171_v39 = vpop.eup %9963 }
 0x4f6   : > { %v3713_v23 = vsel %vm3571_vm2, %v11171_v39, 0.0 }
 0x501   : > { %3705 = vadd.xlane.f32.xlu1 %v3704_v44 }
 0x505   : > { %3711 = vadd.xlane.f32.xlu1 %v3710_v8  ;;  %v3999_v8 = vsel %vm3767_vm3, %v2823_v40, 0 }
 0x509   : > { %3714 = vadd.xlane.f32.xlu1 %v3713_v23 }
 0x514   : > { %2658 = vxpose.xlu0.b32.start [1/2] (short) (narrow) %v9570_v22, 8 }
 0x518   : > { %2659 = vxpose.xlu0.b32.end [2/2] (short) (narrow) %v9575_v20, 8  ;;  %v2824_v20 = vpack.c.bf16 %v11086_v62, %v11086_v62  ;;  %v2825_v62 = vpack.c.bf16 %v11088_v34, %v11088_v34 }
 0x51a   : > { %v4045_v38 = vsel %vm3767_vm3, %v2824_v20, 0  ;;  %v4091_v24 = vsel %vm3767_vm3, %v2825_v62, 0 }
 0x528   : > { %v3670_v9 = vpop.xlane.xlu0 %3669 }
 0x529   : > { %9965 = vrcp.f32 %v3670_v9 }
 0x530   : > { %v3673_v56 = vpop.xlane.xlu1 %3672 }
 0x531   : > { %9967 = vrcp.f32 %v3673_v56 }
 0x532   : > { %9969 = vpow2.f32 %v3662_v37 }
 0x533   : > { %v9966_v18 = vpop.eup %9965 }
 0x534   : > { %v3732_v60 = vmul.f32 %v9966_v18, %v11100_v49 }
 0x536   : > { %v3748_v26 = vpack.c.bf16 %v3732_v60, %v3732_v60 }
 0x538   : > { %8988 = vmatmul.mubr.msk.bf16.vlgmr.msra.gmra.mrb[28].mxu0 %vm3571_vm2, %v3748_v26  ;;  %v3676_v16 = vpop.xlane.xlu0 %3675  ;;  %v2826_v26 = vpack.c.bf16 %v11090_v6, %v11090_v6  ;;  %v9590_v6 = vunpack.i.h.bf16 %v10996_v31 }
 0x539   : > { %8998 = vmatpush3.bf16.msra.mxu0 %v3861_v63  ;;  %9971 = vrcp.f32 %v3676_v16  ;;  %8999 = vmatprep.mubr.msk.bf16.mxu0 %vm10321_vm0, %v10320_v5 }
 0x53a   : > { %9009 = vmatprep.subr.bf16.mxu0 %v10320_v5  ;;  %v4137_v16 = vsel %vm3767_vm3, %v2826_v26, 0 }
 0x53b   : > { %v9968_v49 = vpop.eup %9967 }
 0x53c   : > { %v3733_v3 = vmul.f32 %v9968_v49, %v11105_v25  ;;  %2754 = vxpose.xlu1.b32.start [1/2] (short) (narrow) %v9600_v61, 8  ;;  %v11189_v2 = vpop.eup %9969 }
 0x53d   : > { %v3707_v55 = vsel %vm3571_vm2, %v11189_v2, 0.0 }
 0x53e   : > { %v3749_v12 = vpack.c.bf16 %v3733_v3, %v3733_v3 }
 0x540   : > { %2755 = vxpose.xlu1.b32.end [2/2] (short) (narrow) %v9605_v10, 8  ;;  %8994 = vmatmul.mubr.msk.bf16.vlgmr.msra.gmra.mrb[44].mxu1 %vm3571_vm2, %v3749_v12  ;;  %v9595_v10 = vunpack.i.h.bf16 %v10999_v13 }
 0x541   : > { %9004 = vmatpush3.bf16.msra.mxu1 %v3907_v45  ;;  %9005 = vmatprep.mubr.msk.bf16.mxu1 %vm10321_vm0, %v10320_v5 }
 0x542   : > { %9015 = vmatprep.subr.bf16.mxu1 %v10320_v5 }
 0x543   : > { %v9972_v25 = vpop.eup %9971 }
 0x544   : > { %v3734_v47 = vmul.f32 %v9972_v25, %v11109_v30 }
 0x545   : > { %3708 = vadd.xlane.f32.xlu0 %v3707_v55 }
 0x546   : > { %v3750_v1 = vpack.c.bf16 %v3734_v47, %v3734_v47 }
 0x548   : > { %9000 = vmatmul.mubr.msk.bf16.vlgmr.msra.gmra.mrb[32].mxu0 %vm3571_vm2, %v3750_v1 }
 0x549   : > { %9010 = vmatpush3.bf16.msra.mxu0 %v3953_v48  ;;  %9011 = vmatprep.mubr.msk.bf16.mxu0 %vm10321_vm0, %v10320_v5 }
 0x54a   : > { %9021 = vmatprep.subr.bf16.mxu0 %v10320_v5 }
 0x54c   : > { %v3679_v51 = vpop.xlane.xlu0 %3678 }
 0x54d   : > { %9973 = vrcp.f32 %v3679_v51 }
 0x554   : > { %v3682_v52 = vpop.xlane.xlu0 %3681 }
 0x555   : > { %9975 = vrcp.f32 %v3682_v52 }
 0x557   : > { %v9974_v21 = vpop.eup %9973 }
 0x558   : > { %v3735_v30 = vmul.f32 %v9974_v21, %v11115_v15 }
 0x55a   : > { %v3751_v44 = vpack.c.bf16 %v3735_v30, %v3735_v30 }
 0x55c   : > { %9006 = vmatmul.mubr.msk.bf16.vlgmr.msra.gmra.mrb[48].mxu1 %vm3571_vm2, %v3751_v44  ;;  %v3685_v23 = vpop.xlane.xlu0 %3684 }
 0x55d   : > { %9016 = vmatpush3.bf16.msra.mxu1 %v3999_v8  ;;  %9017 = vmatprep.mubr.msk.bf16.mxu1 %vm10321_vm0, %v10320_v5  ;;  %9977 = vrcp.f32 %v3685_v23 }
 0x55e   : > { %9027 = vmatprep.subr.bf16.mxu1 %v10320_v5 }
 0x55f   : > { %v9976_v22 = vpop.eup %9975 }
 0x560   : > { %v3736_v29 = vmul.f32 %v9976_v22, %v11121_v42  ;;  %v3688_v15 = vpop.xlane.xlu0 %3687 }
 0x561   : > { %9979 = vrcp.f32 %v3688_v15 }
 0x562   : > { %v3752_v9 = vpack.c.bf16 %v3736_v29, %v3736_v29 }
 0x564   : > { %9012 = vmatmul.mubr.msk.bf16.vlgmr.msra.gmra.mrb[36].mxu0 %vm3571_vm2, %v3752_v9  ;;  %v3691_v14 = vpop.xlane.xlu0 %3690 }
 0x565   : > { %9022 = vmatpush3.bf16.msra.mxu0 %v4045_v38  ;;  %9023 = vmatprep.mubr.msk.bf16.mxu0 %vm10321_vm0, %v10320_v5  ;;  %9981 = vrcp.f32 %v3691_v14 }
 0x566   : > { %9033 = vmatprep.subr.bf16.mxu0 %v10320_v5 }
 0x567   : > { %v9978_v56 = vpop.eup %9977 }
 0x568   : > { %v3737_v42 = vmul.f32 %v9978_v56, %v11127_v53  ;;  %v3694_v37 = vpop.xlane.xlu0 %3693 }
 0x569   : > { %9983 = vrcp.f32 %v3694_v37 }
 0x56a   : > { %v3753_v18 = vpack.c.bf16 %v3737_v42, %v3737_v42 }
 0x56b   : > { %v9980_v60 = vpop.eup %9979 }
 0x56c   : > { %v3738_v54 = vmul.f32 %v9980_v60, %v11131_v59  ;;  %9018 = vmatmul.mubr.msk.bf16.vlgmr.msra.gmra.mrb[52].mxu1 %vm3571_vm2, %v3753_v18  ;;  %v3697_v63 = vpop.xlane.xlu0 %3696  ;;  %v2827_v59 = vpack.c.bf16 %v11092_v0, %v11092_v0  ;;  %v2828_v0 = vpack.c.bf16 %v11097_v43, %v11097_v43  ;;  %v9610_v43 = vunpack.i.h.bf16 %v11008_v17 }
 0x56d   : > { %9028 = vmatpush3.bf16.msra.mxu1 %v4091_v24  ;;  %9029 = vmatprep.mubr.msk.bf16.mxu1 %vm10321_vm0, %v10320_v5  ;;  %9985 = vrcp.f32 %v3697_v63 }
 0x56e   : > { %v3754_v34 = vpack.c.bf16 %v3738_v54, %v3738_v54  ;;  %9039 = vmatprep.subr.bf16.mxu1 %v10320_v5  ;;  %v4183_v31 = vsel %vm3767_vm3, %v2827_v59, 0  ;;  %v4229_v13 = vsel %vm3767_vm3, %v2828_v0, 0 }
 0x56f   : > { %v9982_v53 = vpop.eup %9981 }
 0x570   : > { %9024 = vmatmul.mubr.msk.bf16.vlgmr.msra.gmra.mrb[40].mxu0 %vm3571_vm2, %v3754_v34  ;;  %v3739_v61 = vmul.f32 %v9982_v53, %v11137_v11  ;;  %v3700_v49 = vpop.xlane.xlu0 %3699 }
 0x571   : > { %9034 = vmatpush3.bf16.msra.mxu0 %v4137_v16  ;;  %9035 = vmatprep.mubr.msk.bf16.mxu0 %vm10321_vm0, %v10320_v5  ;;  %9987 = vrcp.f32 %v3700_v49 }
 0x572   : > { %9045 = vmatprep.subr.bf16.mxu0 %v10320_v5  ;;  %2722 = vxpose.xlu0.b32.start [1/2] (short) (narrow) %v9590_v6, 8  ;;  %v3755_v3 = vpack.c.bf16 %v3739_v61, %v3739_v61 }
 0x573   : > { %v9984_v41 = vpop.eup %9983 }
 0x574   : > { %v3740_v11 = vmul.f32 %v9984_v41, %v11143_v36  ;;  %9030 = vmatmul.mubr.msk.bf16.vlgmr.msra.gmra.mrb[56].mxu1 %vm3571_vm2, %v3755_v3  ;;  %v2706_v36 = vpop.trf.xlu1 }
 0x575   : > { %9040 = vmatpush3.bf16.msra.mxu1 %v4183_v31  ;;  %9041 = vmatprep.mubr.msk.bf16.mxu1 %vm10321_vm0, %v10320_v5  ;;  %v2830_v58 = vpack.c.bf16 %v2706_v36, %v2706_v36 }
 0x576   : > { %2723 = vxpose.xlu0.b32.end [2/2] (short) (narrow) %v9595_v10, 8  ;;  %v3756_v12 = vpack.c.bf16 %v3740_v11, %v3740_v11  ;;  %9051 = vmatprep.subr.bf16.mxu1 %v10320_v5 }
 0x577   : > { %v9986_v45 = vpop.eup %9985  ;;  %v4321_v48 = vsel %vm3767_vm3, %v2830_v58, 0 }
 0x578   : > { %v3741_v55 = vmul.f32 %v9986_v45, %v11148_v27  ;;  %9036 = vmatmul.mubr.msk.bf16.vlgmr.msra.gmra.mrb[44].mxu0 %vm3571_vm2, %v3756_v12  ;;  %v9615_v27 = vunpack.i.h.bf16 %v11011_v19 }
 0x579   : > { %9046 = vmatpush3.bf16.msra.mxu0 %v4229_v13  ;;  %9047 = vmatprep.mubr.msk.bf16.mxu0 %vm10321_vm0, %v10320_v5 }
 0x57a   : > { %2786 = vxpose.xlu0.b32.start [1/2] (short) (narrow) %v9610_v43, 8  ;;  %v3757_v25 = vpack.c.bf16 %v3741_v55, %v3741_v55  ;;  %9057 = vmatprep.subr.bf16.mxu0 %v10320_v5 }
 0x57b   : > { %v9988_v47 = vpop.eup %9987 }
 0x57c   : > { %v3742_v1 = vmul.f32 %v9988_v47, %v11152_v46  ;;  %9042 = vmatmul.mubr.msk.bf16.vlgmr.msra.gmra.mrb[60].mxu1 %vm3571_vm2, %v3757_v25  ;;  %v3703_v46 = vpop.xlane.xlu0 %3702 }
 0x57d   : > { %9053 = vmatprep.mubr.msk.bf16.mxu1 %vm10321_vm0, %v10320_v5  ;;  %9989 = vrcp.f32 %v3703_v46 }
 0x57e   : > { %2787 = vxpose.xlu0.b32.end [2/2] (short) (narrow) %v9615_v27, 8  ;;  %v3758_v17 = vpack.c.bf16 %v3742_v1, %v3742_v1 }
 0x580   : > { %9048 = vmatmul.mubr.msk.bf16.vlgmr.msra.gmra.mrb[48].mxu0 %vm3571_vm2, %v3758_v17 }
 0x581   : > { %9058 = vmatpush3.bf16.msra.mxu0 %v4321_v48  ;;  %9059 = vmatprep.mubr.msk.bf16.mxu0 %vm10321_vm0, %v10320_v5 }
 0x582   : > { %9069 = vmatprep.subr.bf16.mxu0 %v10320_v5 }
 0x587   : > { %v9990_v19 = vpop.eup %9989 }
 0x588   : > { %v3743_v21 = vmul.f32 %v9990_v19, %v11156_v28 }
 0x58a   : > { %v3759_v44 = vpack.c.bf16 %v3743_v21, %v3743_v21 }
 0x58e   : > { %v3706_v51 = vpop.xlane.xlu1 %3705 }
 0x58f   : > { %9991 = vrcp.f32 %v3706_v51 }
 0x592   : > { %v3712_v28 = vpop.xlane.xlu1 %3711 }
 0x593   : > { %9993 = vrcp.f32 %v3712_v28 }
 0x594   : > { %v2674_v52 = vpop.trf.xlu0 }
 0x595   : > { %v2829_v40 = vpack.c.bf16 %v2674_v52, %v2674_v52 }
 0x596   : > { %v3715_v20 = vpop.xlane.xlu1 %3714 }
 0x597   : > { %v4275_v30 = vsel %vm3767_vm3, %v2829_v40, 0 }
 0x598   : > { %9052 = vmatpush3.bf16.msra.mxu1 %v4275_v30 }
 0x599   : > { %9063 = vmatprep.subr.bf16.mxu1 %v10320_v5  ;;  %v9992_v8 = vpop.eup %9991 }
 0x59a   : > { %v3744_v23 = vmul.f32 %v9992_v8, %v11163_v57 }
 0x59b   : > { %9054 = vmatmul.mubr.msk.bf16.vlgmr.msra.gmra.mrb[64].mxu1 %vm3571_vm2, %v3759_v44 }
 0x59c   : > { %9065 = vmatprep.mubr.msk.bf16.mxu1 %vm10321_vm0, %v10320_v5  ;;  %v3760_v22 = vpack.c.bf16 %v3744_v23, %v3744_v23 }
 0x59d   : > { %v9994_v29 = vpop.eup %9993 }
 0x59e   : > { %9060 = vmatmul.mubr.msk.bf16.vlgmr.msra.gmra.mrb[52].mxu0 %vm3571_vm2, %v3760_v22  ;;  %v3746_v9 = vmul.f32 %v9994_v29, %v11167_v7 }
 0x59f   : > { %9071 = vmatprep.mubr.msk.bf16.mxu0 %vm10321_vm0, %v10320_v5 }
 0x5a0   : > { %v3762_v57 = vpack.c.bf16 %v3746_v9, %v3746_v9 }
 0x5bc   : > { %v2770_v15 = vpop.trf.xlu1 }
 0x5bd   : > { %v2832_v38 = vpack.c.bf16 %v2770_v15, %v2770_v15 }
 0x5bf   : > { %v4413_v14 = vsel %vm3767_vm3, %v2832_v38, 0 }
 0x5c0   : > { %9070 = vmatpush3.bf16.msra.mxu0 %v4413_v14 }
 0x5c1   : > { %9081 = vmatprep.subr.bf16.mxu0 %v10320_v5 }
 0x5c3   : > { %9072 = vmatmul.mubr.msk.bf16.vlgmr.msra.gmra.mrb[56].mxu0 %vm3571_vm2, %v3762_v57 }
 0x5c4   : > { %9097 = vmatprep.mubr.msk.bf16.mxu0 %vm10321_vm0, %v10320_v5 }
 0x5d2   : > { %v3709_v56 = vpop.xlane.xlu0 %3708 }
 0x5d3   : > { %9995 = vrcp.f32 %v3709_v56 }
 0x5d4   : > { %9997 = vrcp.f32 %v3715_v20 }
 0x5dd   : > { %v9996_v62 = vpop.eup %9995 }
 0x5de   : > { %v3745_v37 = vmul.f32 %v9996_v62, %v11189_v2  ;;  %v9998_v24 = vpop.eup %9997 }
 0x5df   : > { %v3747_v54 = vmul.f32 %v9998_v24, %v11171_v39 }
 0x5e0   : > { %v3761_v60 = vpack.c.bf16 %v3745_v37, %v3745_v37 }
 0x5e1   : > { %v3763_v2 = vpack.c.bf16 %v3747_v54, %v3747_v54 }
 0x5f2   : > { %v2738_v42 = vpop.trf.xlu0 }
 0x5f3   : > { %v2831_v7 = vpack.c.bf16 %v2738_v42, %v2738_v42 }
 0x5f5   : > { %v4367_v18 = vsel %vm3767_vm3, %v2831_v7, 0 }
 0x5f6   : > { %9064 = vmatpush3.bf16.msra.mxu1 %v4367_v18 }
 0x5f7   : > { %9075 = vmatprep.subr.bf16.mxu1 %v10320_v5 }
 0x5f9   : > { %9066 = vmatmul.mubr.msk.bf16.vlgmr.msra.gmra.mrb[68].mxu1 %vm3571_vm2, %v3761_v60 }
 0x5fa   : > { %v2802_v26 = vpop.trf.xlu0  ;;  %9077 = vmatprep.mubr.msk.bf16.mxu1 %vm10321_vm0, %v10320_v5 }
 0x5fb   : > { %v2833_v63 = vpack.c.bf16 %v2802_v26, %v2802_v26 }
 0x5fd   : > { %v4459_v34 = vsel %vm3767_vm3, %v2833_v63, 0 }
 0x5fe   : > { %9076 = vmatpush3.bf16.msra.mxu1 %v4459_v34 }
 0x601   : > { %9078 = vmatmul.mubr.msk.bf16.vlgmr.msra.gmra.mrb[72].mxu1 %vm3571_vm2, %v3763_v2 }
 0x602   : > { %6118 = vmatprep.mubr.bf16.mxu1 %v10319_v4 }
 0x60b   : > { %v3805_v53 = vpop.f32.mrb[28].mxu0 }
 0x60c   : > { %v8989_v16 = vpop.f32.mrb[29].mxu0 }
 0x60d   : > { %v3808_v6 = vpop.f32.mrb[30].mxu0 }
 0x60e   : > { %v8990_v59 = vpop.f32.mrb[31].mxu0 }
 0x613   : > { %v3851_v61 = vpop.f32.mrb[44].mxu1 }
 0x614   : > { %v8995_v49 = vpop.f32.mrb[45].mxu1 }
 0x615   : > { %v3854_v3 = vpop.f32.mrb[46].mxu1 }
 0x616   : > { %v8996_v41 = vpop.f32.mrb[47].mxu1 }
 0x61b   : > { %v3897_v10 = vpop.f32.mrb[32].mxu0 }
 0x61c   : > { %v9001_v31 = vpop.f32.mrb[33].mxu0 }
 0x61d   : > { %v3900_v39 = vpop.f32.mrb[34].mxu0 }
 0x61e   : > { %v9002_v0 = vpop.f32.mrb[35].mxu0 }
 0x62f   : > { %v3943_v11 = vpop.f32.mrb[48].mxu1 }
 0x630   : > { %v9007_v12 = vpop.f32.mrb[49].mxu1 }
 0x631   : > { %v3946_v45 = vpop.f32.mrb[50].mxu1 }
 0x632   : > { %v9008_v13 = vpop.f32.mrb[51].mxu1 }
 0x637   : > { %v3989_v55 = vpop.f32.mrb[36].mxu0 }
 0x638   : > { %v9013_v43 = vpop.f32.mrb[37].mxu0 }
 0x639   : > { %v3992_v36 = vpop.f32.mrb[38].mxu0 }
 0x63a   : > { %v9014_v25 = vpop.f32.mrb[39].mxu0 }
 0x63f   : > { %v4035_v58 = vpop.f32.mrb[52].mxu1 }
 0x640   : > { %v9019_v47 = vpop.f32.mrb[53].mxu1 }
 0x641   : > { %v4038_v1 = vpop.f32.mrb[54].mxu1  ;;  %v9800_v47 = vld [vmem:[%s10719_s1 + $0x8] sm:$0xff]  }
 0x642   : > { %v9020_v27 = vpop.f32.mrb[55].mxu1  ;;  %v9801_v1 = vld [vmem:[%s10719_s1 + $0x10] sm:$0xff]  }
 0x643   : > { %v4081_v17 = vpop.f32.mrb[40].mxu0 }
 0x644   : > { %v9025_v48 = vpop.f32.mrb[41].mxu0 }
 0x645   : > { %v4084_v46 = vpop.f32.mrb[42].mxu0 }
 0x646   : > { %v9026_v51 = vpop.f32.mrb[43].mxu0 }
 0x647   : > { %v4127_v19 = vpop.f32.mrb[56].mxu1  ;;  %v9803_v51 = vld [vmem:[%s10719_s1 + $0x20] sm:$0xff]  }
 0x648   : > { %v9031_v52 = vpop.f32.mrb[57].mxu1 }
 0x649   : > { %v4130_v21 = vpop.f32.mrb[58].mxu1  ;;  %v9804_v52 = vld [vmem:[%s10719_s1 + $0x28] sm:$0xff]  }
 0x64a   : > { %v9032_v40 = vpop.f32.mrb[59].mxu1  ;;  %v9805_v21 = vld [vmem:[%s10719_s1 + $0x30] sm:$0xff]  }
 0x64b   : > { %v4173_v30 = vpop.f32.mrb[44].mxu0 }
 0x64c   : > { %v9634_v44 = vpack.i.bf16 %v4173_v30, %v3805_v53  ;;  %v9037_v8 = vpop.f32.mrb[45].mxu0 }
 0x64d   : > { %v4176_v23 = vpop.f32.mrb[46].mxu0 }
 0x64e   : > { %v9038_v22 = vpop.f32.mrb[47].mxu0  ;;  %9635 = vxpose.xlu1.b32.start.end [1/1] (short) (narrow) %v9634_v44, 16  ;;  %v9806_v44 = vld [vmem:[%s10719_s1 + $0x38] sm:$0xff]  }
 0x64f   : > { %v4219_v28 = vpop.f32.mrb[60].mxu1 }
 0x650   : > { %v9646_v20 = vpack.i.bf16 %v4219_v28, %v3851_v61  ;;  %v9043_v29 = vpop.f32.mrb[61].mxu1 }
 0x651   : > { %v4222_v15 = vpop.f32.mrb[62].mxu1 }
 0x652   : > { %v9044_v9 = vpop.f32.mrb[63].mxu1 }
 0x653   : > { %v4265_v38 = vpop.f32.mrb[48].mxu0  ;;  %9647 = vxpose.xlu1.b32.start.end [1/1] (short) (narrow) %v9646_v20, 16 }
 0x654   : > { %v9658_v14 = vpack.i.bf16 %v4265_v38, %v3897_v10  ;;  %v9049_v57 = vpop.f32.mrb[49].mxu0 }
 0x655   : > { %v4268_v56 = vpop.f32.mrb[50].mxu0 }
 0x656   : > { %v9050_v62 = vpop.f32.mrb[51].mxu0  ;;  %9659 = vxpose.xlu0.b32.start.end [1/1] (short) (narrow) %v9658_v14, 16 }
 0x657   : > { %v10007_v62 = vld [vmem:[#allocation2] sm:$0xff] }
 0x66e   : > { %v4311_v42 = vpop.f32.mrb[64].mxu1 }
 0x66f   : > { %v9670_v37 = vpack.i.bf16 %v4311_v42, %v3943_v11  ;;  %v9055_v7 = vpop.f32.mrb[65].mxu1 }
 0x670   : > { %v4314_v18 = vpop.f32.mrb[66].mxu1 }
 0x671   : > { %9671 = vxpose.xlu1.b32.start.end [1/1] (short) (narrow) %v9670_v37, 16  ;;  %v9056_v60 = vpop.f32.mrb[67].mxu1  ;;  %v4357_v24 = vpop.f32.mrb[52].mxu0  ;;  %v10008_v18 = vld [vmem:[#allocation2 + $0x8] sm:$0xff] }
 0x672   : > { %v9682_v26 = vpack.i.bf16 %v4357_v24, %v3989_v55  ;;  %v9061_v54 = vpop.f32.mrb[53].mxu0  ;;  %v5234_v24 = vld [vmem:[%s10721_s16] sm:$0xff] }
 0x673   : > { %v4360_v63 = vpop.f32.mrb[54].mxu0  ;;  %v5235_v54 = vld [vmem:[%s10721_s16 + $0x8] sm:$0xff] }
 0x674   : > { %9683 = vxpose.xlu0.b32.start.end [1/1] (short) (narrow) %v9682_v26, 16  ;;  %v9062_v34 = vpop.f32.mrb[55].mxu0  ;;  %v5242_v26 = vld [vmem:[%s10721_s16 + $0x40] sm:$0xff] }
 0x675   : > { %v8325_v63 = vcombine.low %v5234_v24, %v5242_v26  ;;  %v8326_v34 = vcombine.high %v5234_v24, %v5242_v26  ;;  %v5339_v26 = vld [vmem:[%s10721_s16 + $0x348] sm:$0xff] }
 0x677   : > { %6086 = vmatprep.subr.bf16.mxu1 %v8326_v34 }
 0x678   : > { %6087 = vmatpush1.bf16.msra.mxu1 %v8325_v63 }
 0x696   : > { %v4449_v2 = vpop.f32.mrb[56].mxu0 }
 0x697   : > { %v9706_v53 = vpack.i.bf16 %v4449_v2, %v4081_v17  ;;  %v9073_v16 = vpop.f32.mrb[57].mxu0  ;;  %v9802_v17 = vld [vmem:[%s10719_s1 + $0x18] sm:$0xff]   ;;  %v5243_v2 = vld [vmem:[%s10721_s16 + $0x48] sm:$0xff] }
 0x698   : > { %v4452_v6 = vpop.f32.mrb[58].mxu0  ;;  %v5258_v16 = vld [vmem:[%s10721_s16 + $0xc0] sm:$0xff] }
 0x699   : > { %9707 = vxpose.xlu0.b32.start.end [1/1] (short) (narrow) %v9706_v53, 16  ;;  %v9074_v59 = vpop.f32.mrb[59].mxu0  ;;  %v5250_v53 = vld [vmem:[%s10721_s16 + $0x80] sm:$0xff]  ;;  %v8327_v6 = vcombine.low %v5235_v54, %v5243_v2 }
 0x69a   : > { %v8328_v59 = vcombine.high %v5235_v54, %v5243_v2  ;;  %v5346_v2 = vld [vmem:[%s10721_s16 + $0x380] sm:$0xff] }
 0x6cc   : > { %v4403_v61 = vpop.f32.mrb[68].mxu1 }
 0x6cd   : > { %v9694_v49 = vpack.i.bf16 %v4403_v61, %v4035_v58  ;;  %v9067_v3 = vpop.f32.mrb[69].mxu1  ;;  %v9799_v58 = vld [vmem:[%s10719_s1] sm:$0xff]   ;;  %s11818_s1 = scalar_lea.vmem %s11817_s18, %s10741_s27  ;;  %v8342_v61 = vcombine.high %v5250_v53, %v5258_v16 }
 0x6ce   : > { %v4406_v41 = vpop.f32.mrb[70].mxu1  ;;  %v9636_v10 = vpop.trf.xlu1  ;;  %9082 = vmatpush3.bf16.msra.mxu0 %v9799_v58  ;;  %v5259_v3 = vld [vmem:[%s10721_s16 + $0xc8] sm:$0xff] }
 0x6cf   : > { %9695 = vxpose.xlu1.b32.start.end [1/1] (short) (narrow) %v9694_v49, 16  ;;  %v9068_v31 = vpop.f32.mrb[71].mxu1  ;;  %9731 = vxpose.xlu0.b32.start [1/16] (narrow) %v9636_v10, 8  ;;  %v5251_v49 = vld [vmem:[%s10721_s16 + $0x88] sm:$0xff]  ;;  %v8341_v10 = vcombine.low %v5250_v53, %v5258_v16  ;;  %v5354_v53 = vld [vmem:[%s10721_s16 + $0x3c0] sm:$0xff] }
 0x6d0   : > { %9083 = vmatprep.subr.bf16.mxu0 %v10320_v5  ;;  %v8344_v41 = vcombine.high %v5251_v49, %v5259_v3  ;;  %6088 = vmatprep.subr.bf16.mxu1 %v8342_v61  ;;  %v8343_v31 = vcombine.low %v5251_v49, %v5259_v3  ;;  %v5267_v58 = vld [vmem:[%s10721_s16 + $0x108] sm:$0xff]  ;;  %v8437_v61 = vcombine.low %v5346_v2, %v5354_v53 }
 0x6d1   : > { %6089 = vmatpush1.bf16.msra.mxu1 %v8341_v10  ;;  %v5347_v16 = vld [vmem:[%s10721_s16 + $0x388] sm:$0xff]  ;;  %v5244_v10 = vld [vmem:[%s10721_s16 + $0x50] sm:$0xff] }
 0x6d2   : > { %v9641_v39 = vpop.trf.xlu1  ;;  %9084 = vmatpush3.bf16.msra.mxu0 %v9800_v47 }
 0x6d3   : > { %9733 = vxpose.xlu0.b32.cont [2/16] (narrow) %v9641_v39, 8  ;;  %9085 = vmatprep.subr.bf16.mxu0 %v10320_v5 }
 0x6d4   : > { %v4495_v0 = vpop.f32.mrb[72].mxu1 }
 0x6d5   : > { %v9718_v11 = vpack.i.bf16 %v4495_v0, %v4127_v19  ;;  %v9079_v12 = vpop.f32.mrb[73].mxu1 }
 0x6d6   : > { %v4498_v45 = vpop.f32.mrb[74].mxu1  ;;  %v9648_v13 = vpop.trf.xlu1  ;;  %9086 = vmatpush3.bf16.msra.mxu0 %v9801_v1  ;;  %v5275_v1 = vld [vmem:[%s10721_s16 + $0x148] sm:$0xff] }
 0x6d7   : > { %9719 = vxpose.xlu1.b32.start.end [1/1] (short) (narrow) %v9718_v11, 16  ;;  %v9080_v55 = vpop.f32.mrb[75].mxu1  ;;  %v9660_v43 = vpop.trf.xlu0  ;;  %9735 = vxpose.xlu0.b32.cont [3/16] (narrow) %v9648_v13, 8 }
 0x6d8   : > { %9087 = vmatprep.subr.bf16.mxu0 %v10320_v5 }
 0x6da   : > { %v9653_v36 = vpop.trf.xlu1  ;;  %9088 = vmatpush3.bf16.msra.mxu0 %v9802_v17  ;;  %v8359_v17 = vcombine.low %v5267_v58, %v5275_v1 }
 0x6db   : > { %v9665_v25 = vpop.trf.xlu0  ;;  %9737 = vxpose.xlu0.b32.cont [4/16] (narrow) %v9653_v36, 8  ;;  %9089 = vmatprep.subr.bf16.mxu0 %v10320_v5  ;;  %v5266_v36 = vld [vmem:[%s10721_s16 + $0x100] sm:$0xff] }
 0x6de   : > { %9090 = vmatpush3.bf16.msra.mxu0 %v9803_v51  ;;  %v5290_v51 = vld [vmem:[%s10721_s16 + $0x1c0] sm:$0xff] }
 0x6df   : > { %9739 = vxpose.xlu0.b32.cont [5/16] (narrow) %v9660_v43, 8  ;;  %9091 = vmatprep.subr.bf16.mxu0 %v10320_v5 }
 0x6e2   : > { %9092 = vmatpush3.bf16.msra.mxu0 %v9804_v52 }
 0x6e3   : > { %9741 = vxpose.xlu0.b32.cont [6/16] (narrow) %v9665_v25, 8  ;;  %9093 = vmatprep.subr.bf16.mxu0 %v10320_v5  ;;  %v5274_v25 = vld [vmem:[%s10721_s16 + $0x140] sm:$0xff] }
 0x6e4   : > { %v8358_v47 = vcombine.high %v5266_v36, %v5274_v25 }
 0x6e6   : > { %9094 = vmatpush3.bf16.msra.mxu0 %v9805_v21  ;;  %6090 = vmatprep.subr.bf16.mxu1 %v8358_v47  ;;  %v5291_v21 = vld [vmem:[%s10721_s16 + $0x1c8] sm:$0xff] }
 0x6e7   : > { %9095 = vmatprep.subr.bf16.mxu0 %v10320_v5  ;;  %v8314_v5 = vld [vmem:[%s11818_s1] ss:$0 sm:$0xff] }
 0x6ea   : > { %9096 = vmatpush3.bf16.msra.mxu0 %v9806_v44 }
 0x6eb   : > { %6129 = vmatprep.subr.bf16.mxu0 %v8328_v59  ;;  %v5355_v59 = vld [vmem:[%s10721_s16 + $0x3c8] sm:$0xff] }
 0x6ec   : > { %v8439_v49 = vcombine.low %v5347_v16, %v5355_v59  ;;  %v8440_v3 = vcombine.high %v5347_v16, %v5355_v59  ;;  %v5316_v59 = vld [vmem:[%s10721_s16 + $0x290] sm:$0xff] }
 0x6f1   : > { %v9672_v27 = vpop.trf.xlu1 }
 0x6f2   : > { %9743 = vxpose.xlu0.b32.cont [7/16] (narrow) %v9672_v27, 8  ;;  %v8357_v27 = vcombine.low %v5266_v36, %v5274_v25 }
 0x6f4   : > { %v9684_v46 = vpop.trf.xlu0  ;;  %6091 = vmatpush1.bf16.msra.mxu1 %v8357_v27 }
 0x6f5   : > { %v9677_v48 = vpop.trf.xlu1 }
 0x6f6   : > { %9745 = vxpose.xlu0.b32.cont [8/16] (narrow) %v9677_v48, 8  ;;  %v8360_v48 = vcombine.high %v5267_v58, %v5275_v1 }
 0x6f8   : > { %v9689_v19 = vpop.trf.xlu0 }
 0x6fa   : > { %9747 = vxpose.xlu0.b32.cont [9/16] (narrow) %v9684_v46, 8  ;;  %v5282_v46 = vld [vmem:[%s10721_s16 + $0x180] sm:$0xff] }
 0x6fb   : > { %v8374_v52 = vcombine.high %v5282_v46, %v5290_v51 }
 0x6fd   : > { %6092 = vmatprep.subr.bf16.mxu1 %v8374_v52  ;;  %v8324_v52 = vld [vmem:[%s773_s11] ss:$0 sm:$0xff] }
 0x6fe   : > { %9749 = vxpose.xlu0.b32.cont [10/16] (narrow) %v9689_v19, 8  ;;  %v5283_v19 = vld [vmem:[%s10721_s16 + $0x188] sm:$0xff] }
 0x6ff   : > { %v8376_v44 = vcombine.high %v5283_v19, %v5291_v21 }
 0x719   : > { %v9708_v40 = vpop.trf.xlu0 }
 0x71d   : > { %v9713_v30 = vpop.trf.xlu0 }
 0x74f   : > { %v9696_v8 = vpop.trf.xlu1 }
 0x750   : > { %9751 = vxpose.xlu0.b32.cont [11/16] (narrow) %v9696_v8, 8  ;;  %v5298_v8 = vld [vmem:[%s10721_s16 + $0x200] sm:$0xff] }
 0x753   : > { %v9701_v23 = vpop.trf.xlu1 }
 0x754   : > { %9753 = vxpose.xlu0.b32.cont [12/16] (narrow) %v9701_v23, 8  ;;  %v5306_v23 = vld [vmem:[%s10721_s16 + $0x240] sm:$0xff] }
 0x757   : > { %v9720_v22 = vpop.trf.xlu1 }
 0x758   : > { %9755 = vxpose.xlu0.b32.cont [13/16] (narrow) %v9708_v40, 8  ;;  %v8373_v40 = vcombine.low %v5282_v46, %v5290_v51 }
 0x75a   : > { %6093 = vmatpush1.bf16.msra.mxu1 %v8373_v40  ;;  %v5260_v40 = vld [vmem:[%s10721_s16 + $0xd0] sm:$0xff] }
 0x75b   : > { %v9725_v28 = vpop.trf.xlu1 }
 0x75c   : > { %9757 = vxpose.xlu0.b32.cont [14/16] (narrow) %v9713_v30, 8  ;;  %v8375_v30 = vcombine.low %v5283_v19, %v5291_v21 }
 0x760   : > { %9759 = vxpose.xlu0.b32.cont [15/16] (narrow) %v9720_v22, 8  ;;  %v5299_v22 = vld [vmem:[%s10721_s16 + $0x208] sm:$0xff] }
 0x764   : > { %9761 = vxpose.xlu0.b32.end [16/16] (narrow) %v9725_v28, 8  ;;  %v8390_v28 = vcombine.high %v5298_v8, %v5306_v23 }
 0x766   : > { %6094 = vmatprep.subr.bf16.mxu1 %v8390_v28 }
 0x7a8   : > { %v9762_v20 = vpop.trf.xlu0 }
 0x7a9   : > { %v9766_v29 = vunpack.i.h.bf16 %v9762_v20  ;;  %v9763_v15 = vunpack.i.l.bf16 %v9762_v20  ;;  %v5307_v20 = vld [vmem:[%s10721_s16 + $0x248] sm:$0xff] }
 0x7ab   : > { %v5077_v9 = vpack.c.bf16 %v9766_v29, %v9763_v15  ;;  %v8389_v29 = vcombine.low %v5298_v8, %v5306_v23  ;;  %v8391_v15 = vcombine.low %v5299_v22, %v5307_v20 }
 0x7ad   : > { %9098 = vmatmul.mubr.bf16.vlgmr.msra.gmra.mrb[60].mxu0 %v5077_v9  ;;  %v8392_v9 = vcombine.high %v5299_v22, %v5307_v20  ;;  %6095 = vmatpush1.bf16.msra.mxu1 %v8389_v29  ;;  %v5268_v20 = vld [vmem:[%s10721_s16 + $0x110] sm:$0xff] }
 0x7ae   : > { %6161 = vmatprep.mubr.bf16.mxu0 %v10319_v4  ;;  %6130 = vmatpush1.bf16.msra.mxu0 %v8327_v6  ;;  %v8438_v6 = vcombine.high %v5346_v2, %v5354_v53  ;;  %v5276_v29 = vld [vmem:[%s10721_s16 + $0x150] sm:$0xff] }
 0x7af   : > { %6131 = vmatprep.subr.bf16.mxu0 %v8344_v41  ;;  %v5236_v41 = vld [vmem:[%s10721_s16 + $0x10] sm:$0xff] }
 0x7b2   : > { %6132 = vmatpush1.bf16.msra.mxu0 %v8343_v31  ;;  %v5237_v31 = vld [vmem:[%s10721_s16 + $0x18] sm:$0xff] }
 0x7b3   : > { %6133 = vmatprep.subr.bf16.mxu0 %v8360_v48  ;;  %v8323_v48 = vld [vmem:[%s770_s14] ss:$0 sm:$0xff] }
 0x7b6   : > { %6134 = vmatpush1.bf16.msra.mxu0 %v8359_v17 }
 0x7b7   : > { %6135 = vmatprep.subr.bf16.mxu0 %v8376_v44  ;;  %v5261_v44 = vld [vmem:[%s10721_s16 + $0xd8] sm:$0xff] }
 0x7ba   : > { %6136 = vmatpush1.bf16.msra.mxu0 %v8375_v30  ;;  %v5253_v30 = vld [vmem:[%s10721_s16 + $0x98] sm:$0xff] }
 0x7bb   : > { %6137 = vmatprep.subr.bf16.mxu0 %v8392_v9  ;;  %v5277_v9 = vld [vmem:[%s10721_s16 + $0x158] sm:$0xff] }
 0x7be   : > { %6138 = vmatpush1.bf16.msra.mxu0 %v8391_v15  ;;  %v5269_v15 = vld [vmem:[%s10721_s16 + $0x118] sm:$0xff] }
 0x880   : > { %v5183_v38 = vpop.f32.mrb[60].mxu0 }
 0x881   : > { %v5184_v14 = vadd.f32 %v8314_v5, %v5183_v38  ;;  %v9099_v57 = vpop.f32.mrb[61].mxu0  ;;  %v5322_v38 = vld [vmem:[%s10721_s16 + $0x2c0] sm:$0xff] }
 0x882   : > { %v5186_v56 = vpop.f32.mrb[62].mxu0 }
 0x883   : > { %v5190_v42 = vadd.f32 %v10007_v62, %v5184_v14  ;;  %v5187_v37 = vadd.f32 %v8314_v5, %v5186_v56  ;;  %v9100_v7 = vpop.f32.mrb[63].mxu0  ;;  %v5314_v5 = vld [vmem:[%s10721_s16 + $0x280] sm:$0xff]  ;;  %v5315_v14 = vld [vmem:[%s10721_s16 + $0x288] sm:$0xff] }
 0x884   : > { %v8406_v57 = vcombine.high %v5314_v5, %v5322_v38  ;;  %v5323_v56 = vld [vmem:[%s10721_s16 + $0x2c8] sm:$0xff]  ;;  %v8405_v62 = vcombine.low %v5314_v5, %v5322_v38  ;;  %v5330_v7 = vld [vmem:[%s10721_s16 + $0x300] sm:$0xff]  ;;  %v8347_v38 = vcombine.low %v5253_v30, %v5261_v44 }
 0x885   : > { %5194 = vadd.xlane.f32.xlu1 %v5190_v42  ;;  %v5191_v60 = vadd.f32 %v10008_v18, %v5187_v37  ;;  %v8408_v37 = vcombine.high %v5315_v14, %v5323_v56  ;;  %v5338_v18 = vld [vmem:[%s10721_s16 + $0x340] sm:$0xff] }
 0x886   : > { %6096 = vmatprep.subr.bf16.mxu1 %v8406_v57  ;;  %v8422_v24 = vcombine.high %v5330_v7, %v5338_v18  ;;  %v8421_v54 = vcombine.low %v5330_v7, %v5338_v18  ;;  %v8364_v57 = vcombine.high %v5269_v15, %v5277_v9  ;;  %v8361_v7 = vcombine.low %v5268_v20, %v5276_v29 }
 0x887   : > { %6139 = vmatprep.subr.bf16.mxu0 %v8408_v37  ;;  %6097 = vmatpush1.bf16.msra.mxu1 %v8405_v62  ;;  %v5292_v62 = vld [vmem:[%s10721_s16 + $0x1d0] sm:$0xff]  ;;  %v5293_v37 = vld [vmem:[%s10721_s16 + $0x1d8] sm:$0xff]  ;;  %v8363_v18 = vcombine.low %v5269_v15, %v5277_v9  ;;  %v5255_v15 = vld [vmem:[%s10721_s16 + $0xa8] sm:$0xff] }
 0x888   : > { %6098 = vmatprep.subr.bf16.mxu1 %v8422_v24  ;;  %v5263_v9 = vld [vmem:[%s10721_s16 + $0xe8] sm:$0xff] }
 0x889   : > { %5196 = vadd.xlane.f32.xlu1 %v5191_v60 }
 0x88b   : > { %6099 = vmatpush1.bf16.msra.mxu1 %v8421_v54  ;;  %v5308_v54 = vld [vmem:[%s10721_s16 + $0x250] sm:$0xff] }
 0x88c   : > { %6100 = vmatprep.subr.bf16.mxu1 %v8438_v6 }
 0x88f   : > { %6101 = vmatpush1.bf16.msra.mxu1 %v8437_v61  ;;  %v5324_v61 = vld [vmem:[%s10721_s16 + $0x2d0] sm:$0xff] }
 0x912   : > { %v5195_v39 = vpop.xlane.xlu1 %5194 }
 0x913   : > { %v5199_v0 = vmul.f32 0.0078125, %v5195_v39  ;;  %v8329_v39 = vcombine.low %v5236_v41, %v5244_v10 }
 0x915   : > { %v11323_v11 = vsub.f32 %v5190_v42, %v5199_v0  ;;  %v8407_v42 = vcombine.low %v5315_v14, %v5323_v56  ;;  %v8330_v0 = vcombine.high %v5236_v41, %v5244_v10  ;;  %v8362_v14 = vcombine.high %v5268_v20, %v5276_v29  ;;  %v5284_v56 = vld [vmem:[%s10721_s16 + $0x190] sm:$0xff]  ;;  %v5254_v20 = vld [vmem:[%s10721_s16 + $0xa0] sm:$0xff] }
 0x916   : > { %v5197_v12 = vpop.xlane.xlu1 %5196  ;;  %v8377_v2 = vcombine.low %v5284_v56, %v5292_v62  ;;  %v5262_v29 = vld [vmem:[%s10721_s16 + $0xe0] sm:$0xff] }
 0x917   : > { %v5200_v45 = vmul.f32 0.0078125, %v5197_v12  ;;  %v5203_v13 = vmul.f32 %v11323_v11, %v11323_v11  ;;  %6140 = vmatpush1.bf16.msra.mxu0 %v8407_v42  ;;  %v5245_v12 = vld [vmem:[%s10721_s16 + $0x58] sm:$0xff]  ;;  %6172 = vmatprep.subr.bf16.mxu1 %v8330_v0  ;;  %v5332_v0 = vld [vmem:[%s10721_s16 + $0x310] sm:$0xff] }
 0x918   : > { %v5285_v42 = vld [vmem:[%s10721_s16 + $0x198] sm:$0xff] }
 0x919   : > { %v11327_v55 = vsub.f32 %v5191_v60, %v5200_v45  ;;  %5205 = vadd.xlane.f32.xlu1 %v5203_v13  ;;  %v5331_v60 = vld [vmem:[%s10721_s16 + $0x308] sm:$0xff]  ;;  %v8331_v45 = vcombine.low %v5237_v31, %v5245_v12  ;;  %v8332_v13 = vcombine.high %v5237_v31, %v5245_v12  ;;  %v8380_v24 = vcombine.high %v5285_v42, %v5293_v37  ;;  %v5340_v12 = vld [vmem:[%s10721_s16 + $0x350] sm:$0xff] }
 0x91a   : > { %v8423_v63 = vcombine.low %v5331_v60, %v5339_v26  ;;  %v8424_v34 = vcombine.high %v5331_v60, %v5339_v26  ;;  %v8378_v60 = vcombine.high %v5284_v56, %v5292_v62  ;;  %v5300_v26 = vld [vmem:[%s10721_s16 + $0x210] sm:$0xff]  ;;  %v8379_v53 = vcombine.low %v5285_v42, %v5293_v37  ;;  %v5270_v56 = vld [vmem:[%s10721_s16 + $0x120] sm:$0xff]  ;;  %v5271_v42 = vld [vmem:[%s10721_s16 + $0x128] sm:$0xff] }
 0x91b   : > { %v5204_v43 = vmul.f32 %v11327_v55, %v11327_v55  ;;  %v8394_v16 = vcombine.high %v5300_v26, %v5308_v54  ;;  %v8393_v41 = vcombine.low %v5300_v26, %v5308_v54  ;;  %v8410_v31 = vcombine.high %v5316_v59, %v5324_v61  ;;  %v5278_v62 = vld [vmem:[%s10721_s16 + $0x160] sm:$0xff]  ;;  %v5279_v37 = vld [vmem:[%s10721_s16 + $0x168] sm:$0xff] }
 0x91c   : > { %6141 = vmatprep.subr.bf16.mxu0 %v8424_v34  ;;  %v5309_v34 = vld [vmem:[%s10721_s16 + $0x258] sm:$0xff]  ;;  %v5286_v26 = vld [vmem:[%s10721_s16 + $0x1a0] sm:$0xff] }
 0x91d   : > { %5207 = vadd.xlane.f32.xlu1 %v5204_v43  ;;  %6142 = vmatpush1.bf16.msra.mxu0 %v8423_v63  ;;  %v5301_v63 = vld [vmem:[%s10721_s16 + $0x218] sm:$0xff]  ;;  %v5294_v54 = vld [vmem:[%s10721_s16 + $0x1e0] sm:$0xff] }
 0x91e   : > { %6143 = vmatprep.subr.bf16.mxu0 %v8440_v3  ;;  %v8396_v6 = vcombine.high %v5301_v63, %v5309_v34  ;;  %v5325_v3 = vld [vmem:[%s10721_s16 + $0x2d8] sm:$0xff]  ;;  %v8395_v10 = vcombine.low %v5301_v63, %v5309_v34  ;;  %v5287_v63 = vld [vmem:[%s10721_s16 + $0x1a8] sm:$0xff] }
 0x91f   : > { %v5295_v34 = vld [vmem:[%s10721_s16 + $0x1e8] sm:$0xff] }
 0x921   : > { %6144 = vmatpush1.bf16.msra.mxu0 %v8439_v49  ;;  %v5317_v49 = vld [vmem:[%s10721_s16 + $0x298] sm:$0xff] }
 0x922   : > { %6215 = vmatprep.subr.bf16.mxu0 %v8332_v13  ;;  %v5341_v13 = vld [vmem:[%s10721_s16 + $0x358] sm:$0xff] }
 0x9a6   : > { %v5206_v43 = vpop.xlane.xlu1 %5205 }
 0x9a7   : > { %v5209_v36 = vmul.f32 0.0078125, %v5206_v43  ;;  %v8409_v43 = vcombine.low %v5316_v59, %v5324_v61  ;;  %v5302_v59 = vld [vmem:[%s10721_s16 + $0x220] sm:$0xff] }
 0x9a8   : > { %v5310_v61 = vld [vmem:[%s10721_s16 + $0x260] sm:$0xff] }
 0x9a9   : > { %v5211_v25 = vadd.f32 1e-05, %v5209_v36  ;;  %v8411_v36 = vcombine.low %v5317_v49, %v5325_v3 }
 0x9aa   : > { %v5208_v58 = vpop.xlane.xlu1 %5207 }
 0x9ab   : > { %9999 = vrsqrt.f32 %v5211_v25  ;;  %v5210_v47 = vmul.f32 0.0078125, %v5208_v58  ;;  %v8426_v25 = vcombine.high %v5332_v0, %v5340_v12 }
 0x9ad   : > { %v5212_v1 = vadd.f32 1e-05, %v5210_v47  ;;  %v5348_v47 = vld [vmem:[%s10721_s16 + $0x390] sm:$0xff] }
 0x9af   : > { %10001 = vrsqrt.f32 %v5212_v1  ;;  %v5356_v1 = vld [vmem:[%s10721_s16 + $0x3d0] sm:$0xff] }
 0x9b5   : > { %v10000_v27 = vpop.eup %9999 }
 0x9b6   : > { %v5215_v17 = vmul.f32 %v10000_v27, %v11323_v11  ;;  %v5252_v11 = vld [vmem:[%s10721_s16 + $0x90] sm:$0xff]  ;;  %v5349_v27 = vld [vmem:[%s10721_s16 + $0x398] sm:$0xff] }
 0x9b7   : > { %v8346_v28 = vcombine.high %v5252_v11, %v5260_v40  ;;  %v8345_v5 = vcombine.low %v5252_v11, %v5260_v40  ;;  %v5239_v11 = vld [vmem:[%s10721_s16 + $0x28] sm:$0xff] }
 0x9b8   : > { %v5223_v51 = vmul.f32 %v8323_v48, %v5215_v17  ;;  %v5357_v17 = vld [vmem:[%s10721_s16 + $0x3d8] sm:$0xff]  ;;  %v5247_v40 = vld [vmem:[%s10721_s16 + $0x68] sm:$0xff] }
 0x9b9   : > { %v10002_v46 = vpop.eup %10001 }
 0x9ba   : > { %v5216_v19 = vmul.f32 %v10002_v46, %v11327_v55  ;;  %v11375_v8 = vadd.f32 %v8324_v52, %v5223_v51  ;;  %v8348_v55 = vcombine.high %v5253_v30, %v5261_v44  ;;  %v8442_v51 = vcombine.high %v5348_v47, %v5356_v1 }
 0x9bb   : > { %v8441_v30 = vcombine.low %v5348_v47, %v5356_v1  ;;  %v8443_v44 = vcombine.low %v5349_v27, %v5357_v17  ;;  %v5334_v47 = vld [vmem:[%s10721_s16 + $0x320] sm:$0xff] }
 0x9bc   : > { %v5224_v21 = vmul.f32 %v8323_v48, %v5216_v19  ;;  %v8425_v48 = vcombine.low %v5332_v0, %v5340_v12  ;;  %v8444_v19 = vcombine.high %v5349_v27, %v5357_v17  ;;  %v5318_v0 = vld [vmem:[%s10721_s16 + $0x2a0] sm:$0xff]  ;;  %v5335_v27 = vld [vmem:[%s10721_s16 + $0x328] sm:$0xff] }
 0x9bd   : > { %v5326_v12 = vld [vmem:[%s10721_s16 + $0x2e0] sm:$0xff]  ;;  %v5343_v17 = vld [vmem:[%s10721_s16 + $0x368] sm:$0xff] }
 0x9be   : > { %v11377_v23 = vadd.f32 %v8324_v52, %v5224_v21  ;;  %v5238_v52 = vld [vmem:[%s10721_s16 + $0x20] sm:$0xff] }
 0x9bf   : > { %v5246_v21 = vld [vmem:[%s10721_s16 + $0x60] sm:$0xff] }
 0x9c0   : > { %v11381_v22 = vpack.c.bf16 %v11377_v23, %v11375_v8  ;;  %v5342_v1 = vld [vmem:[%s10721_s16 + $0x360] sm:$0xff] }
 0x9c2   : > { %6119 = vmatmul.mubr.bf16.vlgmr.msra.gmra.mrb[76].mxu1 %v11381_v22  ;;  %6162 = vmatmul.mubr.bf16.vlgmr.msra.gmra.mrb[64].mxu0 %v11381_v22 }
 0x9c3   : > { %6173 = vmatpush1.bf16.msra.mxu1 %v8329_v39  ;;  %6216 = vmatpush1.bf16.msra.mxu0 %v8331_v45  ;;  %v8412_v39 = vcombine.high %v5317_v49, %v5325_v3  ;;  %v5333_v45 = vld [vmem:[%s10721_s16 + $0x318] sm:$0xff]  ;;  %v5303_v49 = vld [vmem:[%s10721_s16 + $0x228] sm:$0xff] }
 0x9c4   : > { %6174 = vmatprep.subr.bf16.mxu1 %v8346_v28  ;;  %6217 = vmatprep.subr.bf16.mxu0 %v8348_v55  ;;  %v8428_v58 = vcombine.high %v5333_v45, %v5341_v13  ;;  %v8427_v46 = vcombine.low %v5333_v45, %v5341_v13  ;;  %v8334_v28 = vcombine.high %v5238_v52, %v5246_v21  ;;  %v5311_v3 = vld [vmem:[%s10721_s16 + $0x268] sm:$0xff] }
 0x9c5   : > { %6204 = vmatprep.mubr.bf16.mxu1 %v10319_v4  ;;  %6247 = vmatprep.mubr.bf16.mxu0 %v10319_v4  ;;  %v8336_v55 = vcombine.high %v5239_v11, %v5247_v40  ;;  %v5319_v45 = vld [vmem:[%s10721_s16 + $0x2a8] sm:$0xff] }
 0x9c6   : > { %v5327_v13 = vld [vmem:[%s10721_s16 + $0x2e8] sm:$0xff] }
 0x9c7   : > { %6175 = vmatpush1.bf16.msra.mxu1 %v8345_v5  ;;  %6218 = vmatpush1.bf16.msra.mxu0 %v8347_v38  ;;  %v8333_v5 = vcombine.low %v5238_v52, %v5246_v21  ;;  %v8335_v38 = vcombine.low %v5239_v11, %v5247_v40  ;;  %v5350_v52 = vld [vmem:[%s10721_s16 + $0x3a0] sm:$0xff]  ;;  %v5351_v11 = vld [vmem:[%s10721_s16 + $0x3a8] sm:$0xff] }
 0x9c8   : > { %6176 = vmatprep.subr.bf16.mxu1 %v8362_v14  ;;  %6219 = vmatprep.subr.bf16.mxu0 %v8364_v57  ;;  %v8350_v14 = vcombine.high %v5254_v20, %v5262_v29  ;;  %v8352_v57 = vcombine.high %v5255_v15, %v5263_v9  ;;  %v5358_v21 = vld [vmem:[%s10721_s16 + $0x3e0] sm:$0xff]  ;;  %v5359_v40 = vld [vmem:[%s10721_s16 + $0x3e8] sm:$0xff] }
 0x9cb   : > { %6177 = vmatpush1.bf16.msra.mxu1 %v8361_v7  ;;  %6220 = vmatpush1.bf16.msra.mxu0 %v8363_v18  ;;  %v8349_v7 = vcombine.low %v5254_v20, %v5262_v29  ;;  %v8351_v18 = vcombine.low %v5255_v15, %v5263_v9  ;;  %v5240_v20 = vld [vmem:[%s10721_s16 + $0x30] sm:$0xff]  ;;  %v5241_v15 = vld [vmem:[%s10721_s16 + $0x38] sm:$0xff] }
 0x9cc   : > { %6178 = vmatprep.subr.bf16.mxu1 %v8378_v60  ;;  %6221 = vmatprep.subr.bf16.mxu0 %v8380_v24  ;;  %v8366_v60 = vcombine.high %v5270_v56, %v5278_v62  ;;  %v8368_v24 = vcombine.high %v5271_v42, %v5279_v37  ;;  %v5248_v29 = vld [vmem:[%s10721_s16 + $0x70] sm:$0xff]  ;;  %v5249_v9 = vld [vmem:[%s10721_s16 + $0x78] sm:$0xff] }
 0x9cf   : > { %6179 = vmatpush1.bf16.msra.mxu1 %v8377_v2  ;;  %6222 = vmatpush1.bf16.msra.mxu0 %v8379_v53  ;;  %v8365_v2 = vcombine.low %v5270_v56, %v5278_v62  ;;  %v8367_v53 = vcombine.low %v5271_v42, %v5279_v37  ;;  %v5256_v56 = vld [vmem:[%s10721_s16 + $0xb0] sm:$0xff]  ;;  %v5257_v42 = vld [vmem:[%s10721_s16 + $0xb8] sm:$0xff] }
 0x9d0   : > { %6180 = vmatprep.subr.bf16.mxu1 %v8394_v16  ;;  %6223 = vmatprep.subr.bf16.mxu0 %v8396_v6  ;;  %v8382_v16 = vcombine.high %v5286_v26, %v5294_v54  ;;  %v8384_v6 = vcombine.high %v5287_v63, %v5295_v34  ;;  %v5264_v62 = vld [vmem:[%s10721_s16 + $0xf0] sm:$0xff]  ;;  %v5265_v37 = vld [vmem:[%s10721_s16 + $0xf8] sm:$0xff] }
 0x9d3   : > { %6181 = vmatpush1.bf16.msra.mxu1 %v8393_v41  ;;  %6224 = vmatpush1.bf16.msra.mxu0 %v8395_v10  ;;  %v8381_v41 = vcombine.low %v5286_v26, %v5294_v54  ;;  %v8383_v10 = vcombine.low %v5287_v63, %v5295_v34  ;;  %v5272_v26 = vld [vmem:[%s10721_s16 + $0x130] sm:$0xff]  ;;  %v5273_v63 = vld [vmem:[%s10721_s16 + $0x138] sm:$0xff] }
 0x9d4   : > { %6182 = vmatprep.subr.bf16.mxu1 %v8410_v31  ;;  %6225 = vmatprep.subr.bf16.mxu0 %v8412_v39  ;;  %v8398_v31 = vcombine.high %v5302_v59, %v5310_v61  ;;  %v8400_v39 = vcombine.high %v5303_v49, %v5311_v3  ;;  %v5280_v54 = vld [vmem:[%s10721_s16 + $0x170] sm:$0xff]  ;;  %v5281_v34 = vld [vmem:[%s10721_s16 + $0x178] sm:$0xff] }
 0x9d7   : > { %6183 = vmatpush1.bf16.msra.mxu1 %v8409_v43  ;;  %6226 = vmatpush1.bf16.msra.mxu0 %v8411_v36  ;;  %v8397_v43 = vcombine.low %v5302_v59, %v5310_v61  ;;  %v8399_v36 = vcombine.low %v5303_v49, %v5311_v3  ;;  %v5288_v59 = vld [vmem:[%s10721_s16 + $0x1b0] sm:$0xff]  ;;  %v5289_v49 = vld [vmem:[%s10721_s16 + $0x1b8] sm:$0xff] }
 0x9d8   : > { %6184 = vmatprep.subr.bf16.mxu1 %v8426_v25  ;;  %6227 = vmatprep.subr.bf16.mxu0 %v8428_v58  ;;  %v8414_v25 = vcombine.high %v5318_v0, %v5326_v12  ;;  %v8416_v58 = vcombine.high %v5319_v45, %v5327_v13  ;;  %v5296_v61 = vld [vmem:[%s10721_s16 + $0x1f0] sm:$0xff]  ;;  %v5297_v3 = vld [vmem:[%s10721_s16 + $0x1f8] sm:$0xff] }
 0x9db   : > { %6185 = vmatpush1.bf16.msra.mxu1 %v8425_v48  ;;  %6228 = vmatpush1.bf16.msra.mxu0 %v8427_v46  ;;  %v8413_v48 = vcombine.low %v5318_v0, %v5326_v12  ;;  %v8415_v46 = vcombine.low %v5319_v45, %v5327_v13  ;;  %v5304_v0 = vld [vmem:[%s10721_s16 + $0x230] sm:$0xff]  ;;  %v5305_v45 = vld [vmem:[%s10721_s16 + $0x238] sm:$0xff] }
 0x9dc   : > { %6186 = vmatprep.subr.bf16.mxu1 %v8442_v51  ;;  %6229 = vmatprep.subr.bf16.mxu0 %v8444_v19  ;;  %v8430_v51 = vcombine.high %v5334_v47, %v5342_v1  ;;  %v8432_v19 = vcombine.high %v5335_v27, %v5343_v17  ;;  %v5312_v12 = vld [vmem:[%s10721_s16 + $0x270] sm:$0xff]  ;;  %v5313_v13 = vld [vmem:[%s10721_s16 + $0x278] sm:$0xff] }
 0x9df   : > { %6187 = vmatpush1.bf16.msra.mxu1 %v8441_v30  ;;  %6230 = vmatpush1.bf16.msra.mxu0 %v8443_v44  ;;  %v8429_v30 = vcombine.low %v5334_v47, %v5342_v1  ;;  %v8431_v44 = vcombine.low %v5335_v27, %v5343_v17  ;;  %v5328_v47 = vld [vmem:[%s10721_s16 + $0x2f0] sm:$0xff]  ;;  %v5321_v1 = vld [vmem:[%s10721_s16 + $0x2b8] sm:$0xff]  ;;  %v8401_v17 = vcombine.low %v5304_v0, %v5312_v12 }
 0x9e0   : > { %6258 = vmatprep.subr.bf16.mxu1 %v8334_v28  ;;  %6301 = vmatprep.subr.bf16.mxu0 %v8336_v55  ;;  %v8446_v28 = vcombine.high %v5350_v52, %v5358_v21  ;;  %v8448_v55 = vcombine.high %v5351_v11, %v5359_v40  ;;  %v5329_v27 = vld [vmem:[%s10721_s16 + $0x2f8] sm:$0xff] }
 0x9e2   : > { %6205 = vmatmul.mubr.bf16.vlgmr.msra.gmra.mrb[80].mxu1 %v11381_v22  ;;  %6248 = vmatmul.mubr.bf16.vlgmr.msra.gmra.mrb[68].mxu0 %v11381_v22 }
 0x9e3   : > { %6259 = vmatpush1.bf16.msra.mxu1 %v8333_v5  ;;  %6302 = vmatpush1.bf16.msra.mxu0 %v8335_v38  ;;  %v8445_v5 = vcombine.low %v5350_v52, %v5358_v21  ;;  %v8447_v38 = vcombine.low %v5351_v11, %v5359_v40  ;;  %v5344_v52 = vld [vmem:[%s10721_s16 + $0x370] sm:$0xff]  ;;  %v5337_v21 = vld [vmem:[%s10721_s16 + $0x338] sm:$0xff] }
 0x9e4   : > { %6260 = vmatprep.subr.bf16.mxu1 %v8350_v14  ;;  %6303 = vmatprep.subr.bf16.mxu0 %v8352_v57  ;;  %v8338_v14 = vcombine.high %v5240_v20, %v5248_v29  ;;  %v8340_v57 = vcombine.high %v5241_v15, %v5249_v9  ;;  %v5345_v11 = vld [vmem:[%s10721_s16 + $0x378] sm:$0xff] }
 0x9e5   : > { %6290 = vmatprep.mubr.bf16.mxu1 %v10319_v4  ;;  %6333 = vmatprep.mubr.bf16.mxu0 %v10319_v4 }
 0x9e7   : > { %6261 = vmatpush1.bf16.msra.mxu1 %v8349_v7  ;;  %6304 = vmatpush1.bf16.msra.mxu0 %v8351_v18  ;;  %v8337_v7 = vcombine.low %v5240_v20, %v5248_v29  ;;  %v8339_v18 = vcombine.low %v5241_v15, %v5249_v9  ;;  %v5360_v20 = vld [vmem:[%s10721_s16 + $0x3f0] sm:$0xff]  ;;  %v5353_v29 = vld [vmem:[%s10721_s16 + $0x3b8] sm:$0xff] }
 0x9e8   : > { %6262 = vmatprep.subr.bf16.mxu1 %v8366_v60  ;;  %6305 = vmatprep.subr.bf16.mxu0 %v8368_v24  ;;  %v8354_v60 = vcombine.high %v5256_v56, %v5264_v62  ;;  %v8356_v24 = vcombine.high %v5257_v42, %v5265_v37  ;;  %v5361_v15 = vld [vmem:[%s10721_s16 + $0x3f8] sm:$0xff] }
 0x9eb   : > { %6263 = vmatpush1.bf16.msra.mxu1 %v8365_v2  ;;  %6306 = vmatpush1.bf16.msra.mxu0 %v8367_v53  ;;  %v8353_v2 = vcombine.low %v5256_v56, %v5264_v62  ;;  %v8355_v53 = vcombine.low %v5257_v42, %v5265_v37  ;;  %v8451_v56 = vcombine.low %v5353_v29, %v5361_v15  ;;  %v9807_v62 = vld [vmem:[%s10729_s17 + $0x40] sm:$0xff]  }
 0x9ec   : > { %6264 = vmatprep.subr.bf16.mxu1 %v8382_v16  ;;  %6307 = vmatprep.subr.bf16.mxu0 %v8384_v6  ;;  %v8370_v16 = vcombine.high %v5272_v26, %v5280_v54  ;;  %v8372_v6 = vcombine.high %v5273_v63, %v5281_v34  ;;  %v9808_v42 = vld [vmem:[%s10729_s17 + $0xc0] sm:$0xff]  }
 0x9ed   : > { %v9809_v37 = vld [vmem:[%s10729_s17] sm:$0xff]  }
 0x9ef   : > { %6265 = vmatpush1.bf16.msra.mxu1 %v8381_v41  ;;  %6308 = vmatpush1.bf16.msra.mxu0 %v8383_v10  ;;  %v8369_v41 = vcombine.low %v5272_v26, %v5280_v54  ;;  %v8371_v10 = vcombine.low %v5273_v63, %v5281_v34  ;;  %v9814_v26 = vld [vmem:[%s10729_s17 + $0x88] sm:$0xff]   ;;  %v9815_v54 = vld [vmem:[%s10729_s17 + $0x50] sm:$0xff]  }
 0x9f0   : > { %6266 = vmatprep.subr.bf16.mxu1 %v8398_v31  ;;  %6309 = vmatprep.subr.bf16.mxu0 %v8400_v39  ;;  %v8386_v31 = vcombine.high %v5288_v59, %v5296_v61  ;;  %v8388_v39 = vcombine.high %v5289_v49, %v5297_v3  ;;  %v9816_v63 = vld [vmem:[%s10729_s17 + $0xd0] sm:$0xff]  }
 0x9f1   : > { %v9817_v34 = vld [vmem:[%s10729_s17 + $0x10] sm:$0xff]  }
 0x9f3   : > { %6267 = vmatpush1.bf16.msra.mxu1 %v8397_v43  ;;  %6310 = vmatpush1.bf16.msra.mxu0 %v8399_v36  ;;  %v8385_v43 = vcombine.low %v5288_v59, %v5296_v61  ;;  %v8402_v36 = vcombine.high %v5304_v0, %v5312_v12  ;;  %v9823_v59 = vld [vmem:[%s10729_s17 + $0x60] sm:$0xff]   ;;  %v9831_v0 = vld [vmem:[%s10729_s17 + $0x70] sm:$0xff]  }
 0x9f4   : > { %6268 = vmatprep.subr.bf16.mxu1 %v8414_v25  ;;  %6311 = vmatprep.subr.bf16.mxu0 %v8416_v58  ;;  %v8404_v25 = vcombine.high %v5305_v45, %v5313_v13  ;;  %v5320_v58 = vld [vmem:[%s10721_s16 + $0x2b0] sm:$0xff]  ;;  %v9824_v61 = vld [vmem:[%s10729_s17 + $0xe0] sm:$0xff]  }
 0x9f5   : > { %v8417_v40 = vcombine.low %v5320_v58, %v5328_v47  ;;  %v9832_v12 = vld [vmem:[%s10729_s17 + $0xf0] sm:$0xff]  }
 0x9f7   : > { %6269 = vmatpush1.bf16.msra.mxu1 %v8413_v48  ;;  %6312 = vmatpush1.bf16.msra.mxu0 %v8415_v46  ;;  %v8403_v48 = vcombine.low %v5305_v45, %v5313_v13  ;;  %v8418_v46 = vcombine.high %v5320_v58, %v5328_v47  ;;  %v9833_v45 = vld [vmem:[%s10729_s17 + $0x30] sm:$0xff]   ;;  %v9839_v58 = vld [vmem:[%s10729_s17 + $0x140] sm:$0xff]  }
 0x9f8   : > { %6270 = vmatprep.subr.bf16.mxu1 %v8430_v51  ;;  %6313 = vmatprep.subr.bf16.mxu0 %v8432_v19  ;;  %v8420_v51 = vcombine.high %v5321_v1, %v5329_v27  ;;  %v5336_v19 = vld [vmem:[%s10721_s16 + $0x330] sm:$0xff]  ;;  %v9840_v47 = vld [vmem:[%s10729_s17 + $0x1c0] sm:$0xff]  }
 0x9f9   : > { %v8433_v9 = vcombine.low %v5336_v19, %v5344_v52  ;;  %v9834_v13 = vld [vmem:[%s10729_s17 + $0xb0] sm:$0xff]  }
 0x9fb   : > { %6271 = vmatpush1.bf16.msra.mxu1 %v8429_v30  ;;  %6314 = vmatpush1.bf16.msra.mxu0 %v8431_v44  ;;  %v8419_v30 = vcombine.low %v5321_v1, %v5329_v27  ;;  %v8434_v44 = vcombine.high %v5336_v19, %v5344_v52  ;;  %v11520_v1 = vld [vmem:[%s10727_s25] sm:$0xff]  ;;  %v5380_v27 = vsub.s32 3, %v10816_v32 }
 0x9fc   : > { %6272 = vmatprep.subr.bf16.mxu1 %v8446_v28  ;;  %6315 = vmatprep.subr.bf16.mxu0 %v8448_v55  ;;  %v8436_v28 = vcombine.high %v5337_v21, %v5345_v11  ;;  %v5352_v55 = vld [vmem:[%s10721_s16 + $0x3b0] sm:$0xff] }
 0x9ff   : > { %6273 = vmatpush1.bf16.msra.mxu1 %v8445_v5  ;;  %6316 = vmatpush1.bf16.msra.mxu0 %v8447_v38  ;;  %v8435_v5 = vcombine.low %v5337_v21, %v5345_v11  ;;  %v8450_v38 = vcombine.high %v5352_v55, %v5360_v20 }
 0xa00   : > { %6344 = vmatprep.subr.bf16.mxu1 %v8338_v14  ;;  %6387 = vmatprep.subr.bf16.mxu0 %v8340_v57  ;;  %v8452_v14 = vcombine.high %v5353_v29, %v5361_v15  ;;  %v8449_v57 = vcombine.low %v5352_v55, %v5360_v20 }
 0xa02   : > { %6291 = vmatmul.mubr.bf16.vlgmr.msra.gmra.mrb[84].mxu1 %v11381_v22  ;;  %6334 = vmatmul.mubr.bf16.vlgmr.msra.gmra.mrb[72].mxu0 %v11381_v22 }
 0xa03   : > { %6345 = vmatpush1.bf16.msra.mxu1 %v8337_v7  ;;  %6388 = vmatpush1.bf16.msra.mxu0 %v8339_v18  ;;  %v9810_v7 = vld [vmem:[%s10729_s17 + $0x80] sm:$0xff]   ;;  %v9811_v18 = vld [vmem:[%s10729_s17 + $0x48] sm:$0xff]  }
 0xa04   : > { %6346 = vmatprep.subr.bf16.mxu1 %v8354_v60  ;;  %6389 = vmatprep.subr.bf16.mxu0 %v8356_v24  ;;  %v9812_v60 = vld [vmem:[%s10729_s17 + $0xc8] sm:$0xff]  }
 0xa05   : > { %6376 = vmatprep.mubr.bf16.mxu1 %v10319_v4  ;;  %6419 = vmatprep.mubr.bf16.mxu0 %v10319_v4  ;;  %v8387_v4 = vcombine.low %v5289_v49, %v5297_v3  ;;  %v9813_v24 = vld [vmem:[%s10729_s17 + $0x8] sm:$0xff]   ;;  %v9825_v49 = vld [vmem:[%s10729_s17 + $0x20] sm:$0xff]  }
 0xa06   : > { %v9826_v3 = vld [vmem:[%s10729_s17 + $0xa0] sm:$0xff]  }
 0xa07   : > { %6347 = vmatpush1.bf16.msra.mxu1 %v8353_v2  ;;  %6390 = vmatpush1.bf16.msra.mxu0 %v8355_v53  ;;  %v9818_v2 = vld [vmem:[%s10729_s17 + $0x90] sm:$0xff]   ;;  %v9820_v53 = vld [vmem:[%s10729_s17 + $0xd8] sm:$0xff]  }
 0xa08   : > { %6348 = vmatprep.subr.bf16.mxu1 %v8370_v16  ;;  %6391 = vmatprep.subr.bf16.mxu0 %v8372_v6  ;;  %v9821_v16 = vld [vmem:[%s10729_s17 + $0x18] sm:$0xff]  }
 0xa09   : > { %v9822_v6 = vld [vmem:[%s10729_s17 + $0x98] sm:$0xff]  }
 0xa0b   : > { %6349 = vmatpush1.bf16.msra.mxu1 %v8369_v41  ;;  %6392 = vmatpush1.bf16.msra.mxu0 %v8371_v10  ;;  %v9827_v41 = vld [vmem:[%s10729_s17 + $0x68] sm:$0xff]  }
 0xa0c   : > { %6350 = vmatprep.subr.bf16.mxu1 %v8386_v31  ;;  %6393 = vmatprep.subr.bf16.mxu0 %v8388_v39  ;;  %v9828_v10 = vld [vmem:[%s10729_s17 + $0xe8] sm:$0xff]  }
 0xa0d   : > { %v9829_v31 = vld [vmem:[%s10729_s17 + $0x28] sm:$0xff]  }
 0xa0e   : > { %v9830_v39 = vld [vmem:[%s10729_s17 + $0xa8] sm:$0xff]  }
 0xa0f   : > { %6351 = vmatpush1.bf16.msra.mxu1 %v8385_v43  ;;  %6394 = vmatpush1.bf16.msra.mxu0 %v8387_v4  ;;  %v9835_v43 = vld [vmem:[%s10729_s17 + $0x78] sm:$0xff]  }
 0xa10   : > { %6352 = vmatprep.subr.bf16.mxu1 %v8402_v36  ;;  %6395 = vmatprep.subr.bf16.mxu0 %v8404_v25  ;;  %v9836_v4 = vld [vmem:[%s10729_s17 + $0xf8] sm:$0xff]  }
 0xa11   : > { %v9837_v36 = vld [vmem:[%s10729_s17 + $0x38] sm:$0xff]  }
 0xa12   : > { %v9838_v25 = vld [vmem:[%s10729_s17 + $0xb8] sm:$0xff]  }
 0xa13   : > { %6353 = vmatpush1.bf16.msra.mxu1 %v8401_v17  ;;  %6396 = vmatpush1.bf16.msra.mxu0 %v8403_v48  ;;  %v5369_v17 = vrot.slane %v11520_v1, %v10819_v33  ;;  %v5377_v48 = vrot.slane %v11520_v1, %v10828_v50 }
 0xa14   : > { %6354 = vmatprep.subr.bf16.mxu1 %v8418_v46  ;;  %6397 = vmatprep.subr.bf16.mxu0 %v8420_v51  ;;  %v5373_v46 = vrot.slane %v11520_v1, %v10823_v35  ;;  %v5381_v51 = vrot.slane %v11520_v1, %v5380_v27 }
 0xa17   : > { %6355 = vmatpush1.bf16.msra.mxu1 %v8417_v40  ;;  %6398 = vmatpush1.bf16.msra.mxu0 %v8419_v30 }
 0xa18   : > { %6356 = vmatprep.subr.bf16.mxu1 %v8434_v44  ;;  %6399 = vmatprep.subr.bf16.mxu0 %v8436_v28 }
 0xa1b   : > { %6357 = vmatpush1.bf16.msra.mxu1 %v8433_v9  ;;  %6400 = vmatpush1.bf16.msra.mxu0 %v8435_v5 }
 0xa1c   : > { %6358 = vmatprep.subr.bf16.mxu1 %v8450_v38  ;;  %6401 = vmatprep.subr.bf16.mxu0 %v8452_v14 }
 0xa1f   : > { %6359 = vmatpush1.bf16.msra.mxu1 %v8449_v57  ;;  %6402 = vmatpush1.bf16.msra.mxu0 %v8451_v56 }
 0xa20   : > { %8684 = vmatprep.subr.bf16.mxu1 %v9807_v62  ;;  %8706 = vmatprep.subr.bf16.mxu0 %v9808_v42 }
 0xa22   : > { %6377 = vmatmul.mubr.bf16.vlgmr.msra.gmra.mrb[88].mxu1 %v11381_v22  ;;  %6420 = vmatmul.mubr.bf16.vlgmr.msra.gmra.mrb[76].mxu0 %v11381_v22  ;;  %v9819_v22 = vld [vmem:[%s10729_s17 + $0x58] sm:$0xff]  }
 0xa23   : > { %8685 = vmatpush3.bf16.msra.mxu1 %v9809_v37  ;;  %8707 = vmatpush3.bf16.msra.mxu0 %v9810_v7 }
 0xa24   : > { %8686 = vmatprep.subr.bf16.mxu1 %v9811_v18  ;;  %8708 = vmatprep.subr.bf16.mxu0 %v9812_v60 }
 0xa27   : > { %8687 = vmatpush3.bf16.msra.mxu1 %v9813_v24  ;;  %8709 = vmatpush3.bf16.msra.mxu0 %v9814_v26 }
 0xa28   : > { %8688 = vmatprep.subr.bf16.mxu1 %v9815_v54  ;;  %8710 = vmatprep.subr.bf16.mxu0 %v9816_v63 }
 0xa2b   : > { %8689 = vmatpush3.bf16.msra.mxu1 %v9817_v34  ;;  %8711 = vmatpush3.bf16.msra.mxu0 %v9818_v2  ;;  %v9841_v34 = vld [vmem:[%s10729_s17 + $0x100] sm:$0xff]  }
 0xa2c   : > { %8690 = vmatprep.subr.bf16.mxu1 %v9819_v22  ;;  %8712 = vmatprep.subr.bf16.mxu0 %v9820_v53  ;;  %v9842_v2 = vld [vmem:[%s10729_s17 + $0x180] sm:$0xff]   ;;  %v9843_v22 = vld [vmem:[%s10729_s17 + $0x148] sm:$0xff]  }
 0xa2d   : > { %v9844_v53 = vld [vmem:[%s10729_s17 + $0x1c8] sm:$0xff]  }
 0xa2f   : > { %8691 = vmatpush3.bf16.msra.mxu1 %v9821_v16  ;;  %8713 = vmatpush3.bf16.msra.mxu0 %v9822_v6  ;;  %v9845_v16 = vld [vmem:[%s10729_s17 + $0x108] sm:$0xff]  }
 0xa30   : > { %8692 = vmatprep.subr.bf16.mxu1 %v9823_v59  ;;  %8714 = vmatprep.subr.bf16.mxu0 %v9824_v61  ;;  %v9846_v6 = vld [vmem:[%s10729_s17 + $0x188] sm:$0xff]   ;;  %v9847_v59 = vld [vmem:[%s10729_s17 + $0x150] sm:$0xff]  }
 0xa31   : > { %v9848_v61 = vld [vmem:[%s10729_s17 + $0x1d0] sm:$0xff]  }
 0xa33   : > { %8693 = vmatpush3.bf16.msra.mxu1 %v9825_v49  ;;  %8715 = vmatpush3.bf16.msra.mxu0 %v9826_v3  ;;  %v9849_v49 = vld [vmem:[%s10729_s17 + $0x110] sm:$0xff]  }
 0xa34   : > { %8694 = vmatprep.subr.bf16.mxu1 %v9827_v41  ;;  %8716 = vmatprep.subr.bf16.mxu0 %v9828_v10  ;;  %v9850_v3 = vld [vmem:[%s10729_s17 + $0x190] sm:$0xff]   ;;  %v9851_v41 = vld [vmem:[%s10729_s17 + $0x158] sm:$0xff]  }
 0xa35   : > { %v9852_v10 = vld [vmem:[%s10729_s17 + $0x1d8] sm:$0xff]  }
 0xa37   : > { %8695 = vmatpush3.bf16.msra.mxu1 %v9829_v31  ;;  %8717 = vmatpush3.bf16.msra.mxu0 %v9830_v39  ;;  %v9853_v31 = vld [vmem:[%s10729_s17 + $0x118] sm:$0xff]  }
 0xa38   : > { %8696 = vmatprep.subr.bf16.mxu1 %v9831_v0  ;;  %8718 = vmatprep.subr.bf16.mxu0 %v9832_v12  ;;  %v9854_v39 = vld [vmem:[%s10729_s17 + $0x198] sm:$0xff]   ;;  %v9855_v0 = vld [vmem:[%s10729_s17 + $0x160] sm:$0xff]  }
 0xa39   : > { %v9856_v12 = vld [vmem:[%s10729_s17 + $0x1e0] sm:$0xff]  }
 0xa3b   : > { %8697 = vmatpush3.bf16.msra.mxu1 %v9833_v45  ;;  %8719 = vmatpush3.bf16.msra.mxu0 %v9834_v13  ;;  %v9857_v45 = vld [vmem:[%s10729_s17 + $0x120] sm:$0xff]  }
 0xa3c   : > { %8698 = vmatprep.subr.bf16.mxu1 %v9835_v43  ;;  %8720 = vmatprep.subr.bf16.mxu0 %v9836_v4  ;;  %v9858_v13 = vld [vmem:[%s10729_s17 + $0x1a0] sm:$0xff]   ;;  %v9859_v43 = vld [vmem:[%s10729_s17 + $0x168] sm:$0xff]  }
 0xa3d   : > { %v9860_v4 = vld [vmem:[%s10729_s17 + $0x1e8] sm:$0xff]  }
 0xa3f   : > { %8699 = vmatpush3.bf16.msra.mxu1 %v9837_v36  ;;  %8721 = vmatpush3.bf16.msra.mxu0 %v9838_v25  ;;  %v5384_v36 = vsub.s32 4, %v10816_v32  ;;  %v5392_v25 = vsub.s32 6, %v10816_v32 }
 0xa40   : > { %8728 = vmatprep.subr.bf16.mxu1 %v9839_v58  ;;  %8750 = vmatprep.subr.bf16.mxu0 %v9840_v47  ;;  %v5388_v58 = vsub.s32 5, %v10816_v32  ;;  %v5396_v47 = vsub.s32 7, %v10816_v32 }
 0xa95   : > { %v6120_v19 = vpop.f32.mrb[76].mxu1  ;;  %v6163_v52 = vpop.f32.mrb[64].mxu0 }
 0xa96   : > { %v6121_v21 = vadd.f32 %v6120_v19, %v5369_v17  ;;  %v6164_v11 = vadd.f32 %v6163_v52, %v5377_v48  ;;  %v6122_v40 = vpop.f32.mrb[77].mxu1  ;;  %v6165_v30 = vpop.f32.mrb[65].mxu0  ;;  %v9863_v19 = vld [vmem:[%s10729_s17 + $0x170] sm:$0xff]  }
 0xa97   : > { %v6123_v44 = vadd.f32 %v6122_v40, %v5373_v46  ;;  %v6166_v28 = vadd.f32 %v6165_v30, %v5381_v51  ;;  %v6124_v55 = vpop.f32.mrb[78].mxu1  ;;  %v6167_v20 = vpop.f32.mrb[66].mxu0  ;;  %v9864_v52 = vld [vmem:[%s10729_s17 + $0x1f0] sm:$0xff]  }
 0xa98   : > { %v6125_v29 = vadd.f32 %v6124_v55, %v5369_v17  ;;  %v6168_v15 = vadd.f32 %v6167_v20, %v5377_v48  ;;  %v6126_v9 = vpop.f32.mrb[79].mxu1  ;;  %v6169_v5 = vpop.f32.mrb[67].mxu0  ;;  %v6430_v57 = vmax.f32 %v6121_v21, 0.0  ;;  %v6432_v56 = vmax.f32 %v6164_v11, 0.0  ;;  %v9861_v17 = vld [vmem:[%s10729_s17 + $0x128] sm:$0xff]  }
 0xa99   : > { %v6127_v38 = vadd.f32 %v6126_v9, %v5373_v46  ;;  %v6170_v14 = vadd.f32 %v6169_v5, %v5381_v51  ;;  %v6431_v37 = vmax.f32 %v6123_v44, 0.0  ;;  %v6433_v7 = vmax.f32 %v6166_v28, 0.0  ;;  %v9862_v48 = vld [vmem:[%s10729_s17 + $0x1a8] sm:$0xff]   ;;  %v9865_v44 = vld [vmem:[%s10729_s17 + $0x130] sm:$0xff]   ;;  %v9867_v9 = vld [vmem:[%s10729_s17 + $0x178] sm:$0xff]  }
 0xa9a   : > { %v6446_v62 = vmax.f32 %v6125_v29, 0.0  ;;  %v6448_v42 = vmax.f32 %v6168_v15, 0.0  ;;  %v5385_v46 = vrot.slane %v11520_v1, %v5384_v36  ;;  %v5393_v51 = vrot.slane %v11520_v1, %v5392_v25  ;;  %v9866_v28 = vld [vmem:[%s10729_s17 + $0x1b0] sm:$0xff]   ;;  %v9868_v5 = vld [vmem:[%s10729_s17 + $0x1f8] sm:$0xff]  }
 0xa9b   : > { %v6447_v18 = vmax.f32 %v6127_v38, 0.0  ;;  %v6449_v60 = vmax.f32 %v6170_v14, 0.0  ;;  %v5389_v21 = vrot.slane %v11520_v1, %v5388_v58  ;;  %v5397_v11 = vrot.slane %v11520_v1, %v5396_v47 }
 0xa9c   : > { %v6462_v24 = vpack.c.bf16 %v6446_v62, %v6430_v57  ;;  %v6464_v26 = vpack.c.bf16 %v6448_v42, %v6432_v56 }
 0xa9d   : > { %v6463_v54 = vpack.c.bf16 %v6447_v18, %v6431_v37  ;;  %v6465_v63 = vpack.c.bf16 %v6449_v60, %v6433_v7  ;;  %v9869_v60 = vld [vmem:[%s10729_s17 + $0x138] sm:$0xff]  }
 0xa9f   : > { %7541 = vmatprep.mubr.bf16.mxu1 %v6463_v54  ;;  %7582 = vmatprep.mubr.bf16.mxu0 %v6465_v63 }
 0xaa0   : > { %7542 = vmatmul.mubr.bf16.vlgmr.msra.gmra.mrb[92].mxu1 %v6462_v24  ;;  %7583 = vmatmul.mubr.bf16.vlgmr.msra.gmra.mrb[80].mxu0 %v6464_v26  ;;  %v9870_v24 = vld [vmem:[%s10729_s17 + $0x1b8] sm:$0xff]  }
 0xaa1   : > { %8729 = vmatpush3.bf16.msra.mxu1 %v9841_v34  ;;  %8751 = vmatpush3.bf16.msra.mxu0 %v9842_v2  ;;  %v9871_v2 = vld [vmem:[%s10729_s17 + $0x240] sm:$0xff]  }
 0xaa2   : > { %8730 = vmatprep.subr.bf16.mxu1 %v9843_v22  ;;  %8752 = vmatprep.subr.bf16.mxu0 %v9844_v53  ;;  %v9872_v22 = vld [vmem:[%s10729_s17 + $0x2c0] sm:$0xff]  }
 0xaa5   : > { %8731 = vmatpush3.bf16.msra.mxu1 %v9845_v16  ;;  %8753 = vmatpush3.bf16.msra.mxu0 %v9846_v6 }
 0xaa6   : > { %8732 = vmatprep.subr.bf16.mxu1 %v9847_v59  ;;  %8754 = vmatprep.subr.bf16.mxu0 %v9848_v61 }
 0xaa9   : > { %8733 = vmatpush3.bf16.msra.mxu1 %v9849_v49  ;;  %8755 = vmatpush3.bf16.msra.mxu0 %v9850_v3 }
 0xaaa   : > { %8734 = vmatprep.subr.bf16.mxu1 %v9851_v41  ;;  %8756 = vmatprep.subr.bf16.mxu0 %v9852_v10  ;;  %v9873_v10 = vld [vmem:[%s10729_s17 + $0x200] sm:$0xff]  }
 0xaad   : > { %8735 = vmatpush3.bf16.msra.mxu1 %v9853_v31  ;;  %8757 = vmatpush3.bf16.msra.mxu0 %v9854_v39  ;;  %v9874_v31 = vld [vmem:[%s10729_s17 + $0x280] sm:$0xff]   ;;  %v9875_v39 = vld [vmem:[%s10729_s17 + $0x248] sm:$0xff]  }
 0xaae   : > { %8736 = vmatprep.subr.bf16.mxu1 %v9855_v0  ;;  %8758 = vmatprep.subr.bf16.mxu0 %v9856_v12  ;;  %v9876_v0 = vld [vmem:[%s10729_s17 + $0x2c8] sm:$0xff]  }
 0xaaf   : > { %v9877_v12 = vld [vmem:[%s10729_s17 + $0x208] sm:$0xff]  }
 0xab1   : > { %8737 = vmatpush3.bf16.msra.mxu1 %v9857_v45  ;;  %8759 = vmatpush3.bf16.msra.mxu0 %v9858_v13  ;;  %v9878_v45 = vld [vmem:[%s10729_s17 + $0x288] sm:$0xff]   ;;  %v9879_v13 = vld [vmem:[%s10729_s17 + $0x250] sm:$0xff]  }
 0xab2   : > { %8738 = vmatprep.subr.bf16.mxu1 %v9859_v43  ;;  %8760 = vmatprep.subr.bf16.mxu0 %v9860_v4  ;;  %v9880_v43 = vld [vmem:[%s10729_s17 + $0x2d0] sm:$0xff]  }
 0xab3   : > { %v9881_v4 = vld [vmem:[%s10729_s17 + $0x210] sm:$0xff]  }
 0xab5   : > { %v6206_v40 = vpop.f32.mrb[80].mxu1  ;;  %v6249_v30 = vpop.f32.mrb[68].mxu0  ;;  %8739 = vmatpush3.bf16.msra.mxu1 %v9861_v17  ;;  %8761 = vmatpush3.bf16.msra.mxu0 %v9862_v48  ;;  %v9882_v17 = vld [vmem:[%s10729_s17 + $0x290] sm:$0xff]   ;;  %v9883_v48 = vld [vmem:[%s10729_s17 + $0x258] sm:$0xff]  }
 0xab6   : > { %v6207_v55 = vadd.f32 %v6206_v40, %v5385_v46  ;;  %v6250_v20 = vadd.f32 %v6249_v30, %v5393_v51  ;;  %v6208_v29 = vpop.f32.mrb[81].mxu1  ;;  %v6251_v15 = vpop.f32.mrb[69].mxu0  ;;  %8740 = vmatprep.subr.bf16.mxu1 %v9863_v19  ;;  %8762 = vmatprep.subr.bf16.mxu0 %v9864_v52  ;;  %v9886_v19 = vld [vmem:[%s10729_s17 + $0x298] sm:$0xff]   ;;  %v9887_v52 = vld [vmem:[%s10729_s17 + $0x260] sm:$0xff]   ;;  %v9891_v30 = vld [vmem:[%s10729_s17 + $0x268] sm:$0xff]  }
 0xab7   : > { %v6209_v38 = vadd.f32 %v6208_v29, %v5389_v21  ;;  %v6252_v14 = vadd.f32 %v6251_v15, %v5397_v11  ;;  %v6210_v57 = vpop.f32.mrb[82].mxu1  ;;  %v6253_v1 = vpop.f32.mrb[70].mxu0  ;;  %v9890_v40 = vld [vmem:[%s10729_s17 + $0x2a0] sm:$0xff]  }
 0xab8   : > { %v6211_v56 = vadd.f32 %v6210_v57, %v5385_v46  ;;  %v6254_v62 = vadd.f32 %v6253_v1, %v5393_v51  ;;  %v6212_v42 = vpop.f32.mrb[83].mxu1  ;;  %v6255_v37 = vpop.f32.mrb[71].mxu0  ;;  %v6434_v26 = vmax.f32 %v6207_v55, 0.0  ;;  %v6436_v54 = vmax.f32 %v6250_v20, 0.0  ;;  %v9884_v46 = vld [vmem:[%s10729_s17 + $0x2d8] sm:$0xff]   ;;  %v9893_v55 = vld [vmem:[%s10729_s17 + $0x228] sm:$0xff]  }
 0xab9   : > { %v6213_v7 = vadd.f32 %v6212_v42, %v5389_v21  ;;  %v6256_v18 = vadd.f32 %v6255_v37, %v5397_v11  ;;  %8741 = vmatpush3.bf16.msra.mxu1 %v9865_v44  ;;  %8763 = vmatpush3.bf16.msra.mxu0 %v9866_v28  ;;  %v6435_v53 = vmax.f32 %v6209_v38, 0.0  ;;  %v6437_v16 = vmax.f32 %v6252_v14, 0.0  ;;  %v9885_v51 = vld [vmem:[%s10729_s17 + $0x218] sm:$0xff]   ;;  %v9888_v21 = vld [vmem:[%s10729_s17 + $0x2e0] sm:$0xff]   ;;  %v9892_v44 = vld [vmem:[%s10729_s17 + $0x2e8] sm:$0xff]  }
 0xaba   : > { %v6450_v63 = vmax.f32 %v6211_v56, 0.0  ;;  %v6452_v34 = vmax.f32 %v6254_v62, 0.0  ;;  %8742 = vmatprep.subr.bf16.mxu1 %v9867_v9  ;;  %8764 = vmatprep.subr.bf16.mxu0 %v9868_v5  ;;  %v9889_v11 = vld [vmem:[%s10729_s17 + $0x220] sm:$0xff]   ;;  %v11601_v28 = vld [vmem:[%s10727_s25 + $0x8] sm:$0xff]  ;;  %v9895_v9 = vld [vmem:[%s10729_s17 + $0x270] sm:$0xff]  }
 0xabb   : > { %v6451_v6 = vmax.f32 %v6213_v7, 0.0  ;;  %v6453_v59 = vmax.f32 %v6256_v18, 0.0  ;;  %v9894_v20 = vld [vmem:[%s10729_s17 + $0x2a8] sm:$0xff]   ;;  %v5401_v29 = vrot.slane %v11601_v28, %v10819_v33  ;;  %v5409_v15 = vrot.slane %v11601_v28, %v10828_v50  ;;  %v9896_v5 = vld [vmem:[%s10729_s17 + $0x2f0] sm:$0xff]   ;;  %v9899_v7 = vld [vmem:[%s10729_s17 + $0x278] sm:$0xff]  }
 0xabc   : > { %v6466_v61 = vpack.c.bf16 %v6450_v63, %v6434_v26  ;;  %v6468_v49 = vpack.c.bf16 %v6452_v34, %v6436_v54  ;;  %v5405_v38 = vrot.slane %v11601_v28, %v10823_v35  ;;  %v5413_v14 = vrot.slane %v11601_v28, %v5380_v27  ;;  %v9897_v56 = vld [vmem:[%s10729_s17 + $0x230] sm:$0xff]   ;;  %v9900_v35 = vld [vmem:[%s10729_s17 + $0x2f8] sm:$0xff]  }
 0xabd   : > { %v6467_v3 = vpack.c.bf16 %v6451_v6, %v6435_v53  ;;  %v6469_v41 = vpack.c.bf16 %v6453_v59, %v6437_v16  ;;  %8743 = vmatpush3.bf16.msra.mxu1 %v9869_v60  ;;  %8765 = vmatpush3.bf16.msra.mxu0 %v9870_v24  ;;  %v9898_v33 = vld [vmem:[%s10729_s17 + $0x2b0] sm:$0xff]   ;;  %v9901_v53 = vld [vmem:[%s10729_s17 + $0x238] sm:$0xff]  }
 0xabe   : > { %8772 = vmatprep.subr.bf16.mxu1 %v9871_v2  ;;  %8794 = vmatprep.subr.bf16.mxu0 %v9872_v22  ;;  %v9902_v16 = vld [vmem:[%s10729_s17 + $0x2b8] sm:$0xff]  }
 0xabf   : > { %7623 = vmatprep.mubr.bf16.mxu1 %v6467_v3  ;;  %7664 = vmatprep.mubr.bf16.mxu0 %v6469_v41  ;;  %v9903_v3 = vld [vmem:[%s10729_s17 + $0x340] sm:$0xff]  }
 0xac0   : > { %7624 = vmatmul.mubr.bf16.vlgmr.msra.gmra.mrb[96].mxu1 %v6466_v61  ;;  %7665 = vmatmul.mubr.bf16.vlgmr.msra.gmra.mrb[84].mxu0 %v6468_v49  ;;  %v9904_v41 = vld [vmem:[%s10729_s17 + $0x3c0] sm:$0xff]  }
 0xac1   : > { %8773 = vmatpush3.bf16.msra.mxu1 %v9873_v10  ;;  %8795 = vmatpush3.bf16.msra.mxu0 %v9874_v31 }
 0xac2   : > { %8774 = vmatprep.subr.bf16.mxu1 %v9875_v39  ;;  %8796 = vmatprep.subr.bf16.mxu0 %v9876_v0 }
 0xac5   : > { %8775 = vmatpush3.bf16.msra.mxu1 %v9877_v12  ;;  %8797 = vmatpush3.bf16.msra.mxu0 %v9878_v45 }
 0xac6   : > { %8776 = vmatprep.subr.bf16.mxu1 %v9879_v13  ;;  %8798 = vmatprep.subr.bf16.mxu0 %v9880_v43 }
 0xac9   : > { %8777 = vmatpush3.bf16.msra.mxu1 %v9881_v4  ;;  %8799 = vmatpush3.bf16.msra.mxu0 %v9882_v17  ;;  %v9905_v4 = vld [vmem:[%s10729_s17 + $0x300] sm:$0xff]  }
 0xaca   : > { %8778 = vmatprep.subr.bf16.mxu1 %v9883_v48  ;;  %8800 = vmatprep.subr.bf16.mxu0 %v9884_v46  ;;  %v9906_v17 = vld [vmem:[%s10729_s17 + $0x380] sm:$0xff]   ;;  %v9907_v48 = vld [vmem:[%s10729_s17 + $0x348] sm:$0xff]  }
 0xacb   : > { %v9908_v46 = vld [vmem:[%s10729_s17 + $0x3c8] sm:$0xff]  }
 0xacd   : > { %8779 = vmatpush3.bf16.msra.mxu1 %v9885_v51  ;;  %8801 = vmatpush3.bf16.msra.mxu0 %v9886_v19  ;;  %v9909_v51 = vld [vmem:[%s10729_s17 + $0x308] sm:$0xff]  }
 0xace   : > { %8780 = vmatprep.subr.bf16.mxu1 %v9887_v52  ;;  %8802 = vmatprep.subr.bf16.mxu0 %v9888_v21  ;;  %v9910_v19 = vld [vmem:[%s10729_s17 + $0x388] sm:$0xff]   ;;  %v9911_v52 = vld [vmem:[%s10729_s17 + $0x350] sm:$0xff]  }
 0xacf   : > { %v9912_v21 = vld [vmem:[%s10729_s17 + $0x3d0] sm:$0xff]  }
 0xad1   : > { %8781 = vmatpush3.bf16.msra.mxu1 %v9889_v11  ;;  %8803 = vmatpush3.bf16.msra.mxu0 %v9890_v40  ;;  %v9913_v11 = vld [vmem:[%s10729_s17 + $0x310] sm:$0xff]  }
 0xad2   : > { %8782 = vmatprep.subr.bf16.mxu1 %v9891_v30  ;;  %8804 = vmatprep.subr.bf16.mxu0 %v9892_v44  ;;  %v9914_v40 = vld [vmem:[%s10729_s17 + $0x390] sm:$0xff]   ;;  %v9915_v30 = vld [vmem:[%s10729_s17 + $0x358] sm:$0xff]  }
 0xad3   : > { %v9916_v44 = vld [vmem:[%s10729_s17 + $0x3d8] sm:$0xff]  }
 0xad5   : > { %v6292_v57 = vpop.f32.mrb[84].mxu1  ;;  %v6335_v1 = vpop.f32.mrb[72].mxu0  ;;  %8783 = vmatpush3.bf16.msra.mxu1 %v9893_v55  ;;  %8805 = vmatpush3.bf16.msra.mxu0 %v9894_v20  ;;  %v9917_v55 = vld [vmem:[%s10729_s17 + $0x318] sm:$0xff]  }
 0xad6   : > { %v6293_v62 = vadd.f32 %v6292_v57, %v5401_v29  ;;  %v6336_v42 = vadd.f32 %v6335_v1, %v5409_v15  ;;  %v6294_v50 = vpop.f32.mrb[85].mxu1  ;;  %v6337_v37 = vpop.f32.mrb[73].mxu0  ;;  %8784 = vmatprep.subr.bf16.mxu1 %v9895_v9  ;;  %8806 = vmatprep.subr.bf16.mxu0 %v9896_v5  ;;  %v9918_v20 = vld [vmem:[%s10729_s17 + $0x398] sm:$0xff]   ;;  %v9921_v9 = vld [vmem:[%s10729_s17 + $0x320] sm:$0xff]   ;;  %v9925_v57 = vld [vmem:[%s10729_s17 + $0x328] sm:$0xff]  }
 0xad7   : > { %v6295_v18 = vadd.f32 %v6294_v50, %v5405_v38  ;;  %v6338_v60 = vadd.f32 %v6337_v37, %v5413_v14  ;;  %v6296_v24 = vpop.f32.mrb[86].mxu1  ;;  %v6339_v27 = vpop.f32.mrb[74].mxu0  ;;  %v9922_v5 = vld [vmem:[%s10729_s17 + $0x3a0] sm:$0xff]   ;;  %v9926_v1 = vld [vmem:[%s10729_s17 + $0x3a8] sm:$0xff]   ;;  %v5421_v50 = vrot.slane %v11601_v28, %v5388_v58  ;;  %v5429_v37 = vrot.slane %v11601_v28, %v5396_v47  ;;  %v9932_v58 = vld [vmem:[%s10729_s17 + $0x3f8] sm:$0xff]  }
 0xad8   : > { %v6297_v26 = vadd.f32 %v6296_v24, %v5401_v29  ;;  %v6340_v54 = vadd.f32 %v6339_v27, %v5409_v15  ;;  %v6298_v63 = vpop.f32.mrb[87].mxu1  ;;  %v6341_v34 = vpop.f32.mrb[75].mxu0  ;;  %v6438_v6 = vmax.f32 %v6293_v62, 0.0  ;;  %v6440_v59 = vmax.f32 %v6336_v42, 0.0  ;;  %v9919_v29 = vld [vmem:[%s10729_s17 + $0x360] sm:$0xff]   ;;  %v9927_v62 = vld [vmem:[%s10729_s17 + $0x370] sm:$0xff]  }
 0xad9   : > { %v6299_v2 = vadd.f32 %v6298_v63, %v5405_v38  ;;  %v6342_v22 = vadd.f32 %v6341_v34, %v5413_v14  ;;  %8785 = vmatpush3.bf16.msra.mxu1 %v9897_v56  ;;  %8807 = vmatpush3.bf16.msra.mxu0 %v9898_v33  ;;  %v6439_v10 = vmax.f32 %v6295_v18, 0.0  ;;  %v6441_v31 = vmax.f32 %v6338_v60, 0.0  ;;  %v9920_v15 = vld [vmem:[%s10729_s17 + $0x3e0] sm:$0xff]   ;;  %v9923_v38 = vld [vmem:[%s10729_s17 + $0x368] sm:$0xff]   ;;  %v9928_v42 = vld [vmem:[%s10729_s17 + $0x3f0] sm:$0xff]  }
 0xada   : > { %v6454_v61 = vmax.f32 %v6297_v26, 0.0  ;;  %v6456_v49 = vmax.f32 %v6340_v54, 0.0  ;;  %8786 = vmatprep.subr.bf16.mxu1 %v9899_v7  ;;  %8808 = vmatprep.subr.bf16.mxu0 %v9900_v35  ;;  %v9924_v14 = vld [vmem:[%s10729_s17 + $0x3e8] sm:$0xff]   ;;  %v5417_v56 = vrot.slane %v11601_v28, %v5384_v36  ;;  %v5425_v33 = vrot.slane %v11601_v28, %v5392_v25  ;;  %v9929_v36 = vld [vmem:[%s10729_s17 + $0x330] sm:$0xff]   ;;  %v9931_v26 = vld [vmem:[%s10729_s17 + $0x378] sm:$0xff]  }
 0xadb   : > { %v6455_v39 = vmax.f32 %v6299_v2, 0.0  ;;  %v6457_v0 = vmax.f32 %v6342_v22, 0.0  ;;  %v9930_v18 = vld [vmem:[%s10729_s17 + $0x3b0] sm:$0xff]  }
 0xadc   : > { %v6470_v12 = vpack.c.bf16 %v6454_v61, %v6438_v6  ;;  %v6472_v45 = vpack.c.bf16 %v6456_v49, %v6440_v59  ;;  %v9933_v6 = vld [vmem:[%s10729_s17 + $0x338] sm:$0xff]  }
 0xadd   : > { %v6471_v13 = vpack.c.bf16 %v6455_v39, %v6439_v10  ;;  %v6473_v43 = vpack.c.bf16 %v6457_v0, %v6441_v31  ;;  %8787 = vmatpush3.bf16.msra.mxu1 %v9901_v53  ;;  %8809 = vmatpush3.bf16.msra.mxu0 %v9902_v16  ;;  %v9934_v59 = vld [vmem:[%s10729_s17 + $0x3b8] sm:$0xff]  }
 0xade   : > { %8816 = vmatprep.subr.bf16.mxu1 %v9903_v3  ;;  %8838 = vmatprep.subr.bf16.mxu0 %v9904_v41 }
 0xadf   : > { %7705 = vmatprep.mubr.bf16.mxu1 %v6471_v13  ;;  %7746 = vmatprep.mubr.bf16.mxu0 %v6473_v43 }
 0xae0   : > { %7706 = vmatmul.mubr.bf16.vlgmr.msra.gmra.mrb[100].mxu1 %v6470_v12  ;;  %7747 = vmatmul.mubr.bf16.vlgmr.msra.gmra.mrb[88].mxu0 %v6472_v45 }
 0xae1   : > { %8817 = vmatpush3.bf16.msra.mxu1 %v9905_v4  ;;  %8839 = vmatpush3.bf16.msra.mxu0 %v9906_v17 }
 0xae2   : > { %8818 = vmatprep.subr.bf16.mxu1 %v9907_v48  ;;  %8840 = vmatprep.subr.bf16.mxu0 %v9908_v46  ;;  %v8453_v48 = vld [vmem:[%s776_s3] ss:$0 sm:$0xff] }
 0xae5   : > { %8819 = vmatpush3.bf16.msra.mxu1 %v9909_v51  ;;  %8841 = vmatpush3.bf16.msra.mxu0 %v9910_v19 }
 0xae6   : > { %8820 = vmatprep.subr.bf16.mxu1 %v9911_v52  ;;  %8842 = vmatprep.subr.bf16.mxu0 %v9912_v21 }
 0xae9   : > { %8821 = vmatpush3.bf16.msra.mxu1 %v9913_v11  ;;  %8843 = vmatpush3.bf16.msra.mxu0 %v9914_v40 }
 0xaea   : > { %8822 = vmatprep.subr.bf16.mxu1 %v9915_v30  ;;  %8844 = vmatprep.subr.bf16.mxu0 %v9916_v44 }
 0xaed   : > { %8823 = vmatpush3.bf16.msra.mxu1 %v9917_v55  ;;  %8845 = vmatpush3.bf16.msra.mxu0 %v9918_v20 }
 0xaee   : > { %8824 = vmatprep.subr.bf16.mxu1 %v9919_v29  ;;  %8846 = vmatprep.subr.bf16.mxu0 %v9920_v15 }
 0xaf1   : > { %8825 = vmatpush3.bf16.msra.mxu1 %v9921_v9  ;;  %8847 = vmatpush3.bf16.msra.mxu0 %v9922_v5 }
 0xaf2   : > { %8826 = vmatprep.subr.bf16.mxu1 %v9923_v38  ;;  %8848 = vmatprep.subr.bf16.mxu0 %v9924_v14 }
 0xaf5   : > { %v6378_v7 = vpop.f32.mrb[88].mxu1  ;;  %v6421_v35 = vpop.f32.mrb[76].mxu0  ;;  %8827 = vmatpush3.bf16.msra.mxu1 %v9925_v57  ;;  %8849 = vmatpush3.bf16.msra.mxu0 %v9926_v1 }
 0xaf6   : > { %v6379_v60 = vadd.f32 %v6378_v7, %v5417_v56  ;;  %v6422_v25 = vadd.f32 %v6421_v35, %v5425_v33  ;;  %v6380_v24 = vpop.f32.mrb[89].mxu1  ;;  %v6423_v27 = vpop.f32.mrb[77].mxu0  ;;  %8828 = vmatprep.subr.bf16.mxu1 %v9927_v62  ;;  %8850 = vmatprep.subr.bf16.mxu0 %v9928_v42 }
 0xaf7   : > { %v6381_v54 = vadd.f32 %v6380_v24, %v5421_v50  ;;  %v6424_v32 = vadd.f32 %v6423_v27, %v5429_v37  ;;  %v6382_v63 = vpop.f32.mrb[90].mxu1  ;;  %v6425_v47 = vpop.f32.mrb[78].mxu0 }
 0xaf8   : > { %v6383_v28 = vadd.f32 %v6382_v63, %v5417_v56  ;;  %v6426_v34 = vadd.f32 %v6425_v47, %v5425_v33  ;;  %v6384_v2 = vpop.f32.mrb[91].mxu1  ;;  %v6427_v22 = vpop.f32.mrb[79].mxu0  ;;  %v6442_v61 = vmax.f32 %v6379_v60, 0.0  ;;  %v6444_v49 = vmax.f32 %v6422_v25, 0.0 }
 0xaf9   : > { %v6385_v53 = vadd.f32 %v6384_v2, %v5421_v50  ;;  %v6428_v16 = vadd.f32 %v6427_v22, %v5429_v37  ;;  %8829 = vmatpush3.bf16.msra.mxu1 %v9929_v36  ;;  %8851 = vmatpush3.bf16.msra.mxu0 %v9930_v18  ;;  %v6443_v10 = vmax.f32 %v6381_v54, 0.0  ;;  %v6445_v31 = vmax.f32 %v6424_v32, 0.0 }
 0xafa   : > { %v6458_v3 = vmax.f32 %v6383_v28, 0.0  ;;  %v6460_v41 = vmax.f32 %v6426_v34, 0.0  ;;  %8830 = vmatprep.subr.bf16.mxu1 %v9931_v26  ;;  %8852 = vmatprep.subr.bf16.mxu0 %v9932_v58 }
 0xafb   : > { %v6459_v39 = vmax.f32 %v6385_v53, 0.0  ;;  %v6461_v0 = vmax.f32 %v6428_v16, 0.0 }
 0xafc   : > { %v6474_v12 = vpack.c.bf16 %v6458_v3, %v6442_v61  ;;  %v6476_v45 = vpack.c.bf16 %v6460_v41, %v6444_v49 }
 0xafd   : > { %v6475_v13 = vpack.c.bf16 %v6459_v39, %v6443_v10  ;;  %v6477_v43 = vpack.c.bf16 %v6461_v0, %v6445_v31  ;;  %8831 = vmatpush3.bf16.msra.mxu1 %v9933_v6  ;;  %8853 = vmatpush3.bf16.msra.mxu0 %v9934_v59 }
 0xaff   : > { %7787 = vmatprep.mubr.bf16.mxu1 %v6475_v13  ;;  %7828 = vmatprep.mubr.bf16.mxu0 %v6477_v43 }
 0xb00   : > { %7788 = vmatmul.mubr.bf16.vlgmr.msra.gmra.mrb[104].mxu1 %v6474_v12  ;;  %7829 = vmatmul.mubr.bf16.vlgmr.msra.gmra.mrb[92].mxu0 %v6476_v45 }
 0xb73   : > { %v8700_v4 = vpop.f32.mrb[92].mxu1  ;;  %v8722_v17 = vpop.f32.mrb[80].mxu0 }
 0xb74   : > { %v8701_v46 = vpop.f32.mrb[93].mxu1  ;;  %v8723_v51 = vpop.f32.mrb[81].mxu0 }
 0xb75   : > { %v8702_v19 = vadd.f32 %v8701_v46, %v8700_v4  ;;  %v8724_v52 = vadd.f32 %v8723_v51, %v8722_v17  ;;  %v8703_v21 = vpop.f32.mrb[94].mxu1  ;;  %v8725_v11 = vpop.f32.mrb[82].mxu0 }
 0xb76   : > { %v8704_v40 = vpop.f32.mrb[95].mxu1  ;;  %v8726_v30 = vpop.f32.mrb[83].mxu0 }
 0xb77   : > { %v7544_v44 = vadd.f32 %v8702_v19, %v8453_v48  ;;  %v8705_v55 = vadd.f32 %v8704_v40, %v8703_v21  ;;  %v8727_v20 = vadd.f32 %v8726_v30, %v8725_v11 }
 0xb79   : > { %v7585_v29 = vadd.f32 %v8724_v52, %v7544_v44  ;;  %v7547_v15 = vadd.f32 %v8705_v55, %v8453_v48 }
 0xb7b   : > { %v7588_v9 = vadd.f32 %v8727_v20, %v7547_v15 }
 0xb93   : > { %v8744_v5 = vpop.f32.mrb[96].mxu1  ;;  %v8766_v38 = vpop.f32.mrb[84].mxu0 }
 0xb94   : > { %v8745_v14 = vpop.f32.mrb[97].mxu1  ;;  %v8767_v57 = vpop.f32.mrb[85].mxu0 }
 0xb95   : > { %v8746_v1 = vadd.f32 %v8745_v14, %v8744_v5  ;;  %v8768_v56 = vadd.f32 %v8767_v57, %v8766_v38  ;;  %v8747_v33 = vpop.f32.mrb[98].mxu1  ;;  %v8769_v62 = vpop.f32.mrb[86].mxu0  ;;  %v8582_v38 = vld [vmem:[%s779_s13] ss:$0 sm:$0xff] }
 0xb96   : > { %v8748_v42 = vpop.f32.mrb[99].mxu1  ;;  %v8770_v50 = vpop.f32.mrb[87].mxu0  ;;  %v8583_v57 = vld [vmem:[%s782_s28] ss:$0 sm:$0xff] }
 0xb97   : > { %v7626_v37 = vadd.f32 %v8746_v1, %v7585_v29  ;;  %v8749_v7 = vadd.f32 %v8748_v42, %v8747_v33  ;;  %v8771_v35 = vadd.f32 %v8770_v50, %v8769_v62 }
 0xb99   : > { %v7667_v36 = vadd.f32 %v8768_v56, %v7626_v37  ;;  %v7629_v18 = vadd.f32 %v8749_v7, %v7588_v9  ;;  %v10009_v37 = vld [vmem:[#allocation14] sm:$0xff] (!%p8584_p13)   ;;  %v10322_v7 = vmov (!%p8584_p13), 0.0  }
 0xb9a   : > { %9101 = vmatprep.subr.bf16.mxu0 (!%p8584_p13), %v10322_v7  ;;  %9117 = vmatprep.mubr.msk.bf16.mxu0 (!%p8584_p13), %vm10323_vm4, %v10322_v7 }
 0xb9b   : > { %v7670_v60 = vadd.f32 %v8771_v35, %v7629_v18  ;;  %9102 = vmatpush3.bf16.msra.mxu0 (!%p8584_p13), %v10009_v37  ;;  %v10010_v35 = vld [vmem:[#allocation14 + $0x8] sm:$0xff] (!%p8584_p13)   ;;  %v10012_v18 = vld [vmem:[#allocation14 + $0x18] sm:$0xff] (!%p8584_p13)  }
 0xb9c   : > { %9103 = vmatprep.subr.bf16.mxu0 (!%p8584_p13), %v10322_v7 }
 0xb9f   : > { %9104 = vmatpush3.bf16.msra.mxu0 (!%p8584_p13), %v10010_v35 }
 0xba0   : > { %9105 = vmatprep.subr.bf16.mxu0 (!%p8584_p13), %v10322_v7 }
 0xbb3   : > { %v8788_v25 = vpop.f32.mrb[100].mxu1  ;;  %v8810_v24 = vpop.f32.mrb[88].mxu0 }
 0xbb4   : > { %v8789_v27 = vpop.f32.mrb[101].mxu1  ;;  %v8811_v26 = vpop.f32.mrb[89].mxu0 }
 0xbb5   : > { %v8790_v58 = vadd.f32 %v8789_v27, %v8788_v25  ;;  %v8812_v54 = vadd.f32 %v8811_v26, %v8810_v24  ;;  %v8791_v32 = vpop.f32.mrb[102].mxu1  ;;  %v8813_v63 = vpop.f32.mrb[90].mxu0  ;;  %v10014_v25 = vld [vmem:[#allocation14 + $0x28] sm:$0xff] (!%p8584_p13)   ;;  %v10015_v24 = vld [vmem:[#allocation14 + $0x30] sm:$0xff] (!%p8584_p13)   ;;  %v10016_v27 = vld [vmem:[#allocation14 + $0x38] sm:$0xff] (!%p8584_p13)  }
 0xbb6   : > { %v8792_v47 = vpop.f32.mrb[103].mxu1  ;;  %v8814_v28 = vpop.f32.mrb[91].mxu0 }
 0xbb7   : > { %v7708_v34 = vadd.f32 %v8790_v58, %v7667_v36  ;;  %v8793_v2 = vadd.f32 %v8792_v47, %v8791_v32  ;;  %v8815_v22 = vadd.f32 %v8814_v28, %v8813_v63  ;;  %v10011_v36 = vld [vmem:[#allocation14 + $0x10] sm:$0xff] (!%p8584_p13)   ;;  %v8585_v58 = vld [vmem:[%s11824_s20] ss:$0 sm:$0xff] (!%p8584_p13) }
 0xbb8   : > { %9106 = vmatpush3.bf16.msra.mxu0 (!%p8584_p13), %v10011_v36 }
 0xbb9   : > { %v7749_v53 = vadd.f32 %v8812_v54, %v7708_v34  ;;  %v7711_v16 = vadd.f32 %v8793_v2, %v7670_v60  ;;  %9107 = vmatprep.subr.bf16.mxu0 (!%p8584_p13), %v10322_v7  ;;  %v10013_v60 = vld [vmem:[#allocation14 + $0x20] sm:$0xff] (!%p8584_p13)  }
 0xbbb   : > { %v7752_v6 = vadd.f32 %v8815_v22, %v7711_v16 }
 0xbbc   : > { %9108 = vmatpush3.bf16.msra.mxu0 (!%p8584_p13), %v10012_v18 }
 0xbbd   : > { %9109 = vmatprep.subr.bf16.mxu0 (!%p8584_p13), %v10322_v7 }
 0xbc0   : > { %9110 = vmatpush3.bf16.msra.mxu0 (!%p8584_p13), %v10013_v60 }
 0xbc1   : > { %9111 = vmatprep.subr.bf16.mxu0 (!%p8584_p13), %v10322_v7 }
 0xbc4   : > { %9112 = vmatpush3.bf16.msra.mxu0 (!%p8584_p13), %v10014_v25 }
 0xbc5   : > { %9113 = vmatprep.subr.bf16.mxu0 (!%p8584_p13), %v10322_v7 }
 0xbc8   : > { %9114 = vmatpush3.bf16.msra.mxu0 (!%p8584_p13), %v10015_v24 }
 0xbc9   : > { %9115 = vmatprep.subr.bf16.mxu0 (!%p8584_p13), %v10322_v7 }
 0xbcc   : > { %9116 = vmatpush3.bf16.msra.mxu0 (!%p8584_p13), %v10016_v27 }
 0xbd3   : > { %v8832_v59 = vpop.f32.mrb[104].mxu1  ;;  %v8854_v61 = vpop.f32.mrb[92].mxu0 }
 0xbd4   : > { %v8833_v49 = vpop.f32.mrb[105].mxu1  ;;  %v8855_v3 = vpop.f32.mrb[93].mxu0 }
 0xbd5   : > { %v8834_v41 = vadd.f32 %v8833_v49, %v8832_v59  ;;  %v8856_v10 = vadd.f32 %v8855_v3, %v8854_v61  ;;  %v8835_v31 = vpop.f32.mrb[106].mxu1  ;;  %v8857_v39 = vpop.f32.mrb[94].mxu0 }
 0xbd6   : > { %v8836_v0 = vpop.f32.mrb[107].mxu1  ;;  %v8858_v12 = vpop.f32.mrb[95].mxu0 }
 0xbd7   : > { %v7790_v45 = vadd.f32 %v8834_v41, %v7749_v53  ;;  %v8837_v13 = vadd.f32 %v8836_v0, %v8835_v31  ;;  %v8859_v43 = vadd.f32 %v8858_v12, %v8857_v39 }
 0xbd9   : > { %v7831_v4 = vadd.f32 %v8856_v10, %v7790_v45  ;;  %v7793_v17 = vadd.f32 %v8837_v13, %v7752_v6 }
 0xbdb   : > { %v7834_v48 = vadd.f32 %v8859_v43, %v7793_v17  ;;  %v7837_v46 = vadd.f32 %v7831_v4, %v11375_v8 }
 0xbdd   : > { %7841 = vadd.xlane.f32.xlu1 %v7837_v46  ;;  %v7838_v51 = vadd.f32 %v7834_v48, %v11377_v23 }
 0xbe1   : > { %7843 = vadd.xlane.f32.xlu1 %v7838_v51 }
 0xc6a   : > { %v7842_v19 = vpop.xlane.xlu1 %7841 }
 0xc6b   : > { %v7845_v52 = vmul.f32 0.0078125, %v7842_v19 }
 0xc6d   : > { %v7847_v21 = vsub.f32 %v7837_v46, %v7845_v52 }
 0xc6e   : > { %v7844_v11 = vpop.xlane.xlu1 %7843 }
 0xc6f   : > { %v7846_v40 = vmul.f32 0.0078125, %v7844_v11  ;;  %v7849_v30 = vmul.f32 %v7847_v21, %v7847_v21 }
 0xc71   : > { %v7848_v44 = vsub.f32 %v7838_v51, %v7846_v40  ;;  %7851 = vadd.xlane.f32.xlu0 %v7849_v30 }
 0xc73   : > { %v7850_v55 = vmul.f32 %v7848_v44, %v7848_v44 }
 0xc75   : > { %7853 = vadd.xlane.f32.xlu1 %v7850_v55 }
 0xcfe   : > { %v7852_v20 = vpop.xlane.xlu0 %7851 }
 0xcff   : > { %v7855_v29 = vmul.f32 0.0078125, %v7852_v20 }
 0xd01   : > { %v7857_v15 = vadd.f32 1e-05, %v7855_v29 }
 0xd02   : > { %v7854_v8 = vpop.xlane.xlu1 %7853 }
 0xd03   : > { %10003 = vrsqrt.f32 %v7857_v15  ;;  %v7856_v9 = vmul.f32 0.0078125, %v7854_v8 }
 0xd05   : > { %v7858_v23 = vadd.f32 1e-05, %v7856_v9 }
 0xd07   : > { %10005 = vrsqrt.f32 %v7858_v23 }
 0xd0d   : > { %v10004_v5 = vpop.eup %10003 }
 0xd0e   : > { %v7861_v14 = vmul.f32 %v10004_v5, %v7847_v21 }
 0xd10   : > { %v7869_v1 = vmul.f32 %v8582_v38, %v7861_v14 }
 0xd11   : > { %v10006_v56 = vpop.eup %10005 }
 0xd12   : > { %v7877_v33 = vadd.f32 %v8583_v57, %v7869_v1  ;;  %v7862_v62 = vmul.f32 %v10006_v56, %v7848_v44  ;;  %7884 = sbr.rel (%p8584_p13) target bundleno = 3571 (0xdf3), region = 116 }
 0xd14   : > { %7879 = vst [vmem:[#allocation2] sm:$0xff] %v7877_v33  ;;  %v7870_v42 = vmul.f32 %v8582_v38, %v7862_v62 }
 0xd16   : > { %v7878_v50 = vadd.f32 %v8583_v57, %v7870_v42 }
 0xd18   : > { %7880 = vst [vmem:[#allocation2 + $0x8] sm:$0xff] %v7878_v50  ;;  %v7885_v26 = vpack.c.bf16 (!%p8584_p13), %v7878_v50, %v7877_v33 }
 0xd1a   : > { %9118 = vmatmul.mubr.bf16.vlgmr.msra.gmra.mrb[0].mxu0 %v7885_v26 }
 0xded   : > { %v7991_v54 = vpop.f32.mrb[0].mxu0 }
 0xdee   : > { %v7992_v32 = vadd.f32 %v8585_v58, %v7991_v54  ;;  %v9119_v63 = vpop.f32.mrb[1].mxu0 }
 0xdef   : > { %v7994_v47 = vpop.f32.mrb[2].mxu0 }
 0xdf0   : > { %7998 = vst [vmem:[#allocation15] sm:$0xff] %v7992_v32  ;;  %v7995_v28 = vadd.f32 %v8585_v58, %v7994_v47  ;;  %v9120_v34 = vpop.f32.mrb[3].mxu0 }
 0xdf2   : > { %7999 = vst [vmem:[#allocation15 + $0x8] sm:$0xff] %v7995_v28 }
 0xdf3 PF: > { %p9175_p3 = scmp.eq.s32.totalorder %s10426_s22, 1  ;;  %s10324_s5 = smov [#allocation15]  }
 0xdf4   : > { %s8006_s7 = sshll.u32 %s10324_s5, 4  ;;  %s8007_s7 = int_to_ptr.vmem [resolvable:$true] %s8006_s7 }
 0xdf5   : > { %s10223_s13 = scalar_lea.vmem %s8007_s7, 256  ;;  %p10230_p7 = scmp.lt.s32.totalorder %s8007_s7, %s8007_s7 }
 0xdf6   : > { %p10224_p2 = scmp.ne.s32.totalorder %s8007_s7, %s10223_s13  ;;  %p10231_p10 = scmp.lt.s32.totalorder %s10223_s13, %s10223_s13 }
 0xdf8   : > { %p10225_p1 = pnand %p10224_p2, %p9175_p3  ;;  %p10232_p6 = por %p10231_p10, %p10230_p7 }
 0xdfa   : > { %p10226_p11 = pneg %p10225_p1 }
 0xdfc   : > { %p10233_p0 = pnand %p10232_p6, %p10226_p11 }
 0xdfe   : > { %10236 = shalt.err (!%p10233_p0)
}
 0xdff   : > { %s11825_s28 = sld [smem:[#allocation40_spill]] }
 0xe05   : > { %s10237_s0 = scalar_lea.hbm %s11825_s28, 256 }
 0xe06   : > { %p10238_p4 = scmp.ne.s32.totalorder %s11825_s28, %s10237_s0  ;;  %p10243_p5 = scmp.lt.u32.totalorder %s10237_s0, %s11825_s28 }
 0xe08   : > { %p10239_p12 = pnand %p10238_p4, %p9175_p3 }
 0xe0a   : > { %p10240_p8 = pneg %p10239_p12 }
 0xe0c   : > { %p10245_p9 = pnand %p10243_p5, %p10240_p8 }
 0xe0e   : > { %10248 = shalt.err (!%p10245_p9)
}
 0xe0f   : > { %s10325_s21 = smov 128   ;;  %s10326_s12 = smov 8  }
 0xe10   : > { %9144 = dma.vmem_to_hbm [thread:$0]  (%p9175_p3), %s8007_s7, 256, %s11825_s28, [#allocation5], %s10325_s21, %s10325_s21, %s10326_s12  }
 0xe11   : > { %10286 = dma.done.wait (%p9175_p3), [#allocation5], 256  }
 0xe12   : > { %10288 = vsyncadd (%p9175_p3), [#allocation5], 4294967040 }
 0xe13 PF: > { %s11826_s21 = sld [smem:[#allocation23_spill]]  ;;  %s11827_s24 = sld [smem:[#allocation22_spill]] }
 0xe14   : > { %s11828_s20 = sld [smem:[#allocation24_spill]]  ;;  %s11829_s18 = smov %s10295_s19 }
 0xe19   : > { %p33_p13 = scmp.ge.s32.totalorder %s11826_s21, 4   ;;  %s11830_s19 = smov %s11827_s24 }
 0xe1b   :  { %35 = sbr.rel (!%p33_p13) target bundleno = 25 (0x19), region = 203 }
 0xe22   :  { %8022 = vsyncpa [#allocation4], 1 }
 0xe23   :  { %8024 = vsyncpa [#allocation4 + $0x1], 1 }
 0xe24   :  { %8025 = vsyncpa [#allocation7], 1 }
 0xe25   :  { %8027 = vsyncpa [#allocation7 + $0x1], 1 }
 0xe26   :  { %8028 = vsyncpa [#allocation10], 1 }
 0xe27   :  { %8030 = vsyncpa [#allocation10 + $0x1], 1 }
 0xe28   :  { %8031 = vsyncpa [#allocation13], 1 }
 0xe29   :  { %8033 = vsyncpa [#allocation13 + $0x1], 1 }
 0xe2a   :  { %8034 = vsyncpa [#allocation5], 1 }
 0xe2b   :  { %8036 = vsyncpa [#allocation5 + $0x1], 1 }

</bundles_post_ra>
